<compile_context>
chip_gen: v6e
topology: v6e:2x2x1
jax: 0.10.0
libtpu: 0.0.40
codegen_flags: <defaults>
</compile_context>

<pallas_src>
import functools
import math

import jax
import jax.numpy as jnp
from jax.experimental import pallas as pl
from jax.experimental.pallas import tpu as pltpu

_VMEM_LIMIT = 32 * 1024 * 1024   # explicit scoped-VMEM budget; safe on v5e/v6e/v7x


def _round_up(x, m):
    return ((x + m - 1) // m) * m


# ---------------------------------------------------------------------------
# Kernel 1: fused (matmul * scale + shift [+ ReLU]) on the MXU.
#   conv layers (im2col): scale/shift = folded eval-mode BatchNorm.
# Activations cast to bf16 in-kernel; accumulate + scale/shift in f32; output
# stored in o_ref.dtype (bf16 for the conv chain).
# ---------------------------------------------------------------------------
def _mm_scale_shift_kernel(x_ref, w_ref, s_ref, b_ref, o_ref, *, relu):
    acc = jnp.dot(x_ref[...].astype(jnp.bfloat16),
                  w_ref[...].astype(jnp.bfloat16),
                  preferred_element_type=jnp.float32)
    acc = acc * s_ref[...] + b_ref[...]
    if relu:
        acc = jnp.maximum(acc, 0.0)
    o_ref[...] = acc.astype(o_ref.dtype)


def mm_scale_shift(x, w, scale, shift, relu=False, out_dtype=jnp.float32, tm=512):
    """y = act((x @ w) * scale + shift); M tiled (padded to a tile multiple) so
    large batch*seq never exceeds VMEM; weights/scale/shift stay resident."""
    M, K = x.shape
    Kw, N = w.shape
    assert K == Kw
    tm = min(tm, _round_up(M, 8))
    Mp = _round_up(M, tm)
    if Mp != M:
        x = jnp.pad(x, ((0, Mp - M), (0, 0)))
    kern = functools.partial(_mm_scale_shift_kernel, relu=relu)
    out = pl.pallas_call(
        kern,
        out_shape=jax.ShapeDtypeStruct((Mp, N), out_dtype),
        grid=(Mp // tm,),
        in_specs=[
            pl.BlockSpec((tm, K), lambda i: (i, 0)),
            pl.BlockSpec((K, N), lambda i: (0, 0)),
            pl.BlockSpec((1, N), lambda i: (0, 0)),
            pl.BlockSpec((1, N), lambda i: (0, 0)),
        ],
        out_specs=pl.BlockSpec((tm, N), lambda i: (i, 0)),
        compiler_params=pltpu.CompilerParams(
            dimension_semantics=("parallel",),
            vmem_limit_bytes=_VMEM_LIMIT),
    )(x, w,
      scale.reshape(1, N).astype(jnp.float32),
      shift.reshape(1, N).astype(jnp.float32))
    return out[:M] if Mp != M else out


# ---------------------------------------------------------------------------
# Kernel 2: fused fc1 + hoisted LSTM layer-0 input projection.
#   gx = (relu(flat @ W1 + b1)) @ [Wih0_fwd | Wih0_rev] + (b_ih + b_hh)
# h1 never leaves VMEM.  Rows are already in t*B+b order, so gx reshapes
# directly to (T, B, 8H) with no transpose.
# ---------------------------------------------------------------------------
def _fc1_inproj_kernel(x_ref, w1_ref, b1_ref, wg_ref, bg_ref, o_ref):
    h1 = jnp.dot(x_ref[...].astype(jnp.bfloat16), w1_ref[...],
                 preferred_element_type=jnp.float32) + b1_ref[...]
    h1 = jnp.maximum(h1, 0.0)
    o_ref[...] = jnp.dot(h1.astype(jnp.bfloat16), wg_ref[...],
                         preferred_element_type=jnp.float32) + bg_ref[...]


def fc1_lstm_inproj(x, w1, b1, wg, bg, tm=512):
    M, K = x.shape
    HP = w1.shape[1]
    G2 = wg.shape[1]
    tm = min(tm, _round_up(M, 8))
    Mp = _round_up(M, tm)
    if Mp != M:
        x = jnp.pad(x, ((0, Mp - M), (0, 0)))
    out = pl.pallas_call(
        _fc1_inproj_kernel,
        out_shape=jax.ShapeDtypeStruct((Mp, G2), jnp.float32),
        grid=(Mp // tm,),
        in_specs=[
            pl.BlockSpec((tm, K), lambda i: (i, 0)),
            pl.BlockSpec((K, HP), lambda i: (0, 0)),
            pl.BlockSpec((1, HP), lambda i: (0, 0)),
            pl.BlockSpec((HP, G2), lambda i: (0, 0)),
            pl.BlockSpec((1, G2), lambda i: (0, 0)),
        ],
        out_specs=pl.BlockSpec((tm, G2), lambda i: (i, 0)),
        compiler_params=pltpu.CompilerParams(
            dimension_semantics=("parallel",),
            vmem_limit_bytes=_VMEM_LIMIT),
    )(x, w1, b1, wg, bg)
    return out[:M] if Mp != M else out


# ---------------------------------------------------------------------------
# Kernel 3: LSTM layer 0, both directions, grid=(2,) ("parallel" -> one
# direction per TensorCore on v7x), time loop in-kernel.  Per step exactly one
# MXU matmul: h_t(bf16) @ [Whh | Wih1_half] -> (B, 8H) whose first half is the
# NEXT step's recurrent gate contribution (value carry `rec`) and whose second
# half is gp[t] = layer-1's input projection of h_t, stored lane-dense.
# Gate order i, f, g, o (PyTorch).  gx = x_t @ Wih + (b_ih+b_hh) is precomputed.
# h/c/rec are fori_loop carries -> no scratch shared across the parallel axis.
# ---------------------------------------------------------------------------
def _lstm_layer0_kernel(gx_ref, wfused_ref, gp_ref, *, T, B, H):
    d = pl.program_id(0)                      # 0 = forward, 1 = reverse
    G = 4 * H
    wf = wfused_ref[0]                        # (H, 8H) bf16, resident

    # Full-width gate activation: tanh on the g-lane block, sigmoid elsewhere.
    lane = jax.lax.broadcasted_iota(jnp.int32, (B, G), 1)
    g_mask = (lane >= 2 * H) & (lane < 3 * H)

    def step(s, carry):
        h, c, rec = carry                     # (B,H), (B,H), (B,4H) f32
        idx = d * (T - 1) + (1 - 2 * d) * s   # d=0: s, d=1: T-1-s
        gates = gx_ref[idx] + rec
        act = jnp.where(g_mask, jnp.tanh(gates), jax.nn.sigmoid(gates))
        i_g = act[:, 0 * H:1 * H]
        f_g = act[:, 1 * H:2 * H]
        g_g = act[:, 2 * H:3 * H]
        o_g = act[:, 3 * H:4 * H]
        c_new = f_g * c + i_g * g_g
        h_new = o_g * jnp.tanh(c_new)
        fused = jnp.dot(h_new.astype(jnp.bfloat16), wf,
                        preferred_element_type=jnp.float32)      # (B, 8H)
        gp_ref[idx] = fused[:, G:]            # layer-1 input proj of h_t
        return h_new, c_new, fused[:, :G]     # rec for step t+1 = h_t @ Whh

    init = (jnp.zeros((B, H), jnp.float32),
            jnp.zeros((B, H), jnp.float32),
            jnp.zeros((B, G), jnp.float32))
    jax.lax.fori_loop(0, T, step, init, unroll=(T <= 16))


def lstm_layer0_bidir(gx, wfused):
    """gx: (T, B, 8H) = precomputed input gates for [fwd | rev] directions.
    wfused: (2, H, 8H) bf16 = per-direction [Whh^T | Wih1_rev_half^T].
    Returns gp: (T, B, 8H) with gp[t,:, :4H] = h_fwd_t @ Wih1[:H] and
    gp[t,:, 4H:] = h_rev_t @ Wih1[H:]."""
    T, B, G2 = gx.shape
    G = G2 // 2
    H = G // 4
    return pl.pallas_call(
        functools.partial(_lstm_layer0_kernel, T=T, B=B, H=H),
        out_shape=jax.ShapeDtypeStruct((T, B, G2), jnp.float32),
        grid=(2,),
        in_specs=[
            pl.BlockSpec((T, B, G), lambda d: (0, 0, d)),
            pl.BlockSpec((1, H, G2), lambda d: (d, 0, 0)),
        ],
        out_specs=pl.BlockSpec((T, B, G), lambda d: (0, 0, d)),
        compiler_params=pltpu.CompilerParams(
            dimension_semantics=("parallel",),
            vmem_limit_bytes=_VMEM_LIMIT),
    )(gx, wfused)


# ---------------------------------------------------------------------------
# Kernel 4: LSTM layer 1, reverse direction only (the only state reaching
# h_n[-1]), with fc2 fused after the in-kernel time loop.  grid=(1,), all
# operands VMEM-resident, one bf16 MXU matmul per step, logits written as a
# lane-dense (B, 128) block.
# ---------------------------------------------------------------------------
def _lstm1_fc2_kernel(gp_ref, whh_ref, b_ref, w2_ref, b2_ref, o_ref, *, T, B, H):
    G = 4 * H
    whh = whh_ref[...]                        # (H, 4H) bf16
    bias = b_ref[...]                         # (1, 4H) f32
    lane = jax.lax.broadcasted_iota(jnp.int32, (B, G), 1)
    g_mask = (lane >= 2 * H) & (lane < 3 * H)

    def step(s, carry):
        h, c = carry
        idx = (T - 1) - s                     # reverse time order
        gp = gp_ref[idx]                      # (B, 8H): [fwd | rev] projections
        gates = (gp[:, :G] + gp[:, G:] + bias
                 + jnp.dot(h.astype(jnp.bfloat16), whh,
                           preferred_element_type=jnp.float32))
        act = jnp.where(g_mask, jnp.tanh(gates), jax.nn.sigmoid(gates))
        i_g = act[:, 0 * H:1 * H]
        f_g = act[:, 1 * H:2 * H]
        g_g = act[:, 2 * H:3 * H]
        o_g = act[:, 3 * H:4 * H]
        c_new = f_g * c + i_g * g_g
        h_new = o_g * jnp.tanh(c_new)
        return h_new, c_new

    z = jnp.zeros((B, H), jnp.float32)
    h_fin, _ = jax.lax.fori_loop(0, T, step, (z, z), unroll=(T <= 16))
    # final reverse hidden == h_n[-1]; fc2 fused (columns padded to 128 lanes).
    o_ref[...] = (jnp.dot(h_fin.astype(jnp.bfloat16), w2_ref[...],
                          preferred_element_type=jnp.float32) + b2_ref[...])


def lstm_layer1_rev_fc2(gp, whh, bias, w2_pad, b2_pad):
    T, B, G2 = gp.shape
    G = G2 // 2
    H = G // 4
    NC = w2_pad.shape[1]
    return pl.pallas_call(
        functools.partial(_lstm1_fc2_kernel, T=T, B=B, H=H),
        out_shape=jax.ShapeDtypeStruct((B, NC), jnp.float32),
        grid=(1,),
        in_specs=[
            pl.BlockSpec((T, B, G2), lambda i: (0, 0, 0)),
            pl.BlockSpec((H, G), lambda i: (0, 0)),
            pl.BlockSpec((1, G), lambda i: (0, 0)),
            pl.BlockSpec((H, NC), lambda i: (0, 0)),
            pl.BlockSpec((1, NC), lambda i: (0, 0)),
        ],
        out_specs=pl.BlockSpec((B, NC), lambda i: (0, 0)),
        compiler_params=pltpu.CompilerParams(
            dimension_semantics=("arbitrary",),
            vmem_limit_bytes=_VMEM_LIMIT),
    )(gp, whh, bias, w2_pad, b2_pad)


# ---------------------------------------------------------------------------
# JAX glue (im2col, pooling, orchestration)
# ---------------------------------------------------------------------------
def im2col_3x3_pad1(x):
    """x: (N, H, W, Cin) -> (N*H*W, 9*Cin); position-major, Cin-minor (matches
    PyTorch (Cout,Cin,kh,kw) weights transposed to (kh,kw,Cin,Cout)).
    # TODO(synk): build these patches inside the conv kernel from a halo'd
    # VMEM tile (and fuse the 2x2 pool into conv3) instead of materializing
    # the 9x-expanded matrix in HBM.
    """
    N, H, W, Cin = x.shape
    xp = jnp.pad(x, ((0, 0), (1, 1), (1, 1), (0, 0)))
    cols = [xp[:, i:i + H, j:j + W, :] for i in range(3) for j in range(3)]
    patches = jnp.stack(cols, axis=3)                 # (N, H, W, 9, Cin)
    return patches.reshape(N * H * W, 9 * Cin)


def maxpool2x2_nhwc(x):
    # (N, H, W, C) -> (N, H//2, W//2, C), floor semantics like nn.MaxPool2d(2,2)
    N, H, W, C = x.shape
    Hp, Wp = H // 2, W // 2
    x = x[:, :Hp * 2, :Wp * 2, :].reshape(N, Hp, 2, Wp, 2, C)
    return jnp.max(x, axis=(2, 4))


def forward(x, params, *, num_classes):
    """x: (B, T, L, C) float32 -> logits (B, num_classes)."""
    B, T, L, C = x.shape
    N = T * B
    # One cheap relayout of the (small) raw input to time-major row order
    # t*B + b; everything downstream is then already in LSTM order.
    feat = jnp.transpose(x, (1, 0, 2, 3)).reshape(N, L, C, 1)

    # conv1/2/3 + folded BN + ReLU (fused matmul kernel on im2col patches),
    # activations kept bf16 end-to-end.
    for (wmat, scale, shift) in params["convs"]:
        patches = im2col_3x3_pad1(feat)
        kp = wmat.shape[0]
        if patches.shape[1] != kp:                          # conv1: K 9 -> 16
            patches = jnp.pad(patches, ((0, 0), (0, kp - patches.shape[1])))
        y = mm_scale_shift(patches, wmat, scale, shift, relu=True,
                           out_dtype=jnp.bfloat16)
        feat = y.reshape(N, L, C, wmat.shape[1])

    # MaxPool2d(2,2); flatten in NHWC order (fc1 weight rows were permuted at
    # init, so no NCHW relayout of the activation is needed).
    pooled = maxpool2x2_nhwc(feat)                          # (N, L//2, C//2, 128)
    flat = pooled.reshape(N, -1)                            # bf16, (N, fc1_in)

    # fc1 + ReLU (dropout = eval identity) fused with the hoisted LSTM layer-0
    # input projection (both directions, b_ih + b_hh folded into the shift).
    H = params["l1_whh_t"].shape[0]
    gx = fc1_lstm_inproj(flat, params["fc1_w_t"], params["fc1_b"],
                         params["l0_wih_t"], params["l0_bias"])
    gx = gx.reshape(T, B, 8 * H)                            # already time-major

    # Fused recurrences: layer 0 (both dirs, in-kernel time loop), then
    # layer 1 reverse + fc2 (single call).
    gp = lstm_layer0_bidir(gx, params["l0_wfused"])
    logits_pad = lstm_layer1_rev_fc2(gp, params["l1_whh_t"], params["l1_bias"],
                                     params["fc2_w_t"], params["fc2_b"])
    return logits_pad[:, :num_classes]


# ---------------------------------------------------------------------------
# Deterministic synthetic parameters (mirrors the module __init__ shapes)
# ---------------------------------------------------------------------------
def init_params(key, num_landmarks=8, channels=2, hidden=32, num_classes=10):
    assert channels == 2, "fc1 size in the PyTorch module implies channels == 2"
    assert (4 * hidden) % 128 == 0, "gate width must be lane-aligned"
    keys = iter(jax.random.split(key, 64))

    def nrm(shape, s=0.1):
        return jax.random.normal(next(keys), shape, jnp.float32) * s

    HP = _round_up(hidden, 128)          # lane-dense fc1 / LSTM-input width
    NCP = _round_up(num_classes, 128)    # lane-dense fc2 width
    params = {}

    # conv stack: Conv2d(1->32), (32->64), (64->128), 3x3 pad 1, eval BN folded.
    convs = []
    for cin, cout in [(1, 32), (32, 64), (64, 128)]:
        w = nrm((cout, cin, 3, 3), 0.2)                  # PyTorch (Cout,Cin,kh,kw)
        b = nrm((cout,), 0.1)
        gamma = 1.0 + nrm((cout,), 0.1)
        beta = nrm((cout,), 0.1)
        run_mean = nrm((cout,), 0.1)
        run_var = 1.0 + jnp.abs(nrm((cout,), 0.1))
        scale = gamma / jnp.sqrt(run_var + 1e-5)
        shift = beta + scale * (b - run_mean)
        wmat = jnp.transpose(w, (2, 3, 1, 0)).reshape(9 * cin, cout)
        kp = _round_up(9 * cin, 8)                       # conv1: K 9 -> 16
        if kp != 9 * cin:
            wmat = jnp.pad(wmat, ((0, kp - 9 * cin), (0, 0)))
        convs.append((wmat.astype(jnp.bfloat16), scale, shift))
    params["convs"] = convs

    # fc1: permute PyTorch NCHW-flatten weight columns to NHWC-flatten order,
    # transpose, and zero-pad the output dim to HP lanes.
    Hp_, Wp_ = num_landmarks // 2, channels // 2
    fc1_in = Hp_ * Wp_ * 128
    w_fc1_pt = nrm((hidden, fc1_in), 0.05)
    b_fc1 = nrm((hidden,), 0.05)
    i = jnp.arange(fc1_in)
    h_i = i // (Wp_ * 128)
    w_i = (i % (Wp_ * 128)) // 128
    c_i = i % 128
    nchw_idx = (c_i * Hp_ + h_i) * Wp_ + w_i
    w_fc1 = jnp.take(w_fc1_pt, nchw_idx, axis=1).T          # (fc1_in, hidden)
    params["fc1_w_t"] = jnp.pad(
        w_fc1, ((0, 0), (0, HP - hidden))).astype(jnp.bfloat16)
    params["fc1_b"] = jnp.pad(b_fc1, (0, HP - hidden)).reshape(1, HP)

    # LSTM: 2 layers, bidirectional (PyTorch gate order i,f,g,o).  Only the
    # layer-1 reverse direction reaches the output (h_n[-1]); the layer-1
    # forward weights exist in the module but are dead, so not materialized.
    def lstm_dir(in_dim):
        s = 1.0 / math.sqrt(hidden)
        wih = jax.random.uniform(next(keys), (4 * hidden, in_dim), jnp.float32, -s, s)
        whh = jax.random.uniform(next(keys), (4 * hidden, hidden), jnp.float32, -s, s)
        bih = jax.random.uniform(next(keys), (4 * hidden,), jnp.float32, -s, s)
        bhh = jax.random.uniform(next(keys), (4 * hidden,), jnp.float32, -s, s)
        return wih, whh, bih + bhh

    wih0f, whh0f, b0f = lstm_dir(hidden)          # layer 0, forward
    wih0r, whh0r, b0r = lstm_dir(hidden)          # layer 0, reverse
    wih1r, whh1r, b1r = lstm_dir(2 * hidden)      # layer 1, reverse (-> h_n[-1])

    wih0 = jnp.concatenate([wih0f.T, wih0r.T], axis=1)       # (hidden, 8H)
    params["l0_wih_t"] = jnp.pad(
        wih0, ((0, HP - hidden), (0, 0))).astype(jnp.bfloat16)
    params["l0_bias"] = jnp.concatenate([b0f, b0r]).reshape(1, 8 * hidden)

    # Fused per-direction recurrent weight: [Whh^T | Wih1_rev_half^T] (H, 8H).
    wih1r_t = wih1r.T                                        # (2H, 4H)
    wf_fwd = jnp.concatenate([whh0f.T, wih1r_t[:hidden]], axis=1)
    wf_rev = jnp.concatenate([whh0r.T, wih1r_t[hidden:]], axis=1)
    params["l0_wfused"] = jnp.stack([wf_fwd, wf_rev]).astype(jnp.bfloat16)

    params["l1_whh_t"] = whh1r.T.astype(jnp.bfloat16)        # (H, 4H)
    params["l1_bias"] = b1r.reshape(1, 4 * hidden)

    w_fc2 = nrm((num_classes, hidden), 0.1)
    b_fc2 = nrm((num_classes,), 0.1)
    params["fc2_w_t"] = jnp.pad(
        w_fc2.T, ((0, 0), (0, NCP - num_classes))).astype(jnp.bfloat16)
    params["fc2_b"] = jnp.pad(b_fc2, (0, NCP - num_classes)).reshape(1, NCP)
    return params


if __name__ == "__main__":
    key = jax.random.PRNGKey(0)
    pkey, xkey = jax.random.split(key)

    # small shapes consistent with the module (channels=2 => fc1_in = L//2*128)
    B, T, L, C = 2, 4, 8, 2
    hidden, num_classes = 32, 10

    params = init_params(pkey, num_landmarks=L, channels=C,
                         hidden=hidden, num_classes=num_classes)
    x = jax.random.normal(xkey, (B, T, L, C), jnp.float32)

    fwd = jax.jit(functools.partial(forward, num_classes=num_classes))
    logits = jax.block_until_ready(fwd(x, params))
    assert logits.shape == (B, num_classes)
    assert bool(jnp.all(jnp.isfinite(logits)))
    print("KERNEL_OK")
</pallas_src>

<mosaic_0001>
module attributes {stable_mosaic.version = 11 : i64} {
  func.func @_mm_scale_shift_kernel(%arg0: i32, %arg1: memref<128x16xf32, #tpu.memory_space<vmem>>, %arg2: memref<16x32xbf16, #tpu.memory_space<vmem>>, %arg3: memref<1x32xf32, #tpu.memory_space<vmem>>, %arg4: memref<1x32xf32, #tpu.memory_space<vmem>>, %arg5: memref<128x32xbf16, #tpu.memory_space<vmem>>) attributes {dimension_semantics = [#tpu.dimension_semantics<parallel>], iteration_bounds = array<i64: 1>, scalar_prefetch = 0 : i64, scratch_operands = 0 : i64, tpu.core_type = #tpu.core_type<tc>, window_params = [{transform_indices = @transform_0, window_bounds = array<i64: 128, 16>}, {pipeline_mode = #tpu.pipeline_mode<synchronous>, transform_indices = @transform_1, window_bounds = array<i64: 16, 32>}, {pipeline_mode = #tpu.pipeline_mode<synchronous>, transform_indices = @transform_2, window_bounds = array<i64: 1, 32>}, {pipeline_mode = #tpu.pipeline_mode<synchronous>, transform_indices = @transform_3, window_bounds = array<i64: 1, 32>}, {transform_indices = @transform_4, window_bounds = array<i64: 128, 32>}]} {
    %c0 = arith.constant 0 : index
    %c0_0 = arith.constant 0 : index
    %0 = vector.load %arg1[%c0, %c0_0] : memref<128x16xf32, #tpu.memory_space<vmem>>, vector<128x16xf32>
    %1 = arith.truncf %0 : vector<128x16xf32> to vector<128x16xbf16>
    %c0_1 = arith.constant 0 : index
    %c0_2 = arith.constant 0 : index
    %2 = vector.load %arg2[%c0_1, %c0_2] : memref<16x32xbf16, #tpu.memory_space<vmem>>, vector<16x32xbf16>
    %cst = arith.constant dense<0.000000e+00> : vector<128x32xf32>
    %3 = tpu.matmul %1, %2, %cst {dimension_numbers = #tpu.dot_dimension_numbers<[1], [0], [0], [1], [0, 0, 1, 1], [], []>} : vector<128x16xbf16>, vector<16x32xbf16>, vector<128x32xf32> -> vector<128x32xf32>
    %c0_3 = arith.constant 0 : index
    %c0_4 = arith.constant 0 : index
    %4 = vector.load %arg3[%c0_3, %c0_4] : memref<1x32xf32, #tpu.memory_space<vmem>>, vector<1x32xf32>
    %5 = vector.broadcast %4 : vector<1x32xf32> to vector<128x32xf32>
    %6 = arith.mulf %3, %5 : vector<128x32xf32>
    %c0_5 = arith.constant 0 : index
    %c0_6 = arith.constant 0 : index
    %7 = vector.load %arg4[%c0_5, %c0_6] : memref<1x32xf32, #tpu.memory_space<vmem>>, vector<1x32xf32>
    %8 = vector.broadcast %7 : vector<1x32xf32> to vector<128x32xf32>
    %9 = arith.addf %6, %8 : vector<128x32xf32>
    %cst_7 = arith.constant 0.000000e+00 : f32
    %10 = vector.broadcast %cst_7 : f32 to vector<128x32xf32>
    %11 = arith.maximumf %9, %10 : vector<128x32xf32>
    %12 = arith.truncf %11 : vector<128x32xf32> to vector<128x32xbf16>
    %c0_8 = arith.constant 0 : index
    %c0_9 = arith.constant 0 : index
    %13 = vector.load %arg5[%c0_8, %c0_9] : memref<128x32xbf16, #tpu.memory_space<vmem>>, vector<128x32xbf16>
    tpu.vector_store %arg5[%c0_8, %c0_9], %12 {strides = array<i32>} : memref<128x32xbf16, #tpu.memory_space<vmem>>, vector<128x32xbf16>,
    return
  }
  func.func @transform_0(%arg0: i32) -> (i32, i32) {
    %c0_i32 = arith.constant 0 : i32
    %c0_i32_0 = arith.constant 0 : i32
    return %arg0, %c0_i32 : i32, i32
  }
  func.func @transform_1(%arg0: i32) -> (i32, i32) {
    %c0_i32 = arith.constant 0 : i32
    %c0_i32_0 = arith.constant 0 : i32
    %c0_i32_1 = arith.constant 0 : i32
    return %c0_i32, %c0_i32_0 : i32, i32
  }
  func.func @transform_2(%arg0: i32) -> (i32, i32) {
    %c0_i32 = arith.constant 0 : i32
    %c0_i32_0 = arith.constant 0 : i32
    %c0_i32_1 = arith.constant 0 : i32
    return %c0_i32, %c0_i32_0 : i32, i32
  }
  func.func @transform_3(%arg0: i32) -> (i32, i32) {
    %c0_i32 = arith.constant 0 : i32
    %c0_i32_0 = arith.constant 0 : i32
    %c0_i32_1 = arith.constant 0 : i32
    return %c0_i32, %c0_i32_0 : i32, i32
  }
  func.func @transform_4(%arg0: i32) -> (i32, i32) {
    %c0_i32 = arith.constant 0 : i32
    %c0_i32_0 = arith.constant 0 : i32
    return %arg0, %c0_i32 : i32, i32
  }
}

module attributes {stable_mosaic.version = 11 : i64} {
  func.func @_mm_scale_shift_kernel(%arg0: i32, %arg1: memref<128x288xbf16, #tpu.memory_space<vmem>>, %arg2: memref<288x64xbf16, #tpu.memory_space<vmem>>, %arg3: memref<1x64xf32, #tpu.memory_space<vmem>>, %arg4: memref<1x64xf32, #tpu.memory_space<vmem>>, %arg5: memref<128x64xbf16, #tpu.memory_space<vmem>>) attributes {dimension_semantics = [#tpu.dimension_semantics<parallel>], iteration_bounds = array<i64: 1>, scalar_prefetch = 0 : i64, scratch_operands = 0 : i64, tpu.core_type = #tpu.core_type<tc>, window_params = [{transform_indices = @transform_0, window_bounds = array<i64: 128, 288>}, {pipeline_mode = #tpu.pipeline_mode<synchronous>, transform_indices = @transform_1, window_bounds = array<i64: 288, 64>}, {pipeline_mode = #tpu.pipeline_mode<synchronous>, transform_indices = @transform_2, window_bounds = array<i64: 1, 64>}, {pipeline_mode = #tpu.pipeline_mode<synchronous>, transform_indices = @transform_3, window_bounds = array<i64: 1, 64>}, {transform_indices = @transform_4, window_bounds = array<i64: 128, 64>}]} {
    %c0 = arith.constant 0 : index
    %c0_0 = arith.constant 0 : index
    %0 = vector.load %arg1[%c0, %c0_0] : memref<128x288xbf16, #tpu.memory_space<vmem>>, vector<128x288xbf16>
    %c0_1 = arith.constant 0 : index
    %c0_2 = arith.constant 0 : index
    %1 = vector.load %arg2[%c0_1, %c0_2] : memref<288x64xbf16, #tpu.memory_space<vmem>>, vector<288x64xbf16>
    %cst = arith.constant dense<0.000000e+00> : vector<128x64xf32>
    %2 = tpu.matmul %0, %1, %cst {dimension_numbers = #tpu.dot_dimension_numbers<[1], [0], [0], [1], [0, 0, 1, 1], [], []>} : vector<128x288xbf16>, vector<288x64xbf16>, vector<128x64xf32> -> vector<128x64xf32>
    %c0_3 = arith.constant 0 : index
    %c0_4 = arith.constant 0 : index
    %3 = vector.load %arg3[%c0_3, %c0_4] : memref<1x64xf32, #tpu.memory_space<vmem>>, vector<1x64xf32>
    %4 = vector.broadcast %3 : vector<1x64xf32> to vector<128x64xf32>
    %5 = arith.mulf %2, %4 : vector<128x64xf32>
    %c0_5 = arith.constant 0 : index
    %c0_6 = arith.constant 0 : index
    %6 = vector.load %arg4[%c0_5, %c0_6] : memref<1x64xf32, #tpu.memory_space<vmem>>, vector<1x64xf32>
    %7 = vector.broadcast %6 : vector<1x64xf32> to vector<128x64xf32>
    %8 = arith.addf %5, %7 : vector<128x64xf32>
    %cst_7 = arith.constant 0.000000e+00 : f32
    %9 = vector.broadcast %cst_7 : f32 to vector<128x64xf32>
    %10 = arith.maximumf %8, %9 : vector<128x64xf32>
    %11 = arith.truncf %10 : vector<128x64xf32> to vector<128x64xbf16>
    %c0_8 = arith.constant 0 : index
    %c0_9 = arith.constant 0 : index
    %12 = vector.load %arg5[%c0_8, %c0_9] : memref<128x64xbf16, #tpu.memory_space<vmem>>, vector<128x64xbf16>
    tpu.vector_store %arg5[%c0_8, %c0_9], %11 {strides = array<i32>} : memref<128x64xbf16, #tpu.memory_space<vmem>>, vector<128x64xbf16>,
    return
  }
  func.func @transform_0(%arg0: i32) -> (i32, i32) {
    %c0_i32 = arith.constant 0 : i32
    %c0_i32_0 = arith.constant 0 : i32
    return %arg0, %c0_i32 : i32, i32
  }
  func.func @transform_1(%arg0: i32) -> (i32, i32) {
    %c0_i32 = arith.constant 0 : i32
    %c0_i32_0 = arith.constant 0 : i32
    %c0_i32_1 = arith.constant 0 : i32
    return %c0_i32, %c0_i32_0 : i32, i32
  }
  func.func @transform_2(%arg0: i32) -> (i32, i32) {
    %c0_i32 = arith.constant 0 : i32
    %c0_i32_0 = arith.constant 0 : i32
    %c0_i32_1 = arith.constant 0 : i32
    return %c0_i32, %c0_i32_0 : i32, i32
  }
  func.func @transform_3(%arg0: i32) -> (i32, i32) {
    %c0_i32 = arith.constant 0 : i32
    %c0_i32_0 = arith.constant 0 : i32
    %c0_i32_1 = arith.constant 0 : i32
    return %c0_i32, %c0_i32_0 : i32, i32
  }
  func.func @transform_4(%arg0: i32) -> (i32, i32) {
    %c0_i32 = arith.constant 0 : i32
    %c0_i32_0 = arith.constant 0 : i32
    return %arg0, %c0_i32 : i32, i32
  }
}

module attributes {stable_mosaic.version = 11 : i64} {
  func.func @_mm_scale_shift_kernel(%arg0: i32, %arg1: memref<128x576xbf16, #tpu.memory_space<vmem>>, %arg2: memref<576x128xbf16, #tpu.memory_space<vmem>>, %arg3: memref<1x128xf32, #tpu.memory_space<vmem>>, %arg4: memref<1x128xf32, #tpu.memory_space<vmem>>, %arg5: memref<128x128xbf16, #tpu.memory_space<vmem>>) attributes {dimension_semantics = [#tpu.dimension_semantics<parallel>], iteration_bounds = array<i64: 1>, scalar_prefetch = 0 : i64, scratch_operands = 0 : i64, tpu.core_type = #tpu.core_type<tc>, window_params = [{transform_indices = @transform_0, window_bounds = array<i64: 128, 576>}, {pipeline_mode = #tpu.pipeline_mode<synchronous>, transform_indices = @transform_1, window_bounds = array<i64: 576, 128>}, {pipeline_mode = #tpu.pipeline_mode<synchronous>, transform_indices = @transform_2, window_bounds = array<i64: 1, 128>}, {pipeline_mode = #tpu.pipeline_mode<synchronous>, transform_indices = @transform_3, window_bounds = array<i64: 1, 128>}, {transform_indices = @transform_4, window_bounds = array<i64: 128, 128>}]} {
    %c0 = arith.constant 0 : index
    %c0_0 = arith.constant 0 : index
    %0 = vector.load %arg1[%c0, %c0_0] : memref<128x576xbf16, #tpu.memory_space<vmem>>, vector<128x576xbf16>
    %c0_1 = arith.constant 0 : index
    %c0_2 = arith.constant 0 : index
    %1 = vector.load %arg2[%c0_1, %c0_2] : memref<576x128xbf16, #tpu.memory_space<vmem>>, vector<576x128xbf16>
    %cst = arith.constant dense<0.000000e+00> : vector<128x128xf32>
    %2 = tpu.matmul %0, %1, %cst {dimension_numbers = #tpu.dot_dimension_numbers<[1], [0], [0], [1], [0, 0, 1, 1], [], []>} : vector<128x576xbf16>, vector<576x128xbf16>, vector<128x128xf32> -> vector<128x128xf32>
    %c0_3 = arith.constant 0 : index
    %c0_4 = arith.constant 0 : index
    %3 = vector.load %arg3[%c0_3, %c0_4] : memref<1x128xf32, #tpu.memory_space<vmem>>, vector<1x128xf32>
    %4 = vector.broadcast %3 : vector<1x128xf32> to vector<128x128xf32>
    %5 = arith.mulf %2, %4 : vector<128x128xf32>
    %c0_5 = arith.constant 0 : index
    %c0_6 = arith.constant 0 : index
    %6 = vector.load %arg4[%c0_5, %c0_6] : memref<1x128xf32, #tpu.memory_space<vmem>>, vector<1x128xf32>
    %7 = vector.broadcast %6 : vector<1x128xf32> to vector<128x128xf32>
    %8 = arith.addf %5, %7 : vector<128x128xf32>
    %cst_7 = arith.constant 0.000000e+00 : f32
    %9 = vector.broadcast %cst_7 : f32 to vector<128x128xf32>
    %10 = arith.maximumf %8, %9 : vector<128x128xf32>
    %11 = arith.truncf %10 : vector<128x128xf32> to vector<128x128xbf16>
    %c0_8 = arith.constant 0 : index
    %c0_9 = arith.constant 0 : index
    %12 = vector.load %arg5[%c0_8, %c0_9] : memref<128x128xbf16, #tpu.memory_space<vmem>>, vector<128x128xbf16>
    tpu.vector_store %arg5[%c0_8, %c0_9], %11 {strides = array<i32>} : memref<128x128xbf16, #tpu.memory_space<vmem>>, vector<128x128xbf16>,
    return
  }
  func.func @transform_0(%arg0: i32) -> (i32, i32) {
    %c0_i32 = arith.constant 0 : i32
    %c0_i32_0 = arith.constant 0 : i32
    return %arg0, %c0_i32 : i32, i32
  }
  func.func @transform_1(%arg0: i32) -> (i32, i32) {
    %c0_i32 = arith.constant 0 : i32
    %c0_i32_0 = arith.constant 0 : i32
    %c0_i32_1 = arith.constant 0 : i32
    return %c0_i32, %c0_i32_0 : i32, i32
  }
  func.func @transform_2(%arg0: i32) -> (i32, i32) {
    %c0_i32 = arith.constant 0 : i32
    %c0_i32_0 = arith.constant 0 : i32
    %c0_i32_1 = arith.constant 0 : i32
    return %c0_i32, %c0_i32_0 : i32, i32
  }
  func.func @transform_3(%arg0: i32) -> (i32, i32) {
    %c0_i32 = arith.constant 0 : i32
    %c0_i32_0 = arith.constant 0 : i32
    %c0_i32_1 = arith.constant 0 : i32
    return %c0_i32, %c0_i32_0 : i32, i32
  }
  func.func @transform_4(%arg0: i32) -> (i32, i32) {
    %c0_i32 = arith.constant 0 : i32
    %c0_i32_0 = arith.constant 0 : i32
    return %arg0, %c0_i32 : i32, i32
  }
}

module attributes {stable_mosaic.version = 11 : i64} {
  func.func @_fc1_inproj_kernel(%arg0: i32, %arg1: memref<8x512xbf16, #tpu.memory_space<vmem>>, %arg2: memref<512x128xbf16, #tpu.memory_space<vmem>>, %arg3: memref<1x128xf32, #tpu.memory_space<vmem>>, %arg4: memref<128x256xbf16, #tpu.memory_space<vmem>>, %arg5: memref<1x256xf32, #tpu.memory_space<vmem>>, %arg6: memref<8x256xf32, #tpu.memory_space<vmem>>) attributes {dimension_semantics = [#tpu.dimension_semantics<parallel>], iteration_bounds = array<i64: 1>, scalar_prefetch = 0 : i64, scratch_operands = 0 : i64, tpu.core_type = #tpu.core_type<tc>, window_params = [{transform_indices = @transform_0, window_bounds = array<i64: 8, 512>}, {pipeline_mode = #tpu.pipeline_mode<synchronous>, transform_indices = @transform_1, window_bounds = array<i64: 512, 128>}, {pipeline_mode = #tpu.pipeline_mode<synchronous>, transform_indices = @transform_2, window_bounds = array<i64: 1, 128>}, {pipeline_mode = #tpu.pipeline_mode<synchronous>, transform_indices = @transform_3, window_bounds = array<i64: 128, 256>}, {pipeline_mode = #tpu.pipeline_mode<synchronous>, transform_indices = @transform_4, window_bounds = array<i64: 1, 256>}, {transform_indices = @transform_5, window_bounds = array<i64: 8, 256>}]} {
    %c0 = arith.constant 0 : index
    %c0_0 = arith.constant 0 : index
    %0 = vector.load %arg1[%c0, %c0_0] : memref<8x512xbf16, #tpu.memory_space<vmem>>, vector<8x512xbf16>
    %c0_1 = arith.constant 0 : index
    %c0_2 = arith.constant 0 : index
    %1 = vector.load %arg2[%c0_1, %c0_2] : memref<512x128xbf16, #tpu.memory_space<vmem>>, vector<512x128xbf16>
    %cst = arith.constant dense<0.000000e+00> : vector<8x128xf32>
    %2 = tpu.matmul %0, %1, %cst {dimension_numbers = #tpu.dot_dimension_numbers<[1], [0], [0], [1], [0, 0, 1, 1], [], []>} : vector<8x512xbf16>, vector<512x128xbf16>, vector<8x128xf32> -> vector<8x128xf32>
    %c0_3 = arith.constant 0 : index
    %c0_4 = arith.constant 0 : index
    %3 = vector.load %arg3[%c0_3, %c0_4] : memref<1x128xf32, #tpu.memory_space<vmem>>, vector<1x128xf32>
    %4 = vector.broadcast %3 : vector<1x128xf32> to vector<8x128xf32>
    %5 = arith.addf %2, %4 : vector<8x128xf32>
    %cst_5 = arith.constant 0.000000e+00 : f32
    %6 = vector.broadcast %cst_5 : f32 to vector<8x128xf32>
    %7 = arith.maximumf %5, %6 : vector<8x128xf32>
    %8 = arith.truncf %7 : vector<8x128xf32> to vector<8x128xbf16>
    %c0_6 = arith.constant 0 : index
    %c0_7 = arith.constant 0 : index
    %9 = vector.load %arg4[%c0_6, %c0_7] : memref<128x256xbf16, #tpu.memory_space<vmem>>, vector<128x256xbf16>
    %cst_8 = arith.constant dense<0.000000e+00> : vector<8x256xf32>
    %10 = tpu.matmul %8, %9, %cst_8 {dimension_numbers = #tpu.dot_dimension_numbers<[1], [0], [0], [1], [0, 0, 1, 1], [], []>} : vector<8x128xbf16>, vector<128x256xbf16>, vector<8x256xf32> -> vector<8x256xf32>
    %c0_9 = arith.constant 0 : index
    %c0_10 = arith.constant 0 : index
    %11 = vector.load %arg5[%c0_9, %c0_10] : memref<1x256xf32, #tpu.memory_space<vmem>>, vector<1x256xf32>
    %12 = vector.broadcast %11 : vector<1x256xf32> to vector<8x256xf32>
    %13 = arith.addf %10, %12 : vector<8x256xf32>
    %c0_11 = arith.constant 0 : index
    %c0_12 = arith.constant 0 : index
    %14 = vector.load %arg6[%c0_11, %c0_12] : memref<8x256xf32, #tpu.memory_space<vmem>>, vector<8x256xf32>
    tpu.vector_store %arg6[%c0_11, %c0_12], %13 {strides = array<i32>} : memref<8x256xf32, #tpu.memory_space<vmem>>, vector<8x256xf32>,
    return
  }
  func.func @transform_0(%arg0: i32) -> (i32, i32) {
    %c0_i32 = arith.constant 0 : i32
    %c0_i32_0 = arith.constant 0 : i32
    return %arg0, %c0_i32 : i32, i32
  }
  func.func @transform_1(%arg0: i32) -> (i32, i32) {
    %c0_i32 = arith.constant 0 : i32
    %c0_i32_0 = arith.constant 0 : i32
    %c0_i32_1 = arith.constant 0 : i32
    return %c0_i32, %c0_i32_0 : i32, i32
  }
  func.func @transform_2(%arg0: i32) -> (i32, i32) {
    %c0_i32 = arith.constant 0 : i32
    %c0_i32_0 = arith.constant 0 : i32
    %c0_i32_1 = arith.constant 0 : i32
    return %c0_i32, %c0_i32_0 : i32, i32
  }
  func.func @transform_3(%arg0: i32) -> (i32, i32) {
    %c0_i32 = arith.constant 0 : i32
    %c0_i32_0 = arith.constant 0 : i32
    %c0_i32_1 = arith.constant 0 : i32
    return %c0_i32, %c0_i32_0 : i32, i32
  }
  func.func @transform_4(%arg0: i32) -> (i32, i32) {
    %c0_i32 = arith.constant 0 : i32
    %c0_i32_0 = arith.constant 0 : i32
    %c0_i32_1 = arith.constant 0 : i32
    return %c0_i32, %c0_i32_0 : i32, i32
  }
  func.func @transform_5(%arg0: i32) -> (i32, i32) {
    %c0_i32 = arith.constant 0 : i32
    %c0_i32_0 = arith.constant 0 : i32
    return %arg0, %c0_i32 : i32, i32
  }
}

module attributes {stable_mosaic.version = 11 : i64} {
  func.func @_lstm_layer0_kernel(%arg0: i32, %arg1: memref<4x2x128xf32, #tpu.memory_space<vmem>>, %arg2: memref<1x32x256xbf16, #tpu.memory_space<vmem>>, %arg3: memref<4x2x128xf32, #tpu.memory_space<vmem>>) attributes {dimension_semantics = [#tpu.dimension_semantics<parallel>], iteration_bounds = array<i64: 2>, scalar_prefetch = 0 : i64, scratch_operands = 0 : i64, tpu.core_type = #tpu.core_type<tc>, window_params = [{transform_indices = @transform_0, window_bounds = array<i64: 4, 2, 128>}, {transform_indices = @transform_1, window_bounds = array<i64: 1, 32, 256>}, {transform_indices = @transform_2, window_bounds = array<i64: 4, 2, 128>}]} {
    %c0 = arith.constant 0 : index
    %c0_0 = arith.constant 0 : index
    %c0_1 = arith.constant 0 : index
    %0 = vector.load %arg2[%c0, %c0_0, %c0_1] : memref<1x32x256xbf16, #tpu.memory_space<vmem>>, vector<1x32x256xbf16>
    %1 = vector.shape_cast %0 : vector<1x32x256xbf16> to vector<32x256xbf16>
    %2 = tpu.iota {dimensions = array<i32: 1>} : vector<2x128xi32>
    %c64_i32 = arith.constant 64 : i32
    %3 = vector.broadcast %c64_i32 : i32 to vector<2x128xi32>
    %4 = arith.cmpi sge, %2, %3 : vector<2x128xi32>
    %c96_i32 = arith.constant 96 : i32
    %5 = vector.broadcast %c96_i32 : i32 to vector<2x128xi32>
    %6 = arith.cmpi slt, %2, %5 : vector<2x128xi32>
    %7 = arith.andi %4, %6 : vector<2x128xi1>
    %cst = arith.constant 0.000000e+00 : f32
    %8 = vector.broadcast %cst : f32 to vector<2x32xf32>
    %cst_2 = arith.constant 0.000000e+00 : f32
    %9 = vector.broadcast %cst_2 : f32 to vector<2x128xf32>
    %c0_i32 = arith.constant 0 : i32
    %c3_i32 = arith.constant 3 : i32
    %10 = arith.muli %arg0, %c3_i32 : i32
    %c2_i32 = arith.constant 2 : i32
    %11 = arith.muli %c2_i32, %arg0 : i32
    %c1_i32 = arith.constant 1 : i32
    %12 = arith.subi %c1_i32, %11 : i32
    %13 = arith.muli %12, %c0_i32 : i32
    %14 = arith.addi %10, %13 : i32
    %15 = arith.index_cast %14 : i32 to index
    %c0_3 = arith.constant 0 : index
    %c0_4 = arith.constant 0 : index
    %16 = vector.load %arg1[%15, %c0_3, %c0_4] : memref<4x2x128xf32, #tpu.memory_space<vmem>>, vector<1x2x128xf32>
    %17 = vector.shape_cast %16 : vector<1x2x128xf32> to vector<2x128xf32>
    %18 = arith.addf %17, %9 : vector<2x128xf32>
    %19 = math.tanh %18 : vector<2x128xf32>
    %20 = arith.negf %18 : vector<2x128xf32>
    %21 = math.exp %20 : vector<2x128xf32>
    %cst_5 = arith.constant 1.000000e+00 : f32
    %22 = vector.broadcast %cst_5 : f32 to vector<2x128xf32>
    %23 = arith.addf %22, %21 : vector<2x128xf32>
    %24 = arith.divf %22, %23 : vector<2x128xf32>
    %25 = arith.select %7, %19, %24 : vector<2x128xi1>, vector<2x128xf32>
    %26 = vector.extract_strided_slice %25 {offsets = [0, 0], sizes = [2, 32], strides = [1, 1]} : vector<2x128xf32> to vector<2x32xf32>
    %27 = vector.extract_strided_slice %25 {offsets = [0, 32], sizes = [2, 32], strides = [1, 1]} : vector<2x128xf32> to vector<2x32xf32>
    %28 = vector.extract_strided_slice %25 {offsets = [0, 64], sizes = [2, 32], strides = [1, 1]} : vector<2x128xf32> to vector<2x32xf32>
    %29 = vector.extract_strided_slice %25 {offsets = [0, 96], sizes = [2, 32], strides = [1, 1]} : vector<2x128xf32> to vector<2x32xf32>
    %30 = arith.mulf %27, %8 : vector<2x32xf32>
    %31 = arith.mulf %26, %28 : vector<2x32xf32>
    %32 = arith.addf %30, %31 : vector<2x32xf32>
    %33 = math.tanh %32 : vector<2x32xf32>
    %34 = arith.mulf %29, %33 : vector<2x32xf32>
    %35 = arith.truncf %34 : vector<2x32xf32> to vector<2x32xbf16>
    %cst_6 = arith.constant dense<0.000000e+00> : vector<2x256xf32>
    %36 = tpu.matmul %35, %1, %cst_6 {dimension_numbers = #tpu.dot_dimension_numbers<[1], [0], [0], [1], [0, 0, 1, 1], [], []>} : vector<2x32xbf16>, vector<32x256xbf16>, vector<2x256xf32> -> vector<2x256xf32>
    %37 = vector.extract_strided_slice %36 {offsets = [0, 128], sizes = [2, 128], strides = [1, 1]} : vector<2x256xf32> to vector<2x128xf32>
    %38 = arith.index_cast %14 : i32 to index
    %c0_7 = arith.constant 0 : index
    %c0_8 = arith.constant 0 : index
    %39 = vector.load %arg3[%38, %c0_7, %c0_8] : memref<4x2x128xf32, #tpu.memory_space<vmem>>, vector<1x2x128xf32>
    %40 = vector.shape_cast %39 : vector<1x2x128xf32> to vector<2x128xf32>
    %41 = vector.shape_cast %37 : vector<2x128xf32> to vector<1x2x128xf32>
    tpu.vector_store %arg3[%38, %c0_7, %c0_8], %41 {strides = array<i32>} : memref<4x2x128xf32, #tpu.memory_space<vmem>>, vector<1x2x128xf32>,
    %42 = vector.extract_strided_slice %36 {offsets = [0, 0], sizes = [2, 128], strides = [1, 1]} : vector<2x256xf32> to vector<2x128xf32>
    %c1_i32_9 = arith.constant 1 : i32
    %c3_i32_10 = arith.constant 3 : i32
    %43 = arith.muli %arg0, %c3_i32_10 : i32
    %c2_i32_11 = arith.constant 2 : i32
    %44 = arith.muli %c2_i32_11, %arg0 : i32
    %c1_i32_12 = arith.constant 1 : i32
    %45 = arith.subi %c1_i32_12, %44 : i32
    %46 = arith.muli %45, %c1_i32_9 : i32
    %47 = arith.addi %43, %46 : i32
    %48 = arith.index_cast %47 : i32 to index
    %c0_13 = arith.constant 0 : index
    %c0_14 = arith.constant 0 : index
    %49 = vector.load %arg1[%48, %c0_13, %c0_14] : memref<4x2x128xf32, #tpu.memory_space<vmem>>, vector<1x2x128xf32>
    %50 = vector.shape_cast %49 : vector<1x2x128xf32> to vector<2x128xf32>
    %51 = arith.addf %50, %42 : vector<2x128xf32>
    %52 = math.tanh %51 : vector<2x128xf32>
    %53 = arith.negf %51 : vector<2x128xf32>
    %54 = math.exp %53 : vector<2x128xf32>
    %cst_15 = arith.constant 1.000000e+00 : f32
    %55 = vector.broadcast %cst_15 : f32 to vector<2x128xf32>
    %56 = arith.addf %55, %54 : vector<2x128xf32>
    %57 = arith.divf %55, %56 : vector<2x128xf32>
    %58 = arith.select %7, %52, %57 : vector<2x128xi1>, vector<2x128xf32>
    %59 = vector.extract_strided_slice %58 {offsets = [0, 0], sizes = [2, 32], strides = [1, 1]} : vector<2x128xf32> to vector<2x32xf32>
    %60 = vector.extract_strided_slice %58 {offsets = [0, 32], sizes = [2, 32], strides = [1, 1]} : vector<2x128xf32> to vector<2x32xf32>
    %61 = vector.extract_strided_slice %58 {offsets = [0, 64], sizes = [2, 32], strides = [1, 1]} : vector<2x128xf32> to vector<2x32xf32>
    %62 = vector.extract_strided_slice %58 {offsets = [0, 96], sizes = [2, 32], strides = [1, 1]} : vector<2x128xf32> to vector<2x32xf32>
    %63 = arith.mulf %60, %32 : vector<2x32xf32>
    %64 = arith.mulf %59, %61 : vector<2x32xf32>
    %65 = arith.addf %63, %64 : vector<2x32xf32>
    %66 = math.tanh %65 : vector<2x32xf32>
    %67 = arith.mulf %62, %66 : vector<2x32xf32>
    %68 = arith.truncf %67 : vector<2x32xf32> to vector<2x32xbf16>
    %cst_16 = arith.constant dense<0.000000e+00> : vector<2x256xf32>
    %69 = tpu.matmul %68, %1, %cst_16 {dimension_numbers = #tpu.dot_dimension_numbers<[1], [0], [0], [1], [0, 0, 1, 1], [], []>} : vector<2x32xbf16>, vector<32x256xbf16>, vector<2x256xf32> -> vector<2x256xf32>
    %70 = vector.extract_strided_slice %69 {offsets = [0, 128], sizes = [2, 128], strides = [1, 1]} : vector<2x256xf32> to vector<2x128xf32>
    %71 = arith.index_cast %47 : i32 to index
    %c0_17 = arith.constant 0 : index
    %c0_18 = arith.constant 0 : index
    %72 = vector.load %arg3[%71, %c0_17, %c0_18] : memref<4x2x128xf32, #tpu.memory_space<vmem>>, vector<1x2x128xf32>
    %73 = vector.shape_cast %72 : vector<1x2x128xf32> to vector<2x128xf32>
    %74 = vector.shape_cast %70 : vector<2x128xf32> to vector<1x2x128xf32>
    tpu.vector_store %arg3[%71, %c0_17, %c0_18], %74 {strides = array<i32>} : memref<4x2x128xf32, #tpu.memory_space<vmem>>, vector<1x2x128xf32>,
    %75 = vector.extract_strided_slice %69 {offsets = [0, 0], sizes = [2, 128], strides = [1, 1]} : vector<2x256xf32> to vector<2x128xf32>
    %c2_i32_19 = arith.constant 2 : i32
    %c3_i32_20 = arith.constant 3 : i32
    %76 = arith.muli %arg0, %c3_i32_20 : i32
    %c2_i32_21 = arith.constant 2 : i32
    %77 = arith.muli %c2_i32_21, %arg0 : i32
    %c1_i32_22 = arith.constant 1 : i32
    %78 = arith.subi %c1_i32_22, %77 : i32
    %79 = arith.muli %78, %c2_i32_19 : i32
    %80 = arith.addi %76, %79 : i32
    %81 = arith.index_cast %80 : i32 to index
    %c0_23 = arith.constant 0 : index
    %c0_24 = arith.constant 0 : index
    %82 = vector.load %arg1[%81, %c0_23, %c0_24] : memref<4x2x128xf32, #tpu.memory_space<vmem>>, vector<1x2x128xf32>
    %83 = vector.shape_cast %82 : vector<1x2x128xf32> to vector<2x128xf32>
    %84 = arith.addf %83, %75 : vector<2x128xf32>
    %85 = math.tanh %84 : vector<2x128xf32>
    %86 = arith.negf %84 : vector<2x128xf32>
    %87 = math.exp %86 : vector<2x128xf32>
    %cst_25 = arith.constant 1.000000e+00 : f32
    %88 = vector.broadcast %cst_25 : f32 to vector<2x128xf32>
    %89 = arith.addf %88, %87 : vector<2x128xf32>
    %90 = arith.divf %88, %89 : vector<2x128xf32>
    %91 = arith.select %7, %85, %90 : vector<2x128xi1>, vector<2x128xf32>
    %92 = vector.extract_strided_slice %91 {offsets = [0, 0], sizes = [2, 32], strides = [1, 1]} : vector<2x128xf32> to vector<2x32xf32>
    %93 = vector.extract_strided_slice %91 {offsets = [0, 32], sizes = [2, 32], strides = [1, 1]} : vector<2x128xf32> to vector<2x32xf32>
    %94 = vector.extract_strided_slice %91 {offsets = [0, 64], sizes = [2, 32], strides = [1, 1]} : vector<2x128xf32> to vector<2x32xf32>
    %95 = vector.extract_strided_slice %91 {offsets = [0, 96], sizes = [2, 32], strides = [1, 1]} : vector<2x128xf32> to vector<2x32xf32>
    %96 = arith.mulf %93, %65 : vector<2x32xf32>
    %97 = arith.mulf %92, %94 : vector<2x32xf32>
    %98 = arith.addf %96, %97 : vector<2x32xf32>
    %99 = math.tanh %98 : vector<2x32xf32>
    %100 = arith.mulf %95, %99 : vector<2x32xf32>
    %101 = arith.truncf %100 : vector<2x32xf32> to vector<2x32xbf16>
    %cst_26 = arith.constant dense<0.000000e+00> : vector<2x256xf32>
    %102 = tpu.matmul %101, %1, %cst_26 {dimension_numbers = #tpu.dot_dimension_numbers<[1], [0], [0], [1], [0, 0, 1, 1], [], []>} : vector<2x32xbf16>, vector<32x256xbf16>, vector<2x256xf32> -> vector<2x256xf32>
    %103 = vector.extract_strided_slice %102 {offsets = [0, 128], sizes = [2, 128], strides = [1, 1]} : vector<2x256xf32> to vector<2x128xf32>
    %104 = arith.index_cast %80 : i32 to index
    %c0_27 = arith.constant 0 : index
    %c0_28 = arith.constant 0 : index
    %105 = vector.load %arg3[%104, %c0_27, %c0_28] : memref<4x2x128xf32, #tpu.memory_space<vmem>>, vector<1x2x128xf32>
    %106 = vector.shape_cast %105 : vector<1x2x128xf32> to vector<2x128xf32>
    %107 = vector.shape_cast %103 : vector<2x128xf32> to vector<1x2x128xf32>
    tpu.vector_store %arg3[%104, %c0_27, %c0_28], %107 {strides = array<i32>} : memref<4x2x128xf32, #tpu.memory_space<vmem>>, vector<1x2x128xf32>,
    %108 = vector.extract_strided_slice %102 {offsets = [0, 0], sizes = [2, 128], strides = [1, 1]} : vector<2x256xf32> to vector<2x128xf32>
    %c3_i32_29 = arith.constant 3 : i32
    %c3_i32_30 = arith.constant 3 : i32
    %109 = arith.muli %arg0, %c3_i32_30 : i32
    %c2_i32_31 = arith.constant 2 : i32
    %110 = arith.muli %c2_i32_31, %arg0 : i32
    %c1_i32_32 = arith.constant 1 : i32
    %111 = arith.subi %c1_i32_32, %110 : i32
    %112 = arith.muli %111, %c3_i32_29 : i32
    %113 = arith.addi %109, %112 : i32
    %114 = arith.index_cast %113 : i32 to index
    %c0_33 = arith.constant 0 : index
    %c0_34 = arith.constant 0 : index
    %115 = vector.load %arg1[%114, %c0_33, %c0_34] : memref<4x2x128xf32, #tpu.memory_space<vmem>>, vector<1x2x128xf32>
    %116 = vector.shape_cast %115 : vector<1x2x128xf32> to vector<2x128xf32>
    %117 = arith.addf %116, %108 : vector<2x128xf32>
    %118 = math.tanh %117 : vector<2x128xf32>
    %119 = arith.negf %117 : vector<2x128xf32>
    %120 = math.exp %119 : vector<2x128xf32>
    %cst_35 = arith.constant 1.000000e+00 : f32
    %121 = vector.broadcast %cst_35 : f32 to vector<2x128xf32>
    %122 = arith.addf %121, %120 : vector<2x128xf32>
    %123 = arith.divf %121, %122 : vector<2x128xf32>
    %124 = arith.select %7, %118, %123 : vector<2x128xi1>, vector<2x128xf32>
    %125 = vector.extract_strided_slice %124 {offsets = [0, 0], sizes = [2, 32], strides = [1, 1]} : vector<2x128xf32> to vector<2x32xf32>
    %126 = vector.extract_strided_slice %124 {offsets = [0, 32], sizes = [2, 32], strides = [1, 1]} : vector<2x128xf32> to vector<2x32xf32>
    %127 = vector.extract_strided_slice %124 {offsets = [0, 64], sizes = [2, 32], strides = [1, 1]} : vector<2x128xf32> to vector<2x32xf32>
    %128 = vector.extract_strided_slice %124 {offsets = [0, 96], sizes = [2, 32], strides = [1, 1]} : vector<2x128xf32> to vector<2x32xf32>
    %129 = arith.mulf %126, %98 : vector<2x32xf32>
    %130 = arith.mulf %125, %127 : vector<2x32xf32>
    %131 = arith.addf %129, %130 : vector<2x32xf32>
    %132 = math.tanh %131 : vector<2x32xf32>
    %133 = arith.mulf %128, %132 : vector<2x32xf32>
    %134 = arith.truncf %133 : vector<2x32xf32> to vector<2x32xbf16>
    %cst_36 = arith.constant dense<0.000000e+00> : vector<2x256xf32>
    %135 = tpu.matmul %134, %1, %cst_36 {dimension_numbers = #tpu.dot_dimension_numbers<[1], [0], [0], [1], [0, 0, 1, 1], [], []>} : vector<2x32xbf16>, vector<32x256xbf16>, vector<2x256xf32> -> vector<2x256xf32>
    %136 = vector.extract_strided_slice %135 {offsets = [0, 128], sizes = [2, 128], strides = [1, 1]} : vector<2x256xf32> to vector<2x128xf32>
    %137 = arith.index_cast %113 : i32 to index
    %c0_37 = arith.constant 0 : index
    %c0_38 = arith.constant 0 : index
    %138 = vector.load %arg3[%137, %c0_37, %c0_38] : memref<4x2x128xf32, #tpu.memory_space<vmem>>, vector<1x2x128xf32>
    %139 = vector.shape_cast %138 : vector<1x2x128xf32> to vector<2x128xf32>
    %140 = vector.shape_cast %136 : vector<2x128xf32> to vector<1x2x128xf32>
    tpu.vector_store %arg3[%137, %c0_37, %c0_38], %140 {strides = array<i32>} : memref<4x2x128xf32, #tpu.memory_space<vmem>>, vector<1x2x128xf32>,
    %141 = vector.extract_strided_slice %135 {offsets = [0, 0], sizes = [2, 128], strides = [1, 1]} : vector<2x256xf32> to vector<2x128xf32>
    %c4_i32 = arith.constant 4 : i32
    return
  }
  func.func @transform_0(%arg0: i32) -> (i32, i32, i32) {
    %c0_i32 = arith.constant 0 : i32
    %c0_i32_0 = arith.constant 0 : i32
    %c0_i32_1 = arith.constant 0 : i32
    return %c0_i32, %c0_i32_0, %arg0 : i32, i32, i32
  }
  func.func @transform_1(%arg0: i32) -> (i32, i32, i32) {
    %c0_i32 = arith.constant 0 : i32
    %c0_i32_0 = arith.constant 0 : i32
    %c0_i32_1 = arith.constant 0 : i32
    return %arg0, %c0_i32, %c0_i32_0 : i32, i32, i32
  }
  func.func @transform_2(%arg0: i32) -> (i32, i32, i32) {
    %c0_i32 = arith.constant 0 : i32
    %c0_i32_0 = arith.constant 0 : i32
    %c0_i32_1 = arith.constant 0 : i32
    return %c0_i32, %c0_i32_0, %arg0 : i32, i32, i32
  }
}

module attributes {stable_mosaic.version = 11 : i64} {
  func.func @_lstm1_fc2_kernel(%arg0: i32, %arg1: memref<4x2x256xf32, #tpu.memory_space<vmem>>, %arg2: memref<32x128xbf16, #tpu.memory_space<vmem>>, %arg3: memref<1x128xf32, #tpu.memory_space<vmem>>, %arg4: memref<32x128xbf16, #tpu.memory_space<vmem>>, %arg5: memref<1x128xf32, #tpu.memory_space<vmem>>, %arg6: memref<2x128xf32, #tpu.memory_space<vmem>>) attributes {dimension_semantics = [#tpu.dimension_semantics<arbitrary>], iteration_bounds = array<i64: 1>, scalar_prefetch = 0 : i64, scratch_operands = 0 : i64, tpu.core_type = #tpu.core_type<tc>, window_params = [{pipeline_mode = #tpu.pipeline_mode<synchronous>, transform_indices = @transform_0, window_bounds = array<i64: 4, 2, 256>}, {pipeline_mode = #tpu.pipeline_mode<synchronous>, transform_indices = @transform_1, window_bounds = array<i64: 32, 128>}, {pipeline_mode = #tpu.pipeline_mode<synchronous>, transform_indices = @transform_2, window_bounds = array<i64: 1, 128>}, {pipeline_mode = #tpu.pipeline_mode<synchronous>, transform_indices = @transform_3, window_bounds = array<i64: 32, 128>}, {pipeline_mode = #tpu.pipeline_mode<synchronous>, transform_indices = @transform_4, window_bounds = array<i64: 1, 128>}, {pipeline_mode = #tpu.pipeline_mode<synchronous>, transform_indices = @transform_5, window_bounds = array<i64: 2, 128>}]} {
    %c0 = arith.constant 0 : index
    %c0_0 = arith.constant 0 : index
    %0 = vector.load %arg2[%c0, %c0_0] : memref<32x128xbf16, #tpu.memory_space<vmem>>, vector<32x128xbf16>
    %c0_1 = arith.constant 0 : index
    %c0_2 = arith.constant 0 : index
    %1 = vector.load %arg3[%c0_1, %c0_2] : memref<1x128xf32, #tpu.memory_space<vmem>>, vector<1x128xf32>
    %2 = tpu.iota {dimensions = array<i32: 1>} : vector<2x128xi32>
    %c64_i32 = arith.constant 64 : i32
    %3 = vector.broadcast %c64_i32 : i32 to vector<2x128xi32>
    %4 = arith.cmpi sge, %2, %3 : vector<2x128xi32>
    %c96_i32 = arith.constant 96 : i32
    %5 = vector.broadcast %c96_i32 : i32 to vector<2x128xi32>
    %6 = arith.cmpi slt, %2, %5 : vector<2x128xi32>
    %7 = arith.andi %4, %6 : vector<2x128xi1>
    %cst = arith.constant 0.000000e+00 : f32
    %8 = vector.broadcast %cst : f32 to vector<2x32xf32>
    %c0_i32 = arith.constant 0 : i32
    %c3_i32 = arith.constant 3 : i32
    %9 = arith.subi %c3_i32, %c0_i32 : i32
    %10 = arith.index_cast %9 : i32 to index
    %c0_3 = arith.constant 0 : index
    %c0_4 = arith.constant 0 : index
    %11 = vector.load %arg1[%10, %c0_3, %c0_4] : memref<4x2x256xf32, #tpu.memory_space<vmem>>, vector<1x2x256xf32>
    %12 = vector.shape_cast %11 : vector<1x2x256xf32> to vector<2x256xf32>
    %13 = vector.extract_strided_slice %12 {offsets = [0, 0], sizes = [2, 128], strides = [1, 1]} : vector<2x256xf32> to vector<2x128xf32>
    %14 = vector.extract_strided_slice %12 {offsets = [0, 128], sizes = [2, 128], strides = [1, 1]} : vector<2x256xf32> to vector<2x128xf32>
    %15 = arith.addf %13, %14 : vector<2x128xf32>
    %16 = vector.broadcast %1 : vector<1x128xf32> to vector<2x128xf32>
    %17 = arith.addf %15, %16 : vector<2x128xf32>
    %18 = arith.truncf %8 : vector<2x32xf32> to vector<2x32xbf16>
    %cst_5 = arith.constant dense<0.000000e+00> : vector<2x128xf32>
    %19 = tpu.matmul %18, %0, %cst_5 {dimension_numbers = #tpu.dot_dimension_numbers<[1], [0], [0], [1], [0, 0, 1, 1], [], []>} : vector<2x32xbf16>, vector<32x128xbf16>, vector<2x128xf32> -> vector<2x128xf32>
    %20 = arith.addf %17, %19 : vector<2x128xf32>
    %21 = math.tanh %20 : vector<2x128xf32>
    %22 = arith.negf %20 : vector<2x128xf32>
    %23 = math.exp %22 : vector<2x128xf32>
    %cst_6 = arith.constant 1.000000e+00 : f32
    %24 = vector.broadcast %cst_6 : f32 to vector<2x128xf32>
    %25 = arith.addf %24, %23 : vector<2x128xf32>
    %26 = arith.divf %24, %25 : vector<2x128xf32>
    %27 = arith.select %7, %21, %26 : vector<2x128xi1>, vector<2x128xf32>
    %28 = vector.extract_strided_slice %27 {offsets = [0, 0], sizes = [2, 32], strides = [1, 1]} : vector<2x128xf32> to vector<2x32xf32>
    %29 = vector.extract_strided_slice %27 {offsets = [0, 32], sizes = [2, 32], strides = [1, 1]} : vector<2x128xf32> to vector<2x32xf32>
    %30 = vector.extract_strided_slice %27 {offsets = [0, 64], sizes = [2, 32], strides = [1, 1]} : vector<2x128xf32> to vector<2x32xf32>
    %31 = vector.extract_strided_slice %27 {offsets = [0, 96], sizes = [2, 32], strides = [1, 1]} : vector<2x128xf32> to vector<2x32xf32>
    %32 = arith.mulf %29, %8 : vector<2x32xf32>
    %33 = arith.mulf %28, %30 : vector<2x32xf32>
    %34 = arith.addf %32, %33 : vector<2x32xf32>
    %35 = math.tanh %34 : vector<2x32xf32>
    %36 = arith.mulf %31, %35 : vector<2x32xf32>
    %c1_i32 = arith.constant 1 : i32
    %c3_i32_7 = arith.constant 3 : i32
    %37 = arith.subi %c3_i32_7, %c1_i32 : i32
    %38 = arith.index_cast %37 : i32 to index
    %c0_8 = arith.constant 0 : index
    %c0_9 = arith.constant 0 : index
    %39 = vector.load %arg1[%38, %c0_8, %c0_9] : memref<4x2x256xf32, #tpu.memory_space<vmem>>, vector<1x2x256xf32>
    %40 = vector.shape_cast %39 : vector<1x2x256xf32> to vector<2x256xf32>
    %41 = vector.extract_strided_slice %40 {offsets = [0, 0], sizes = [2, 128], strides = [1, 1]} : vector<2x256xf32> to vector<2x128xf32>
    %42 = vector.extract_strided_slice %40 {offsets = [0, 128], sizes = [2, 128], strides = [1, 1]} : vector<2x256xf32> to vector<2x128xf32>
    %43 = arith.addf %41, %42 : vector<2x128xf32>
    %44 = vector.broadcast %1 : vector<1x128xf32> to vector<2x128xf32>
    %45 = arith.addf %43, %44 : vector<2x128xf32>
    %46 = arith.truncf %36 : vector<2x32xf32> to vector<2x32xbf16>
    %cst_10 = arith.constant dense<0.000000e+00> : vector<2x128xf32>
    %47 = tpu.matmul %46, %0, %cst_10 {dimension_numbers = #tpu.dot_dimension_numbers<[1], [0], [0], [1], [0, 0, 1, 1], [], []>} : vector<2x32xbf16>, vector<32x128xbf16>, vector<2x128xf32> -> vector<2x128xf32>
    %48 = arith.addf %45, %47 : vector<2x128xf32>
    %49 = math.tanh %48 : vector<2x128xf32>
    %50 = arith.negf %48 : vector<2x128xf32>
    %51 = math.exp %50 : vector<2x128xf32>
    %cst_11 = arith.constant 1.000000e+00 : f32
    %52 = vector.broadcast %cst_11 : f32 to vector<2x128xf32>
    %53 = arith.addf %52, %51 : vector<2x128xf32>
    %54 = arith.divf %52, %53 : vector<2x128xf32>
    %55 = arith.select %7, %49, %54 : vector<2x128xi1>, vector<2x128xf32>
    %56 = vector.extract_strided_slice %55 {offsets = [0, 0], sizes = [2, 32], strides = [1, 1]} : vector<2x128xf32> to vector<2x32xf32>
    %57 = vector.extract_strided_slice %55 {offsets = [0, 32], sizes = [2, 32], strides = [1, 1]} : vector<2x128xf32> to vector<2x32xf32>
    %58 = vector.extract_strided_slice %55 {offsets = [0, 64], sizes = [2, 32], strides = [1, 1]} : vector<2x128xf32> to vector<2x32xf32>
    %59 = vector.extract_strided_slice %55 {offsets = [0, 96], sizes = [2, 32], strides = [1, 1]} : vector<2x128xf32> to vector<2x32xf32>
    %60 = arith.mulf %57, %34 : vector<2x32xf32>
    %61 = arith.mulf %56, %58 : vector<2x32xf32>
    %62 = arith.addf %60, %61 : vector<2x32xf32>
    %63 = math.tanh %62 : vector<2x32xf32>
    %64 = arith.mulf %59, %63 : vector<2x32xf32>
    %c2_i32 = arith.constant 2 : i32
    %c3_i32_12 = arith.constant 3 : i32
    %65 = arith.subi %c3_i32_12, %c2_i32 : i32
    %66 = arith.index_cast %65 : i32 to index
    %c0_13 = arith.constant 0 : index
    %c0_14 = arith.constant 0 : index
    %67 = vector.load %arg1[%66, %c0_13, %c0_14] : memref<4x2x256xf32, #tpu.memory_space<vmem>>, vector<1x2x256xf32>
    %68 = vector.shape_cast %67 : vector<1x2x256xf32> to vector<2x256xf32>
    %69 = vector.extract_strided_slice %68 {offsets = [0, 0], sizes = [2, 128], strides = [1, 1]} : vector<2x256xf32> to vector<2x128xf32>
    %70 = vector.extract_strided_slice %68 {offsets = [0, 128], sizes = [2, 128], strides = [1, 1]} : vector<2x256xf32> to vector<2x128xf32>
    %71 = arith.addf %69, %70 : vector<2x128xf32>
    %72 = vector.broadcast %1 : vector<1x128xf32> to vector<2x128xf32>
    %73 = arith.addf %71, %72 : vector<2x128xf32>
    %74 = arith.truncf %64 : vector<2x32xf32> to vector<2x32xbf16>
    %cst_15 = arith.constant dense<0.000000e+00> : vector<2x128xf32>
    %75 = tpu.matmul %74, %0, %cst_15 {dimension_numbers = #tpu.dot_dimension_numbers<[1], [0], [0], [1], [0, 0, 1, 1], [], []>} : vector<2x32xbf16>, vector<32x128xbf16>, vector<2x128xf32> -> vector<2x128xf32>
    %76 = arith.addf %73, %75 : vector<2x128xf32>
    %77 = math.tanh %76 : vector<2x128xf32>
    %78 = arith.negf %76 : vector<2x128xf32>
    %79 = math.exp %78 : vector<2x128xf32>
    %cst_16 = arith.constant 1.000000e+00 : f32
    %80 = vector.broadcast %cst_16 : f32 to vector<2x128xf32>
    %81 = arith.addf %80, %79 : vector<2x128xf32>
    %82 = arith.divf %80, %81 : vector<2x128xf32>
    %83 = arith.select %7, %77, %82 : vector<2x128xi1>, vector<2x128xf32>
    %84 = vector.extract_strided_slice %83 {offsets = [0, 0], sizes = [2, 32], strides = [1, 1]} : vector<2x128xf32> to vector<2x32xf32>
    %85 = vector.extract_strided_slice %83 {offsets = [0, 32], sizes = [2, 32], strides = [1, 1]} : vector<2x128xf32> to vector<2x32xf32>
    %86 = vector.extract_strided_slice %83 {offsets = [0, 64], sizes = [2, 32], strides = [1, 1]} : vector<2x128xf32> to vector<2x32xf32>
    %87 = vector.extract_strided_slice %83 {offsets = [0, 96], sizes = [2, 32], strides = [1, 1]} : vector<2x128xf32> to vector<2x32xf32>
    %88 = arith.mulf %85, %62 : vector<2x32xf32>
    %89 = arith.mulf %84, %86 : vector<2x32xf32>
    %90 = arith.addf %88, %89 : vector<2x32xf32>
    %91 = math.tanh %90 : vector<2x32xf32>
    %92 = arith.mulf %87, %91 : vector<2x32xf32>
    %c3_i32_17 = arith.constant 3 : i32
    %c3_i32_18 = arith.constant 3 : i32
    %93 = arith.subi %c3_i32_18, %c3_i32_17 : i32
    %94 = arith.index_cast %93 : i32 to index
    %c0_19 = arith.constant 0 : index
    %c0_20 = arith.constant 0 : index
    %95 = vector.load %arg1[%94, %c0_19, %c0_20] : memref<4x2x256xf32, #tpu.memory_space<vmem>>, vector<1x2x256xf32>
    %96 = vector.shape_cast %95 : vector<1x2x256xf32> to vector<2x256xf32>
    %97 = vector.extract_strided_slice %96 {offsets = [0, 0], sizes = [2, 128], strides = [1, 1]} : vector<2x256xf32> to vector<2x128xf32>
    %98 = vector.extract_strided_slice %96 {offsets = [0, 128], sizes = [2, 128], strides = [1, 1]} : vector<2x256xf32> to vector<2x128xf32>
    %99 = arith.addf %97, %98 : vector<2x128xf32>
    %100 = vector.broadcast %1 : vector<1x128xf32> to vector<2x128xf32>
    %101 = arith.addf %99, %100 : vector<2x128xf32>
    %102 = arith.truncf %92 : vector<2x32xf32> to vector<2x32xbf16>
    %cst_21 = arith.constant dense<0.000000e+00> : vector<2x128xf32>
    %103 = tpu.matmul %102, %0, %cst_21 {dimension_numbers = #tpu.dot_dimension_numbers<[1], [0], [0], [1], [0, 0, 1, 1], [], []>} : vector<2x32xbf16>, vector<32x128xbf16>, vector<2x128xf32> -> vector<2x128xf32>
    %104 = arith.addf %101, %103 : vector<2x128xf32>
    %105 = math.tanh %104 : vector<2x128xf32>
    %106 = arith.negf %104 : vector<2x128xf32>
    %107 = math.exp %106 : vector<2x128xf32>
    %cst_22 = arith.constant 1.000000e+00 : f32
    %108 = vector.broadcast %cst_22 : f32 to vector<2x128xf32>
    %109 = arith.addf %108, %107 : vector<2x128xf32>
    %110 = arith.divf %108, %109 : vector<2x128xf32>
    %111 = arith.select %7, %105, %110 : vector<2x128xi1>, vector<2x128xf32>
    %112 = vector.extract_strided_slice %111 {offsets = [0, 0], sizes = [2, 32], strides = [1, 1]} : vector<2x128xf32> to vector<2x32xf32>
    %113 = vector.extract_strided_slice %111 {offsets = [0, 32], sizes = [2, 32], strides = [1, 1]} : vector<2x128xf32> to vector<2x32xf32>
    %114 = vector.extract_strided_slice %111 {offsets = [0, 64], sizes = [2, 32], strides = [1, 1]} : vector<2x128xf32> to vector<2x32xf32>
    %115 = vector.extract_strided_slice %111 {offsets = [0, 96], sizes = [2, 32], strides = [1, 1]} : vector<2x128xf32> to vector<2x32xf32>
    %116 = arith.mulf %113, %90 : vector<2x32xf32>
    %117 = arith.mulf %112, %114 : vector<2x32xf32>
    %118 = arith.addf %116, %117 : vector<2x32xf32>
    %119 = math.tanh %118 : vector<2x32xf32>
    %120 = arith.mulf %115, %119 : vector<2x32xf32>
    %c4_i32 = arith.constant 4 : i32
    %121 = arith.truncf %120 : vector<2x32xf32> to vector<2x32xbf16>
    %c0_23 = arith.constant 0 : index
    %c0_24 = arith.constant 0 : index
    %122 = vector.load %arg4[%c0_23, %c0_24] : memref<32x128xbf16, #tpu.memory_space<vmem>>, vector<32x128xbf16>
    %cst_25 = arith.constant dense<0.000000e+00> : vector<2x128xf32>
    %123 = tpu.matmul %121, %122, %cst_25 {dimension_numbers = #tpu.dot_dimension_numbers<[1], [0], [0], [1], [0, 0, 1, 1], [], []>} : vector<2x32xbf16>, vector<32x128xbf16>, vector<2x128xf32> -> vector<2x128xf32>
    %c0_26 = arith.constant 0 : index
    %c0_27 = arith.constant 0 : index
    %124 = vector.load %arg5[%c0_26, %c0_27] : memref<1x128xf32, #tpu.memory_space<vmem>>, vector<1x128xf32>
    %125 = vector.broadcast %124 : vector<1x128xf32> to vector<2x128xf32>
    %126 = arith.addf %123, %125 : vector<2x128xf32>
    %c0_28 = arith.constant 0 : index
    %c0_29 = arith.constant 0 : index
    %127 = vector.load %arg6[%c0_28, %c0_29] : memref<2x128xf32, #tpu.memory_space<vmem>>, vector<2x128xf32>
    tpu.vector_store %arg6[%c0_28, %c0_29], %126 {strides = array<i32>} : memref<2x128xf32, #tpu.memory_space<vmem>>, vector<2x128xf32>,
    return
  }
  func.func @transform_0(%arg0: i32) -> (i32, i32, i32) {
    %c0_i32 = arith.constant 0 : i32
    %c0_i32_0 = arith.constant 0 : i32
    %c0_i32_1 = arith.constant 0 : i32
    %c0_i32_2 = arith.constant 0 : i32
    return %c0_i32, %c0_i32_0, %c0_i32_1 : i32, i32, i32
  }
  func.func @transform_1(%arg0: i32) -> (i32, i32) {
    %c0_i32 = arith.constant 0 : i32
    %c0_i32_0 = arith.constant 0 : i32
    %c0_i32_1 = arith.constant 0 : i32
    return %c0_i32, %c0_i32_0 : i32, i32
  }
  func.func @transform_2(%arg0: i32) -> (i32, i32) {
    %c0_i32 = arith.constant 0 : i32
    %c0_i32_0 = arith.constant 0 : i32
    %c0_i32_1 = arith.constant 0 : i32
    return %c0_i32, %c0_i32_0 : i32, i32
  }
  func.func @transform_3(%arg0: i32) -> (i32, i32) {
    %c0_i32 = arith.constant 0 : i32
    %c0_i32_0 = arith.constant 0 : i32
    %c0_i32_1 = arith.constant 0 : i32
    return %c0_i32, %c0_i32_0 : i32, i32
  }
  func.func @transform_4(%arg0: i32) -> (i32, i32) {
    %c0_i32 = arith.constant 0 : i32
    %c0_i32_0 = arith.constant 0 : i32
    %c0_i32_1 = arith.constant 0 : i32
    return %c0_i32, %c0_i32_0 : i32, i32
  }
  func.func @transform_5(%arg0: i32) -> (i32, i32) {
    %c0_i32 = arith.constant 0 : i32
    %c0_i32_0 = arith.constant 0 : i32
    %c0_i32_1 = arith.constant 0 : i32
    return %c0_i32, %c0_i32_0 : i32, i32
  }
}

</mosaic_0001>

<bundles_post_ra>
// kernel: forward.6
= control target key start
LH: loop header
LB: loop body
LE: loop exit
PB: predicated region body
PF: predicated region fallthrough
CT: control target
= control target key end

     0   :  { %vm50_vm0 = vcmask 130048   ;;  %vm298_vm1 = vcmask 257024   ;;  %s582_s1 = inlined_call_operand.vmem [shape: bf16[16,32], index: 1, kind: input, shape index: {}]   ;;  %s583_s0 = inlined_call_operand.vmem [shape: f32[128,16], index: 0, kind: input, shape index: {}]   ;;  %s584_s2 = inlined_call_operand.vmem [shape: f32[1,32], index: 2, kind: input, shape index: {}]   ;;  %s585_s3 = inlined_call_operand.vmem [shape: f32[1,32], index: 3, kind: input, shape index: {}]   ;;  %s586_s4 = inlined_call_operand.vmem [shape: bf16[128,32], index: 4, kind: output, shape index: {}]  }
   0x1   :  { %v391_v0 = vld [vmem:[%s582_s1] sm:$0xff]   ;;  %v19_v2 = vld [vmem:[%s583_s0 + $0x8] sm:$0xff]  ;;  %v20_v6 = vld [vmem:[%s583_s0 + $0x10] sm:$0xff] }
   0x2   :  { %v18_v1 = vld [vmem:[%s583_s0] sm:$0xff]  ;;  %371 = vmatprep.subr.bf16.mxu0 %v391_v0  ;;  %389 = vmatprep.subr.bf16.mxu1 %v391_v0  ;;  %v27_v5 = vld [vmem:[%s583_s0 + $0x48] sm:$0xff]  ;;  %v21_v7 = vld [vmem:[%s583_s0 + $0x18] sm:$0xff] }
   0x3   :  { %v26_v3 = vld [vmem:[%s583_s0 + $0x40] sm:$0xff]  ;;  %v34_v4 = vpack.c.bf16 %v19_v2, %v18_v1  ;;  %372 = vmatpush3.bf16.msra.mxu0 %v391_v0  ;;  %390 = vmatpush3.bf16.msra.mxu1 %v391_v0  ;;  %v35_v9 = vpack.c.bf16 %v21_v7, %v20_v6  ;;  %v28_v10 = vld [vmem:[%s583_s0 + $0x50] sm:$0xff]  ;;  %v29_v11 = vld [vmem:[%s583_s0 + $0x58] sm:$0xff] }
   0x4   :  { %v38_v8 = vpack.c.bf16 %v27_v5, %v26_v3  ;;  %v22_v12 = vld [vmem:[%s583_s0 + $0x20] sm:$0xff]  ;;  %v39_v13 = vpack.c.bf16 %v29_v11, %v28_v10  ;;  %v23_v14 = vld [vmem:[%s583_s0 + $0x28] sm:$0xff]  ;;  %v24_v19 = vld [vmem:[%s583_s0 + $0x30] sm:$0xff] }
   0x5   :  { %373 = vmatprep.mubr.msk.bf16.mxu0 %vm50_vm0, %v34_v4  ;;  %v30_v15 = vld [vmem:[%s583_s0 + $0x60] sm:$0xff]  ;;  %v31_v16 = vld [vmem:[%s583_s0 + $0x68] sm:$0xff]  ;;  %v36_v17 = vpack.c.bf16 %v23_v14, %v22_v12  ;;  %v25_v20 = vld [vmem:[%s583_s0 + $0x38] sm:$0xff] }
   0x6   :  { %381 = vmatprep.mubr.msk.bf16.mxu1 %vm50_vm0, %v38_v8  ;;  %v40_v18 = vpack.c.bf16 %v31_v16, %v30_v15  ;;  %374 = vmatmul.mubr.msk.bf16.vlgmr.msra.gmra.mxu0 %vm50_vm0, %v35_v9  ;;  %v32_v21 = vld [vmem:[%s583_s0 + $0x70] sm:$0xff]  ;;  %v33_v22 = vld [vmem:[%s583_s0 + $0x78] sm:$0xff]  ;;  %v37_v23 = vpack.c.bf16 %v25_v20, %v24_v19  ;;  %v479_v25 = vld [vmem:[%s584_s2] ss:$0 sm:$0xff] }
   0x7   :  { %382 = vmatmul.mubr.msk.bf16.vlgmr.msra.gmra.mxu1 %vm50_vm0, %v39_v13  ;;  %377 = vmatprep.mubr.msk.bf16.mxu0 %vm50_vm0, %v36_v17  ;;  %v41_v24 = vpack.c.bf16 %v33_v22, %v32_v21  ;;  %v484_v27 = vld [vmem:[%s585_s3] ss:$0 sm:$0xff] }
   0x8   :  { %385 = vmatprep.mubr.msk.bf16.mxu1 %vm50_vm0, %v40_v18 }
   0xe   :  { %378 = vmatmul.mubr.msk.bf16.gmra.mxu0 %vm50_vm0, %v37_v23 }
   0xf   :  { %386 = vmatmul.mubr.msk.bf16.gmra.mxu1 %vm50_vm0, %v41_v24 }
  0xc6   :  { %v375_v26 = vpop.f32.mrf.mxu0 }
  0xc7   :  { %v383_v28 = vpop.f32.mrf.mxu1  ;;  %v181_v29 = vmul.f32 %v375_v26, %v479_v25 }
  0xc8   :  { %v189_v30 = vmul.f32 %v383_v28, %v479_v25  ;;  %v109_v31 = vpop.f32.mrf.mxu0 }
  0xc9   :  { %v141_v32 = vpop.f32.mrf.mxu1  ;;  %v204_v33 = vadd.f32 %v484_v27, %v181_v29  ;;  %v179_v35 = vmul.f32 %v479_v25, %v109_v31 }
  0xca   :  { %v212_v34 = vadd.f32 %v484_v27, %v189_v30  ;;  %v187_v36 = vmul.f32 %v479_v25, %v141_v32  ;;  %v376_v37 = vpop.f32.mrf.mxu0 }
  0xcb   :  { %v384_v38 = vpop.f32.mrf.mxu1  ;;  %v220_v39 = vmax.f32 %v204_v33, 0.0  ;;  %v202_v41 = vadd.f32 %v484_v27, %v179_v35  ;;  %v182_v43 = vmul.f32 %v376_v37, %v479_v25 }
  0xcc   :  { %v228_v40 = vmax.f32 %v212_v34, 0.0  ;;  %v210_v42 = vadd.f32 %v484_v27, %v187_v36  ;;  %v190_v44 = vmul.f32 %v384_v38, %v479_v25  ;;  %v112_v45 = vpop.f32.mrf.mxu0 }
  0xcd   :  { %v144_v46 = vpop.f32.mrf.mxu1  ;;  %v348_v47 = vpack.c.bf16 %v220_v39, %v220_v39  ;;  %v218_v49 = vmax.f32 %v202_v41, 0.0  ;;  %v205_v51 = vadd.f32 %v484_v27, %v182_v43  ;;  %v180_v53 = vmul.f32 %v479_v25, %v112_v45 }
  0xce   :  { %v356_v48 = vpack.c.bf16 %v228_v40, %v228_v40  ;;  %v226_v50 = vmax.f32 %v210_v42, 0.0  ;;  %v213_v52 = vadd.f32 %v484_v27, %v190_v44  ;;  %v188_v54 = vmul.f32 %v479_v25, %v144_v46  ;;  %v379_v55 = vpop.f32.mrf.mxu0 }
  0xcf   :  { %v387_v56 = vpop.f32.mrf.mxu1  ;;  %301 = vst.msk [vmem:[%s586_s4 + $0x8] sm:$0xf] %vm298_vm1, %v348_v47  ;;  %v346_v57 = vpack.c.bf16 %v218_v49, %v218_v49  ;;  %v185_v59 = vmul.f32 %v379_v55, %v479_v25  ;;  %v221_v61 = vmax.f32 %v205_v51, 0.0  ;;  %v203_v63 = vadd.f32 %v484_v27, %v180_v53 }
  0xd0   :  { %309 = vst.msk [vmem:[%s586_s4 + $0x28] sm:$0xf] %vm298_vm1, %v356_v48  ;;  %v354_v58 = vpack.c.bf16 %v226_v50, %v226_v50  ;;  %v193_v60 = vmul.f32 %v387_v56, %v479_v25  ;;  %v229_v62 = vmax.f32 %v213_v52, 0.0  ;;  %v211_v0 = vadd.f32 %v484_v27, %v188_v54  ;;  %v125_v1 = vpop.f32.mrf.mxu0 }
  0xd1   :  { %v157_v2 = vpop.f32.mrf.mxu1  ;;  %299 = vst.msk [vmem:[%s586_s4] sm:$0xf] %vm298_vm1, %v346_v57  ;;  %v208_v3 = vadd.f32 %v484_v27, %v185_v59  ;;  %v183_v5 = vmul.f32 %v479_v25, %v125_v1  ;;  %v349_v7 = vpack.c.bf16 %v221_v61, %v221_v61  ;;  %v219_v9 = vmax.f32 %v203_v63, 0.0 }
  0xd2   :  { %307 = vst.msk [vmem:[%s586_s4 + $0x20] sm:$0xf] %vm298_vm1, %v354_v58  ;;  %v216_v4 = vadd.f32 %v484_v27, %v193_v60  ;;  %v191_v6 = vmul.f32 %v479_v25, %v157_v2  ;;  %v357_v8 = vpack.c.bf16 %v229_v62, %v229_v62  ;;  %v227_v10 = vmax.f32 %v211_v0, 0.0  ;;  %v380_v11 = vpop.f32.mrf.mxu0 }
  0xd3   :  { %v388_v12 = vpop.f32.mrf.mxu1  ;;  %v224_v13 = vmax.f32 %v208_v3, 0.0  ;;  %v206_v15 = vadd.f32 %v484_v27, %v183_v5  ;;  %302 = vst.msk [vmem:[%s586_s4 + $0xc] sm:$0xf] %vm298_vm1, %v349_v7  ;;  %v347_v17 = vpack.c.bf16 %v219_v9, %v219_v9  ;;  %v186_v19 = vmul.f32 %v380_v11, %v479_v25 }
  0xd4   :  { %v232_v14 = vmax.f32 %v216_v4, 0.0  ;;  %v214_v16 = vadd.f32 %v484_v27, %v191_v6  ;;  %310 = vst.msk [vmem:[%s586_s4 + $0x2c] sm:$0xf] %vm298_vm1, %v357_v8  ;;  %v355_v18 = vpack.c.bf16 %v227_v10, %v227_v10  ;;  %v194_v20 = vmul.f32 %v388_v12, %v479_v25  ;;  %v128_v21 = vpop.f32.mrf.mxu0 }
  0xd5   :  { %v160_v22 = vpop.f32.mrf.mxu1  ;;  %v352_v23 = vpack.c.bf16 %v224_v13, %v224_v13  ;;  %v222_v26 = vmax.f32 %v206_v15, 0.0  ;;  %300 = vst.msk [vmem:[%s586_s4 + $0x4] sm:$0xf] %vm298_vm1, %v347_v17  ;;  %v209_v29 = vadd.f32 %v484_v27, %v186_v19  ;;  %v184_v31 = vmul.f32 %v479_v25, %v128_v21 }
  0xd6   :  { %v360_v24 = vpack.c.bf16 %v232_v14, %v232_v14  ;;  %v230_v28 = vmax.f32 %v214_v16, 0.0  ;;  %308 = vst.msk [vmem:[%s586_s4 + $0x24] sm:$0xf] %vm298_vm1, %v355_v18  ;;  %v217_v30 = vadd.f32 %v484_v27, %v194_v20  ;;  %v192_v32 = vmul.f32 %v479_v25, %v160_v22 }
  0xd7   :  { %305 = vst.msk [vmem:[%s586_s4 + $0x18] sm:$0xf] %vm298_vm1, %v352_v23  ;;  %v350_v33 = vpack.c.bf16 %v222_v26, %v222_v26  ;;  %v225_v35 = vmax.f32 %v209_v29, 0.0  ;;  %v207_v37 = vadd.f32 %v484_v27, %v184_v31 }
  0xd8   :  { %313 = vst.msk [vmem:[%s586_s4 + $0x38] sm:$0xf] %vm298_vm1, %v360_v24  ;;  %v358_v34 = vpack.c.bf16 %v230_v28, %v230_v28  ;;  %v233_v36 = vmax.f32 %v217_v30, 0.0  ;;  %v215_v38 = vadd.f32 %v484_v27, %v192_v32 }
  0xd9   :  { %303 = vst.msk [vmem:[%s586_s4 + $0x10] sm:$0xf] %vm298_vm1, %v350_v33  ;;  %v353_v25 = vpack.c.bf16 %v225_v35, %v225_v35  ;;  %v223_v40 = vmax.f32 %v207_v37, 0.0 }
  0xda   :  { %311 = vst.msk [vmem:[%s586_s4 + $0x30] sm:$0xf] %vm298_vm1, %v358_v34  ;;  %v361_v39 = vpack.c.bf16 %v233_v36, %v233_v36  ;;  %v231_v41 = vmax.f32 %v215_v38, 0.0 }
  0xdb   :  { %306 = vst.msk [vmem:[%s586_s4 + $0x1c] sm:$0xf] %vm298_vm1, %v353_v25  ;;  %v351_v27 = vpack.c.bf16 %v223_v40, %v223_v40 }
  0xdc   :  { %314 = vst.msk [vmem:[%s586_s4 + $0x3c] sm:$0xf] %vm298_vm1, %v361_v39  ;;  %v359_v42 = vpack.c.bf16 %v231_v41, %v231_v41 }
  0xdd   :  { %304 = vst.msk [vmem:[%s586_s4 + $0x14] sm:$0xf] %vm298_vm1, %v351_v27 }
  0xde   :  { %312 = vst.msk [vmem:[%s586_s4 + $0x34] sm:$0xf] %vm298_vm1, %v359_v42 }

// kernel: forward.7
= control target key start
LH: loop header
LB: loop body
LE: loop exit
PB: predicated region body
PF: predicated region fallthrough
CT: control target
= control target key end

     0   :  { %vm314_vm0 = vcmask 261120   ;;  %vm659_vm1 = vcmask 519168   ;;  %s1213_s1 = inlined_call_operand.vmem [shape: bf16[288,64], index: 1, kind: input, shape index: {}]   ;;  %s1214_s0 = inlined_call_operand.vmem [shape: bf16[128,288], index: 0, kind: input, shape index: {}]   ;;  %s1215_s2 = inlined_call_operand.vmem [shape: f32[1,64], index: 2, kind: input, shape index: {}]   ;;  %s1216_s3 = inlined_call_operand.vmem [shape: f32[1,64], index: 3, kind: input, shape index: {}]   ;;  %s1217_s4 = inlined_call_operand.vmem [shape: bf16[128,64], index: 4, kind: output, shape index: {}]  }
   0x1   :  { %v874_v0 = vld [vmem:[%s1213_s1 + $0x78] sm:$0xff]   ;;  %v876_v2 = vld [vmem:[%s1213_s1 + $0x70] sm:$0xff]   ;;  %v878_v4 = vld [vmem:[%s1213_s1 + $0x68] sm:$0xff]  }
   0x2   :  { %v875_v1 = vld [vmem:[%s1213_s1 + $0x38] sm:$0xff]   ;;  %764 = vmatprep.subr.bf16.mxu0 %v874_v0  ;;  %858 = vmatprep.subr.bf16.mxu1 %v874_v0  ;;  %v877_v3 = vld [vmem:[%s1213_s1 + $0x30] sm:$0xff]   ;;  %v879_v5 = vld [vmem:[%s1213_s1 + $0x28] sm:$0xff]  }
   0x3   :  { %765 = vmatpush3.bf16.msra.mxu0 %v875_v1  ;;  %866 = vmatpush3.bf16.msra.mxu1 %v875_v1  ;;  %v880_v6 = vld [vmem:[%s1213_s1 + $0x60] sm:$0xff]   ;;  %v882_v8 = vld [vmem:[%s1213_s1 + $0x58] sm:$0xff]   ;;  %v884_v10 = vld [vmem:[%s1213_s1 + $0x50] sm:$0xff]  }
   0x4   :  { %766 = vmatprep.subr.bf16.mxu0 %v876_v2  ;;  %859 = vmatprep.subr.bf16.mxu1 %v876_v2  ;;  %v881_v7 = vld [vmem:[%s1213_s1 + $0x20] sm:$0xff]   ;;  %v883_v9 = vld [vmem:[%s1213_s1 + $0x18] sm:$0xff]   ;;  %v885_v13 = vld [vmem:[%s1213_s1 + $0x10] sm:$0xff]  }
   0x5   :  { %v892_v11 = vld [vmem:[%s1214_s0 + $0x4] ss:$12 sps:$4 sm:$0xff]   ;;  %v895_v12 = vld [vmem:[%s1214_s0 + $0x94] ss:$12 sps:$4 sm:$0xff]   ;;  %v886_v14 = vld [vmem:[%s1213_s1 + $0x48] sm:$0xff]  }
   0x6   :  { %371 = vmatprep.mubr.bf16.mxu0 %v892_v11  ;;  %419 = vmatprep.mubr.bf16.mxu1 %v895_v12  ;;  %v887_v15 = vld [vmem:[%s1213_s1 + $0x8] sm:$0xff]   ;;  %v888_v16 = vld [vmem:[%s1213_s1 + $0x40] sm:$0xff]   ;;  %v893_v20 = vld [vmem:[%s1214_s0 + $0x90] ss:$12 sps:$4 sm:$0xff]  }
   0x7   :  { %767 = vmatpush3.bf16.msra.mxu0 %v877_v3  ;;  %867 = vmatpush3.bf16.msra.mxu1 %v877_v3  ;;  %v889_v17 = vld [vmem:[%s1213_s1] sm:$0xff]   ;;  %v896_v19 = vld [vmem:[%s1213_s1 + $0x88] sm:$0xff]   ;;  %v907_v28 = vld [vmem:[%s1214_s0 + $0x30] ss:$12 sps:$4 sm:$0xff]  }
   0x8   :  { %768 = vmatprep.subr.bf16.mxu0 %v878_v4  ;;  %860 = vmatprep.subr.bf16.mxu1 %v878_v4  ;;  %v890_v18 = vld [vmem:[%s1214_s0] ss:$12 sps:$4 sm:$0xff]   ;;  %v897_v21 = vld [vmem:[%s1214_s0 + $0x1c] ss:$12 sps:$4 sm:$0xff]   ;;  %v901_v24 = vld [vmem:[%s1214_s0 + $0x18] ss:$12 sps:$4 sm:$0xff]  }
   0x9   :  { %v899_v22 = vld [vmem:[%s1214_s0 + $0xac] ss:$12 sps:$4 sm:$0xff]   ;;  %v903_v23 = vld [vmem:[%s1213_s1 + $0x80] sm:$0xff]   ;;  %v902_v25 = vld [vmem:[%s1214_s0 + $0xa8] ss:$12 sps:$4 sm:$0xff]  }
   0xa   :  { %v904_v26 = vld [vmem:[%s1214_s0 + $0x34] ss:$12 sps:$4 sm:$0xff]   ;;  %v909_v30 = vld [vmem:[%s1214_s0 + $0x4c] ss:$12 sps:$4 sm:$0xff]   ;;  %v913_v33 = vld [vmem:[%s1214_s0 + $0x50] ss:$12 sps:$4 sm:$0xff]  }
   0xb   :  { %769 = vmatpush3.bf16.msra.mxu0 %v879_v5  ;;  %868 = vmatpush3.bf16.msra.mxu1 %v879_v5  ;;  %v906_v27 = vld [vmem:[%s1214_s0 + $0x8] ss:$12 sps:$4 sm:$0xff]   ;;  %v908_v29 = vld [vmem:[%s1214_s0 + $0x20] ss:$12 sps:$4 sm:$0xff]   ;;  %v911_v31 = vld [vmem:[%s1214_s0 + $0x38] ss:$12 sps:$4 sm:$0xff]  }
   0xc   :  { %770 = vmatprep.subr.bf16.mxu0 %v880_v6  ;;  %861 = vmatprep.subr.bf16.mxu1 %v880_v6  ;;  %v912_v32 = vld [vmem:[%s1214_s0 + $0x48] ss:$12 sps:$4 sm:$0xff]   ;;  %v914_v34 = vld [vmem:[%s1214_s0 + $0x64] ss:$12 sps:$4 sm:$0xff]   ;;  %v917_v36 = vld [vmem:[%s1214_s0 + $0x60] ss:$12 sps:$4 sm:$0xff]  }
   0xd   :  { %v916_v35 = vld [vmem:[%s1214_s0 + $0x68] ss:$12 sps:$4 sm:$0xff]   ;;  %v918_v37 = vld [vmem:[%s1214_s0 + $0x80] ss:$12 sps:$4 sm:$0xff]   ;;  %v921_v39 = vld [vmem:[%s1214_s0 + $0x98] ss:$12 sps:$4 sm:$0xff]  }
   0xe   :  { %v919_v38 = vld [vmem:[%s1214_s0 + $0x7c] ss:$12 sps:$4 sm:$0xff]   ;;  %v922_v40 = vld [vmem:[%s1214_s0 + $0x78] ss:$12 sps:$4 sm:$0xff]   ;;  %v1102_v61 = vld [vmem:[%s1215_s2] ss:$0 sm:$0xff] }
   0xf   :  { %771 = vmatpush3.bf16.msra.mxu0 %v881_v7  ;;  %869 = vmatpush3.bf16.msra.mxu1 %v881_v7  ;;  %v923_v41 = vld [vmem:[%s1214_s0 + $0xb0] ss:$12 sps:$4 sm:$0xff]   ;;  %v1107_v0 = vld [vmem:[%s1216_s3] ss:$0 sm:$0xff] }
  0x10   :  { %772 = vmatprep.subr.bf16.mxu0 %v882_v8  ;;  %862 = vmatprep.subr.bf16.mxu1 %v882_v8 }
  0x13   :  { %773 = vmatpush3.bf16.msra.mxu0 %v883_v9  ;;  %870 = vmatpush3.bf16.msra.mxu1 %v883_v9 }
  0x14   :  { %774 = vmatprep.subr.bf16.mxu0 %v884_v10  ;;  %863 = vmatprep.subr.bf16.mxu1 %v884_v10 }
  0x17   :  { %775 = vmatpush3.bf16.msra.mxu0 %v885_v13  ;;  %871 = vmatpush3.bf16.msra.mxu1 %v885_v13 }
  0x18   :  { %776 = vmatprep.subr.bf16.mxu0 %v886_v14  ;;  %864 = vmatprep.subr.bf16.mxu1 %v886_v14 }
  0x1b   :  { %777 = vmatpush3.bf16.msra.mxu0 %v887_v15  ;;  %872 = vmatpush3.bf16.msra.mxu1 %v887_v15 }
  0x1c   :  { %778 = vmatprep.subr.bf16.mxu0 %v888_v16  ;;  %865 = vmatprep.subr.bf16.mxu1 %v888_v16 }
  0x1f   :  { %779 = vmatpush3.bf16.msra.mxu0 %v889_v17  ;;  %873 = vmatpush3.bf16.msra.mxu1 %v889_v17 }
  0x20   :  { %838 = vmatprep.subr.bf16.mxu1 %v896_v19 }
  0x22   :  { %372 = vmatmul.mubr.bf16.vlgmr.msra.gmra.mxu0 %v890_v18  ;;  %420 = vmatmul.mubr.bf16.vlgmr.msra.gmra.mxu1 %v893_v20 }
  0x23   :  { %839 = vmatpush3.bf16.msra.mxu1 %v896_v19  ;;  %379 = vmatprep.mubr.bf16.mxu0 %v897_v21 }
  0x24   :  { %427 = vmatprep.mubr.bf16.mxu1 %v899_v22  ;;  %840 = vmatprep.subr.bf16.mxu1 %v903_v23 }
  0x27   :  { %841 = vmatpush3.bf16.msra.mxu1 %v903_v23 }
  0x2a   :  { %380 = vmatmul.mubr.bf16.gmra.mxu0 %v901_v24  ;;  %428 = vmatmul.mubr.bf16.gmra.mxu1 %v902_v25 }
  0x2b   :  { %387 = vmatprep.mubr.bf16.mxu0 %v904_v26  ;;  %842 = vmatprep.mubr.msk.bf16.mxu1 %vm314_vm0, %v906_v27 }
  0x32   :  { %388 = vmatmul.mubr.bf16.gmra.mxu0 %v907_v28  ;;  %843 = vmatmul.mubr.msk.bf16.vlgmr.msra.gmra.mxu1 %vm314_vm0, %v908_v29 }
  0x33   :  { %395 = vmatprep.mubr.bf16.mxu0 %v909_v30  ;;  %846 = vmatprep.mubr.msk.bf16.mxu1 %vm314_vm0, %v911_v31 }
  0x3a   :  { %396 = vmatmul.mubr.bf16.gmra.mxu0 %v912_v32  ;;  %847 = vmatmul.mubr.msk.bf16.gmra.mxu1 %vm314_vm0, %v913_v33 }
  0x3b   :  { %403 = vmatprep.mubr.bf16.mxu0 %v914_v34  ;;  %850 = vmatprep.mubr.msk.bf16.mxu1 %vm314_vm0, %v916_v35 }
  0x42   :  { %404 = vmatmul.mubr.bf16.gmra.mxu0 %v917_v36  ;;  %851 = vmatmul.mubr.msk.bf16.gmra.mxu1 %vm314_vm0, %v918_v37 }
  0x43   :  { %411 = vmatprep.mubr.bf16.mxu0 %v919_v38  ;;  %854 = vmatprep.mubr.msk.bf16.mxu1 %vm314_vm0, %v921_v39 }
  0x4a   :  { %412 = vmatmul.mubr.bf16.gmra.mxu0 %v922_v40  ;;  %855 = vmatmul.mubr.msk.bf16.gmra.mxu1 %vm314_vm0, %v923_v41 }
  0xe2   :  { %v780_v42 = vpop.f32.mrf.mxu0  ;;  %v1083_v43 = vpop.f32.mrf.mxu1 }
  0xe4   :  { %v781_v44 = vpop.f32.mrf.mxu0  ;;  %v1085_v45 = vpop.f32.mrf.mxu1 }
  0xe5   :  { %v782_v62 = vadd.f32 %v781_v44, %v780_v42 }
  0xe6   :  { %v783_v46 = vpop.f32.mrf.mxu0  ;;  %v1087_v47 = vpop.f32.mrf.mxu1 }
  0xe8   :  { %v784_v48 = vpop.f32.mrf.mxu0  ;;  %v1089_v49 = vpop.f32.mrf.mxu1 }
  0xe9   :  { %v785_v11 = vadd.f32 %v784_v48, %v783_v46 }
  0xea   :  { %v786_v50 = vpop.f32.mrf.mxu0  ;;  %v1091_v51 = vpop.f32.mrf.mxu1 }
  0xec   :  { %v787_v52 = vpop.f32.mrf.mxu0  ;;  %v1093_v53 = vpop.f32.mrf.mxu1 }
  0xed   :  { %v788_v58 = vadd.f32 %v787_v52, %v786_v50 }
  0xee   :  { %v789_v54 = vpop.f32.mrf.mxu0  ;;  %v1095_v55 = vpop.f32.mrf.mxu1 }
  0xf0   :  { %v790_v56 = vpop.f32.mrf.mxu0  ;;  %v1097_v57 = vpop.f32.mrf.mxu1 }
  0xf1   :  { %v791_v3 = vadd.f32 %v790_v56, %v789_v54 }
  0xf2   :  { %v792_v59 = vpop.f32.mrf.mxu0  ;;  %v844_v60 = vpop.f32.mrf.mxu1 }
  0xf3   :  { %v479_v63 = vadd.f32 %v844_v60, %v788_v58 }
  0xf4   :  { %v793_v1 = vpop.f32.mrf.mxu0  ;;  %v470_v2 = vpop.f32.mrf.mxu1 }
  0xf5   :  { %v542_v4 = vmul.f32 %v1102_v61, %v479_v63  ;;  %v471_v5 = vadd.f32 %v782_v62, %v470_v2  ;;  %v794_v21 = vadd.f32 %v793_v1, %v792_v59 }
  0xf6   :  { %v795_v6 = vpop.f32.mrf.mxu0  ;;  %v845_v7 = vpop.f32.mrf.mxu1 }
  0xf7   :  { %v565_v8 = vadd.f32 %v1107_v0, %v542_v4  ;;  %v540_v9 = vmul.f32 %v1102_v61, %v471_v5  ;;  %v482_v10 = vadd.f32 %v845_v7, %v791_v3 }
  0xf8   :  { %v796_v12 = vpop.f32.mrf.mxu0  ;;  %v473_v13 = vpop.f32.mrf.mxu1 }
  0xf9   :  { %v581_v14 = vmax.f32 %v565_v8, 0.0  ;;  %v563_v15 = vadd.f32 %v1107_v0, %v540_v9  ;;  %v543_v16 = vmul.f32 %v1102_v61, %v482_v10  ;;  %v474_v17 = vadd.f32 %v785_v11, %v473_v13 }
  0xfa   :  { %v798_v18 = vpop.f32.mrf.mxu0  ;;  %v848_v19 = vpop.f32.mrf.mxu1  ;;  %v797_v35 = vadd.f32 %v796_v12, %v795_v6  ;;  %v824_v13 = vadd.f32 %v1093_v53, %v1091_v51 }
  0xfb   :  { %v750_v20 = vpack.c.bf16 %v581_v14, %v581_v14  ;;  %v579_v22 = vmax.f32 %v563_v15, 0.0  ;;  %v566_v23 = vadd.f32 %v1107_v0, %v543_v16  ;;  %v541_v24 = vmul.f32 %v1102_v61, %v474_v17 }
  0xfc   :  { %v799_v25 = vpop.f32.mrf.mxu0  ;;  %v486_v26 = vpop.f32.mrf.mxu1 }
  0xfd   :  { %662 = vst.msk [vmem:[%s1217_s4 + $0x8] sm:$0xf] %vm659_vm1, %v750_v20  ;;  %v748_v27 = vpack.c.bf16 %v579_v22, %v579_v22  ;;  %v582_v28 = vmax.f32 %v566_v23, 0.0  ;;  %v800_v29 = vadd.f32 %v799_v25, %v798_v18  ;;  %v487_v30 = vadd.f32 %v794_v21, %v486_v26 }
  0xfe   :  { %v564_v31 = vadd.f32 %v1107_v0, %v541_v24  ;;  %v801_v32 = vpop.f32.mrf.mxu0  ;;  %v849_v33 = vpop.f32.mrf.mxu1  ;;  %v818_v20 = vadd.f32 %v1085_v45, %v1083_v43 }
  0xff   :  { %660 = vst.msk [vmem:[%s1217_s4] sm:$0xf] %vm659_vm1, %v748_v27  ;;  %v751_v34 = vpack.c.bf16 %v582_v28, %v582_v28  ;;  %v495_v36 = vadd.f32 %v848_v19, %v800_v29  ;;  %v544_v37 = vmul.f32 %v1102_v61, %v487_v30  ;;  %v827_v27 = vadd.f32 %v1097_v57, %v1095_v55 }
 0x100   :  { %v580_v38 = vmax.f32 %v564_v31, 0.0  ;;  %v802_v39 = vpop.f32.mrf.mxu0  ;;  %v489_v40 = vpop.f32.mrf.mxu1 }
 0x101   :  { %663 = vst.msk [vmem:[%s1217_s4 + $0xc] sm:$0xf] %vm659_vm1, %v751_v34  ;;  %v546_v41 = vmul.f32 %v1102_v61, %v495_v36  ;;  %v567_v42 = vadd.f32 %v1107_v0, %v544_v37  ;;  %v803_v44 = vadd.f32 %v802_v39, %v801_v32  ;;  %v490_v46 = vadd.f32 %v797_v35, %v489_v40 }
 0x102   :  { %v749_v48 = vpack.c.bf16 %v580_v38, %v580_v38  ;;  %v804_v50 = vpop.f32.mrf.mxu0  ;;  %v852_v52 = vpop.f32.mrf.mxu1  ;;  %v821_v35 = vadd.f32 %v1089_v49, %v1087_v47 }
 0x103   :  { %v569_v54 = vadd.f32 %v1107_v0, %v546_v41  ;;  %v583_v56 = vmax.f32 %v567_v42, 0.0  ;;  %v498_v58 = vadd.f32 %v849_v33, %v803_v44  ;;  %v545_v59 = vmul.f32 %v1102_v61, %v490_v46 }
 0x104   :  { %661 = vst.msk [vmem:[%s1217_s4 + $0x4] sm:$0xf] %vm659_vm1, %v749_v48  ;;  %v805_v60 = vpop.f32.mrf.mxu0  ;;  %v502_v62 = vpop.f32.mrf.mxu1 }
 0x105   :  { %v585_v63 = vmax.f32 %v569_v54, 0.0  ;;  %v752_v1 = vpack.c.bf16 %v583_v56, %v583_v56  ;;  %v547_v2 = vmul.f32 %v1102_v61, %v498_v58  ;;  %v568_v3 = vadd.f32 %v1107_v0, %v545_v59 }
 0x106   :  { %v806_v4 = vadd.f32 %v805_v60, %v804_v50  ;;  %v807_v5 = vpop.f32.mrf.mxu0  ;;  %v853_v6 = vpop.f32.mrf.mxu1 }
 0x107   :  { %v754_v7 = vpack.c.bf16 %v585_v63, %v585_v63  ;;  %664 = vst.msk [vmem:[%s1217_s4 + $0x10] sm:$0xf] %vm659_vm1, %v752_v1  ;;  %v570_v8 = vadd.f32 %v1107_v0, %v547_v2  ;;  %v584_v9 = vmax.f32 %v568_v3, 0.0 }
 0x108   :  { %v503_v10 = vadd.f32 %v806_v4, %v502_v62  ;;  %v808_v11 = vpop.f32.mrf.mxu0  ;;  %v505_v12 = vpop.f32.mrf.mxu1 }
 0x109   :  { %666 = vst.msk [vmem:[%s1217_s4 + $0x18] sm:$0xf] %vm659_vm1, %v754_v7  ;;  %v586_v14 = vmax.f32 %v570_v8, 0.0  ;;  %v753_v15 = vpack.c.bf16 %v584_v9, %v584_v9  ;;  %v809_v16 = vadd.f32 %v808_v11, %v807_v5 }
 0x10a   :  { %v548_v17 = vmul.f32 %v1102_v61, %v503_v10  ;;  %v810_v18 = vpop.f32.mrf.mxu0  ;;  %v856_v19 = vpop.f32.mrf.mxu1 }
 0x10b   :  { %v755_v21 = vpack.c.bf16 %v586_v14, %v586_v14  ;;  %665 = vst.msk [vmem:[%s1217_s4 + $0x14] sm:$0xf] %vm659_vm1, %v753_v15  ;;  %v506_v51 = vadd.f32 %v809_v16, %v505_v12  ;;  %v527_v53 = vadd.f32 %v856_v19, %v824_v13 }
 0x10c   :  { %v571_v22 = vadd.f32 %v1107_v0, %v548_v17  ;;  %v811_v23 = vpop.f32.mrf.mxu0  ;;  %v518_v24 = vpop.f32.mrf.mxu1 }
 0x10d   :  { %667 = vst.msk [vmem:[%s1217_s4 + $0x1c] sm:$0xf] %vm659_vm1, %v755_v21  ;;  %v549_v25 = vmul.f32 %v1102_v61, %v506_v51  ;;  %v554_v43 = vmul.f32 %v1102_v61, %v527_v53  ;;  %v812_v45 = vadd.f32 %v811_v23, %v810_v18  ;;  %v519_v26 = vadd.f32 %v818_v20, %v518_v24 }
 0x10e   :  { %v587_v28 = vmax.f32 %v571_v22, 0.0  ;;  %v813_v29 = vpop.f32.mrf.mxu0  ;;  %v857_v30 = vpop.f32.mrf.mxu1 }
 0x10f   :  { %v572_v31 = vadd.f32 %v1107_v0, %v549_v25  ;;  %v577_v32 = vadd.f32 %v1107_v0, %v554_v43  ;;  %v511_v33 = vadd.f32 %v852_v52, %v812_v45  ;;  %v552_v34 = vmul.f32 %v1102_v61, %v519_v26 }
 0x110   :  { %v756_v36 = vpack.c.bf16 %v587_v28, %v587_v28  ;;  %v530_v37 = vadd.f32 %v857_v30, %v827_v27  ;;  %v814_v38 = vpop.f32.mrf.mxu0  ;;  %v521_v39 = vpop.f32.mrf.mxu1 }
 0x111   :  { %v588_v40 = vmax.f32 %v572_v31, 0.0  ;;  %v593_v41 = vmax.f32 %v577_v32, 0.0  ;;  %v550_v55 = vmul.f32 %v1102_v61, %v511_v33  ;;  %v575_v57 = vadd.f32 %v1107_v0, %v552_v34 }
 0x112   :  { %668 = vst.msk [vmem:[%s1217_s4 + $0x20] sm:$0xf] %vm659_vm1, %v756_v36  ;;  %v555_v42 = vmul.f32 %v1102_v61, %v530_v37  ;;  %v815_v44 = vadd.f32 %v814_v38, %v813_v29  ;;  %v522_v46 = vadd.f32 %v821_v35, %v521_v39 }
 0x113   :  { %v757_v47 = vpack.c.bf16 %v588_v40, %v588_v40  ;;  %v762_v49 = vpack.c.bf16 %v593_v41, %v593_v41  ;;  %v573_v48 = vadd.f32 %v1107_v0, %v550_v55  ;;  %v591_v50 = vmax.f32 %v575_v57, 0.0 }
 0x114   :  { %v578_v52 = vadd.f32 %v1107_v0, %v555_v42  ;;  %v514_v54 = vadd.f32 %v853_v6, %v815_v44  ;;  %v553_v56 = vmul.f32 %v1102_v61, %v522_v46 }
 0x115   :  { %669 = vst.msk [vmem:[%s1217_s4 + $0x24] sm:$0xf] %vm659_vm1, %v757_v47  ;;  %674 = vst.msk [vmem:[%s1217_s4 + $0x38] sm:$0xf] %vm659_vm1, %v762_v49  ;;  %v589_v58 = vmax.f32 %v573_v48, 0.0  ;;  %v760_v59 = vpack.c.bf16 %v591_v50, %v591_v50 }
 0x116   :  { %v594_v60 = vmax.f32 %v578_v52, 0.0  ;;  %v551_v62 = vmul.f32 %v1102_v61, %v514_v54  ;;  %v576_v63 = vadd.f32 %v1107_v0, %v553_v56 }
 0x117   :  { %v758_v1 = vpack.c.bf16 %v589_v58, %v589_v58  ;;  %672 = vst.msk [vmem:[%s1217_s4 + $0x30] sm:$0xf] %vm659_vm1, %v760_v59 }
 0x118   :  { %v763_v2 = vpack.c.bf16 %v594_v60, %v594_v60  ;;  %v574_v3 = vadd.f32 %v1107_v0, %v551_v62  ;;  %v592_v4 = vmax.f32 %v576_v63, 0.0 }
 0x119   :  { %670 = vst.msk [vmem:[%s1217_s4 + $0x28] sm:$0xf] %vm659_vm1, %v758_v1 }
 0x11a   :  { %675 = vst.msk [vmem:[%s1217_s4 + $0x3c] sm:$0xf] %vm659_vm1, %v763_v2  ;;  %v590_v61 = vmax.f32 %v574_v3, 0.0  ;;  %v761_v5 = vpack.c.bf16 %v592_v4, %v592_v4 }
 0x11c   :  { %v759_v6 = vpack.c.bf16 %v590_v61, %v590_v61  ;;  %673 = vst.msk [vmem:[%s1217_s4 + $0x34] sm:$0xf] %vm659_vm1, %v761_v5 }
 0x11e   :  { %671 = vst.msk [vmem:[%s1217_s4 + $0x2c] sm:$0xf] %vm659_vm1, %v759_v6 }

// kernel: forward.8
= control target key start
LH: loop header
LB: loop body
LE: loop exit
PB: predicated region body
PF: predicated region fallthrough
CT: control target
= control target key end

     0   :  { %vm554_vm0 = vcmask 523264   ;;  %s1793_s1 = inlined_call_operand.vmem [shape: bf16[576,128], index: 1, kind: input, shape index: {}]   ;;  %s1794_s0 = inlined_call_operand.vmem [shape: bf16[128,576], index: 0, kind: input, shape index: {}]   ;;  %s1795_s2 = inlined_call_operand.vmem [shape: f32[1,128], index: 2, kind: input, shape index: {}]   ;;  %s1796_s3 = inlined_call_operand.vmem [shape: f32[1,128], index: 3, kind: input, shape index: {}]   ;;  %s1797_s4 = inlined_call_operand.vmem [shape: bf16[128,128], index: 4, kind: output, shape index: {}]  }
   0x1   :  { %v1353_v0 = vld [vmem:[%s1793_s1 + $0x78] sm:$0xff]   ;;  %v1357_v4 = vld [vmem:[%s1793_s1 + $0x70] sm:$0xff]   ;;  %v1361_v8 = vld [vmem:[%s1793_s1 + $0x68] sm:$0xff]  }
   0x2   :  { %v1354_v1 = vld [vmem:[%s1793_s1 + $0xf8] sm:$0xff]   ;;  %1181 = vmatprep.subr.bf16.mxu0 %v1353_v0  ;;  %v1358_v5 = vld [vmem:[%s1793_s1 + $0xf0] sm:$0xff]   ;;  %v1362_v9 = vld [vmem:[%s1793_s1 + $0xe8] sm:$0xff]  }
   0x3   :  { %v1355_v2 = vld [vmem:[%s1793_s1 + $0x38] sm:$0xff]   ;;  %1245 = vmatprep.subr.bf16.mxu1 %v1354_v1  ;;  %v1359_v6 = vld [vmem:[%s1793_s1 + $0x30] sm:$0xff]   ;;  %v1363_v10 = vld [vmem:[%s1793_s1 + $0x28] sm:$0xff]  }
   0x4   :  { %v1356_v3 = vld [vmem:[%s1793_s1 + $0xb8] sm:$0xff]   ;;  %1182 = vmatpush3.bf16.msra.mxu0 %v1355_v2  ;;  %v1360_v7 = vld [vmem:[%s1793_s1 + $0xb0] sm:$0xff]   ;;  %v1364_v11 = vld [vmem:[%s1793_s1 + $0xa8] sm:$0xff]  }
   0x5   :  { %1246 = vmatpush3.bf16.msra.mxu1 %v1356_v3  ;;  %1183 = vmatprep.subr.bf16.mxu0 %v1357_v4  ;;  %v1365_v12 = vld [vmem:[%s1793_s1 + $0x60] sm:$0xff]   ;;  %v1369_v16 = vld [vmem:[%s1793_s1 + $0x58] sm:$0xff]   ;;  %v1373_v20 = vld [vmem:[%s1793_s1 + $0x50] sm:$0xff]  }
   0x6   :  { %1247 = vmatprep.subr.bf16.mxu1 %v1358_v5  ;;  %v1366_v13 = vld [vmem:[%s1793_s1 + $0xe0] sm:$0xff]   ;;  %v1370_v17 = vld [vmem:[%s1793_s1 + $0xd8] sm:$0xff]   ;;  %v1374_v21 = vld [vmem:[%s1793_s1 + $0xd0] sm:$0xff]  }
   0x7   :  { %v1367_v14 = vld [vmem:[%s1793_s1 + $0x20] sm:$0xff]   ;;  %v1371_v18 = vld [vmem:[%s1793_s1 + $0x18] sm:$0xff]   ;;  %v1375_v22 = vld [vmem:[%s1793_s1 + $0x10] sm:$0xff]  }
   0x8   :  { %1184 = vmatpush3.bf16.msra.mxu0 %v1359_v6  ;;  %v1368_v15 = vld [vmem:[%s1793_s1 + $0xa0] sm:$0xff]   ;;  %v1372_v19 = vld [vmem:[%s1793_s1 + $0x98] sm:$0xff]   ;;  %v1376_v23 = vld [vmem:[%s1793_s1 + $0x90] sm:$0xff]  }
   0x9   :  { %1248 = vmatpush3.bf16.msra.mxu1 %v1360_v7  ;;  %1185 = vmatprep.subr.bf16.mxu0 %v1361_v8  ;;  %v1377_v24 = vld [vmem:[%s1793_s1 + $0x48] sm:$0xff]   ;;  %v1381_v28 = vld [vmem:[%s1793_s1 + $0x40] sm:$0xff]   ;;  %v1391_v36 = vld [vmem:[%s1793_s1 + $0x118] sm:$0xff]  }
   0xa   :  { %1249 = vmatprep.subr.bf16.mxu1 %v1362_v9  ;;  %v1378_v25 = vld [vmem:[%s1793_s1 + $0xc8] sm:$0xff]   ;;  %v1382_v29 = vld [vmem:[%s1793_s1 + $0xc0] sm:$0xff]   ;;  %v1404_v42 = vld [vmem:[%s1793_s1 + $0x110] sm:$0xff]  }
   0xb   :  { %v1379_v26 = vld [vmem:[%s1793_s1 + $0x8] sm:$0xff]   ;;  %v1383_v30 = vld [vmem:[%s1793_s1] sm:$0xff]   ;;  %v1400_v43 = vld [vmem:[%s1794_s0 + $0x5c] ss:$20 sps:$4 sm:$0xff]  }
   0xc   :  { %1186 = vmatpush3.bf16.msra.mxu0 %v1363_v10  ;;  %v1380_v27 = vld [vmem:[%s1793_s1 + $0x88] sm:$0xff]   ;;  %v1384_v31 = vld [vmem:[%s1793_s1 + $0x80] sm:$0xff]   ;;  %v1405_v47 = vld [vmem:[%s1794_s0 + $0x7c] ss:$20 sps:$4 sm:$0xff]  }
   0xd   :  { %1250 = vmatpush3.bf16.msra.mxu1 %v1364_v11  ;;  %1187 = vmatprep.subr.bf16.mxu0 %v1365_v12  ;;  %v1385_v32 = vld [vmem:[%s1794_s0] ss:$20 sps:$4 sm:$0xff]   ;;  %v1387_v33 = vld [vmem:[%s1794_s0 + $0x4] ss:$20 sps:$4 sm:$0xff]   ;;  %v1388_v34 = vld [vmem:[%s1794_s0 + $0x8] ss:$20 sps:$4 sm:$0xff]  }
   0xe   :  { %1251 = vmatprep.subr.bf16.mxu1 %v1366_v13  ;;  %v1390_v35 = vld [vmem:[%s1794_s0 + $0xc] ss:$20 sps:$4 sm:$0xff]   ;;  %611 = vmatprep.mubr.bf16.mxu0 %v1387_v33  ;;  %v1394_v38 = vld [vmem:[%s1794_s0 + $0x34] ss:$20 sps:$4 sm:$0xff]   ;;  %v1397_v40 = vld [vmem:[%s1794_s0 + $0x30] ss:$20 sps:$4 sm:$0xff]  }
   0xf   :  { %708 = vmatprep.mubr.bf16.mxu1 %v1390_v35  ;;  %v1392_v37 = vld [vmem:[%s1794_s0 + $0x2c] ss:$20 sps:$4 sm:$0xff]   ;;  %v1396_v39 = vld [vmem:[%s1794_s0 + $0x28] ss:$20 sps:$4 sm:$0xff]   ;;  %v1402_v44 = vld [vmem:[%s1794_s0 + $0x50] ss:$20 sps:$4 sm:$0xff]  }
  0x10   :  { %1188 = vmatpush3.bf16.msra.mxu0 %v1367_v14  ;;  %v1398_v41 = vld [vmem:[%s1794_s0 + $0x54] ss:$20 sps:$4 sm:$0xff]   ;;  %v1403_v45 = vld [vmem:[%s1794_s0 + $0x58] ss:$20 sps:$4 sm:$0xff]   ;;  %v1430_v49 = vld [vmem:[%s1793_s1 + $0x100] sm:$0xff]  }
  0x11   :  { %1252 = vmatpush3.bf16.msra.mxu1 %v1368_v15  ;;  %1189 = vmatprep.subr.bf16.mxu0 %v1369_v16  ;;  %v1417_v46 = vld [vmem:[%s1793_s1 + $0x108] sm:$0xff]   ;;  %v1407_v48 = vld [vmem:[%s1794_s0 + $0x84] ss:$20 sps:$4 sm:$0xff]   ;;  %v1410_v51 = vld [vmem:[%s1794_s0 + $0x80] ss:$20 sps:$4 sm:$0xff]  }
  0x12   :  { %1253 = vmatprep.subr.bf16.mxu1 %v1370_v17  ;;  %v1409_v50 = vld [vmem:[%s1794_s0 + $0x78] ss:$20 sps:$4 sm:$0xff]   ;;  %v1415_v54 = vld [vmem:[%s1794_s0 + $0xa0] ss:$20 sps:$4 sm:$0xff]   ;;  %v1416_v55 = vld [vmem:[%s1794_s0 + $0xa8] ss:$20 sps:$4 sm:$0xff]  }
  0x13   :  { %v1411_v52 = vld [vmem:[%s1794_s0 + $0xa4] ss:$20 sps:$4 sm:$0xff]   ;;  %v1413_v53 = vld [vmem:[%s1794_s0 + $0xac] ss:$20 sps:$4 sm:$0xff]   ;;  %v1420_v57 = vld [vmem:[%s1794_s0 + $0xd4] ss:$20 sps:$4 sm:$0xff]  }
  0x14   :  { %1190 = vmatpush3.bf16.msra.mxu0 %v1371_v18  ;;  %v1418_v56 = vld [vmem:[%s1794_s0 + $0xcc] ss:$20 sps:$4 sm:$0xff]   ;;  %v1422_v58 = vld [vmem:[%s1794_s0 + $0xc8] ss:$20 sps:$4 sm:$0xff]   ;;  %v1423_v59 = vld [vmem:[%s1794_s0 + $0xd0] ss:$20 sps:$4 sm:$0xff]  }
  0x15   :  { %1254 = vmatpush3.bf16.msra.mxu1 %v1372_v19  ;;  %1191 = vmatprep.subr.bf16.mxu0 %v1373_v20  ;;  %v1424_v60 = vld [vmem:[%s1794_s0 + $0xf4] ss:$20 sps:$4 sm:$0xff]   ;;  %v1426_v61 = vld [vmem:[%s1794_s0 + $0xfc] ss:$20 sps:$4 sm:$0xff]   ;;  %v1429_v63 = vld [vmem:[%s1794_s0 + $0xf8] ss:$20 sps:$4 sm:$0xff]  }
  0x16   :  { %1255 = vmatprep.subr.bf16.mxu1 %v1374_v21  ;;  %v1428_v62 = vld [vmem:[%s1794_s0 + $0xf0] ss:$20 sps:$4 sm:$0xff]   ;;  %v1435_v2 = vld [vmem:[%s1794_s0 + $0x118] ss:$20 sps:$4 sm:$0xff]   ;;  %v1436_v3 = vld [vmem:[%s1794_s0 + $0x120] ss:$20 sps:$4 sm:$0xff]  }
  0x17   :  { %v1431_v0 = vld [vmem:[%s1794_s0 + $0x11c] ss:$20 sps:$4 sm:$0xff]   ;;  %v1433_v1 = vld [vmem:[%s1794_s0 + $0x124] ss:$20 sps:$4 sm:$0xff]   ;;  %v1441_v8 = vld [vmem:[%s1794_s0 + $0x60] ss:$20 sps:$4 sm:$0xff]  }
  0x18   :  { %1192 = vmatpush3.bf16.msra.mxu0 %v1375_v22  ;;  %v1437_v4 = vld [vmem:[%s1794_s0 + $0x10] ss:$20 sps:$4 sm:$0xff]   ;;  %v1439_v6 = vld [vmem:[%s1794_s0 + $0x38] ss:$20 sps:$4 sm:$0xff]   ;;  %v1442_v9 = vld [vmem:[%s1794_s0 + $0x100] ss:$20 sps:$4 sm:$0xff]  }
  0x19   :  { %1256 = vmatpush3.bf16.msra.mxu1 %v1376_v23  ;;  %1193 = vmatprep.subr.bf16.mxu0 %v1377_v24  ;;  %v1438_v5 = vld [vmem:[%s1794_s0 + $0xb0] ss:$20 sps:$4 sm:$0xff]   ;;  %v1440_v7 = vld [vmem:[%s1794_s0 + $0xd8] ss:$20 sps:$4 sm:$0xff]   ;;  %v1443_v10 = vld [vmem:[%s1794_s0 + $0x88] ss:$20 sps:$4 sm:$0xff]  }
  0x1a   :  { %1257 = vmatprep.subr.bf16.mxu1 %v1378_v25  ;;  %v1444_v11 = vld [vmem:[%s1794_s0 + $0x128] ss:$20 sps:$4 sm:$0xff]  }
  0x1c   :  { %1194 = vmatpush3.bf16.msra.mxu0 %v1379_v26 }
  0x1d   :  { %1258 = vmatpush3.bf16.msra.mxu1 %v1380_v27  ;;  %1195 = vmatprep.subr.bf16.mxu0 %v1381_v28 }
  0x1e   :  { %1259 = vmatprep.subr.bf16.mxu1 %v1382_v29 }
  0x20   :  { %1196 = vmatpush3.bf16.msra.mxu0 %v1383_v30 }
  0x21   :  { %1260 = vmatpush3.bf16.msra.mxu1 %v1384_v31  ;;  %1321 = vmatprep.subr.bf16.mxu0 %v1391_v36 }
  0x22   :  { %1345 = vmatprep.subr.bf16.mxu1 %v1391_v36 }
  0x23   :  { %612 = vmatmul.mubr.bf16.vlgmr.msra.gmra.mxu0 %v1385_v32 }
  0x24   :  { %709 = vmatmul.mubr.bf16.vlgmr.msra.gmra.mxu1 %v1388_v34  ;;  %1322 = vmatpush3.bf16.msra.mxu0 %v1391_v36 }
  0x25   :  { %1349 = vmatpush3.bf16.msra.mxu1 %v1391_v36  ;;  %619 = vmatprep.mubr.bf16.mxu0 %v1392_v37 }
  0x26   :  { %716 = vmatprep.mubr.bf16.mxu1 %v1394_v38  ;;  %1323 = vmatprep.subr.bf16.mxu0 %v1404_v42 }
  0x27   :  { %1346 = vmatprep.subr.bf16.mxu1 %v1404_v42 }
  0x28   :  { %1324 = vmatpush3.bf16.msra.mxu0 %v1404_v42 }
  0x29   :  { %1350 = vmatpush3.bf16.msra.mxu1 %v1404_v42  ;;  %1325 = vmatprep.subr.bf16.mxu0 %v1417_v46 }
  0x2a   :  { %1347 = vmatprep.subr.bf16.mxu1 %v1417_v46 }
  0x2b   :  { %620 = vmatmul.mubr.bf16.gmra.mxu0 %v1396_v39 }
  0x2c   :  { %717 = vmatmul.mubr.bf16.gmra.mxu1 %v1397_v40  ;;  %627 = vmatprep.mubr.bf16.mxu0 %v1398_v41 }
  0x2d   :  { %724 = vmatprep.mubr.bf16.mxu1 %v1400_v43  ;;  %1326 = vmatpush3.bf16.msra.mxu0 %v1417_v46 }
  0x2e   :  { %1351 = vmatpush3.bf16.msra.mxu1 %v1417_v46  ;;  %1327 = vmatprep.subr.bf16.mxu0 %v1430_v49 }
  0x2f   :  { %1348 = vmatprep.subr.bf16.mxu1 %v1430_v49 }
  0x31   :  { %1328 = vmatpush3.bf16.msra.mxu0 %v1430_v49 }
  0x32   :  { %1352 = vmatpush3.bf16.msra.mxu1 %v1430_v49 }
  0x33   :  { %628 = vmatmul.mubr.bf16.gmra.mxu0 %v1402_v44 }
  0x34   :  { %725 = vmatmul.mubr.bf16.gmra.mxu1 %v1403_v45  ;;  %635 = vmatprep.mubr.bf16.mxu0 %v1405_v47 }
  0x35   :  { %732 = vmatprep.mubr.bf16.mxu1 %v1407_v48 }
  0x3b   :  { %636 = vmatmul.mubr.bf16.gmra.mxu0 %v1409_v50 }
  0x3c   :  { %733 = vmatmul.mubr.bf16.gmra.mxu1 %v1410_v51  ;;  %643 = vmatprep.mubr.bf16.mxu0 %v1411_v52 }
  0x3d   :  { %740 = vmatprep.mubr.bf16.mxu1 %v1413_v53 }
  0x43   :  { %644 = vmatmul.mubr.bf16.gmra.mxu0 %v1415_v54 }
  0x44   :  { %741 = vmatmul.mubr.bf16.gmra.mxu1 %v1416_v55  ;;  %651 = vmatprep.mubr.bf16.mxu0 %v1418_v56 }
  0x45   :  { %748 = vmatprep.mubr.bf16.mxu1 %v1420_v57 }
  0x4b   :  { %652 = vmatmul.mubr.bf16.gmra.mxu0 %v1422_v58 }
  0x4c   :  { %749 = vmatmul.mubr.bf16.gmra.mxu1 %v1423_v59  ;;  %659 = vmatprep.mubr.bf16.mxu0 %v1424_v60 }
  0x4d   :  { %756 = vmatprep.mubr.bf16.mxu1 %v1426_v61 }
  0x53   :  { %660 = vmatmul.mubr.bf16.gmra.mxu0 %v1428_v62 }
  0x54   :  { %757 = vmatmul.mubr.bf16.gmra.mxu1 %v1429_v63  ;;  %667 = vmatprep.mubr.bf16.mxu0 %v1431_v0 }
  0x55   :  { %764 = vmatprep.mubr.bf16.mxu1 %v1433_v1 }
  0x5b   :  { %668 = vmatmul.mubr.bf16.gmra.mxu0 %v1435_v2 }
  0x5c   :  { %765 = vmatmul.mubr.bf16.gmra.mxu1 %v1436_v3  ;;  %1329 = vmatprep.mubr.msk.bf16.mxu0 %vm554_vm0, %v1437_v4 }
  0x5d   :  { %1337 = vmatprep.mubr.msk.bf16.mxu1 %vm554_vm0, %v1438_v5 }
  0x63   :  { %1330 = vmatmul.mubr.msk.bf16.vlgmr.msra.gmra.mxu0 %vm554_vm0, %v1439_v6 }
  0x64   :  { %1338 = vmatmul.mubr.msk.bf16.vlgmr.msra.gmra.mxu1 %vm554_vm0, %v1440_v7  ;;  %1333 = vmatprep.mubr.msk.bf16.mxu0 %vm554_vm0, %v1441_v8 }
  0x65   :  { %1341 = vmatprep.mubr.msk.bf16.mxu1 %vm554_vm0, %v1442_v9 }
  0x6b   :  { %1334 = vmatmul.mubr.msk.bf16.gmra.mxu0 %vm554_vm0, %v1443_v10 }
  0x6c   :  { %1342 = vmatmul.mubr.msk.bf16.gmra.mxu1 %vm554_vm0, %v1444_v11 }
  0xe3   :  { %v1197_v12 = vpop.f32.mrf.mxu0 }
  0xe4   :  { %v1261_v13 = vpop.f32.mrf.mxu1 }
  0xe5   :  { %v1198_v14 = vpop.f32.mrf.mxu0 }
  0xe6   :  { %v1199_v15 = vadd.f32 %v1198_v14, %v1197_v12  ;;  %v1262_v16 = vpop.f32.mrf.mxu1 }
  0xe7   :  { %v1263_v17 = vadd.f32 %v1262_v16, %v1261_v13  ;;  %v1200_v18 = vpop.f32.mrf.mxu0 }
  0xe8   :  { %v1264_v19 = vpop.f32.mrf.mxu1 }
  0xe9   :  { %v1201_v20 = vpop.f32.mrf.mxu0  ;;  %v1706_v21 = vadd.f32 %v1263_v17, %v1199_v15 }
  0xea   :  { %v1265_v22 = vpop.f32.mrf.mxu1  ;;  %v1202_v8 = vadd.f32 %v1201_v20, %v1200_v18 }
  0xeb   :  { %1798 = vst [vmem:[#allocation2_spill] sm:$0xff] %v1706_v21  ;;  %v1203_v23 = vpop.f32.mrf.mxu0  ;;  %v1266_v9 = vadd.f32 %v1265_v22, %v1264_v19 }
  0xec   :  { %v1267_v24 = vpop.f32.mrf.mxu1 }
  0xed   :  { %v1204_v25 = vpop.f32.mrf.mxu0 }
  0xee   :  { %v1268_v26 = vpop.f32.mrf.mxu1  ;;  %v1205_v11 = vadd.f32 %v1204_v25, %v1203_v23 }
  0xef   :  { %v1206_v27 = vpop.f32.mrf.mxu0  ;;  %v1269_v12 = vadd.f32 %v1268_v26, %v1267_v24 }
  0xf0   :  { %v1270_v28 = vpop.f32.mrf.mxu1 }
  0xf1   :  { %v1207_v29 = vpop.f32.mrf.mxu0 }
  0xf2   :  { %v1271_v30 = vpop.f32.mrf.mxu1  ;;  %v1208_v13 = vadd.f32 %v1207_v29, %v1206_v27 }
  0xf3   :  { %v1209_v31 = vpop.f32.mrf.mxu0  ;;  %v1272_v14 = vadd.f32 %v1271_v30, %v1270_v28 }
  0xf4   :  { %v1273_v32 = vpop.f32.mrf.mxu1 }
  0xf5   :  { %v1210_v33 = vpop.f32.mrf.mxu0 }
  0xf6   :  { %v1274_v34 = vpop.f32.mrf.mxu1  ;;  %v1211_v16 = vadd.f32 %v1210_v33, %v1209_v31 }
  0xf7   :  { %v1212_v35 = vpop.f32.mrf.mxu0  ;;  %v1275_v17 = vadd.f32 %v1274_v34, %v1273_v32  ;;  %v719_v32 = vadd.f32 %v1269_v12, %v1205_v11  ;;  %v722_v34 = vadd.f32 %v1272_v14, %v1208_v13 }
  0xf8   :  { %v1276_v36 = vpop.f32.mrf.mxu1 }
  0xf9   :  { %v1213_v37 = vpop.f32.mrf.mxu0 }
  0xfa   :  { %v1277_v38 = vpop.f32.mrf.mxu1  ;;  %v1214_v21 = vadd.f32 %v1213_v37, %v1212_v35  ;;  %v714_v35 = vadd.f32 %v1266_v9, %v1202_v8  ;;  %v1719_v37 = vld [vmem:[%s1795_s2] ss:$0 sm:$0xff] }
  0xfb   :  { %v1215_v39 = vpop.f32.mrf.mxu0 }
  0xfc   :  { %v1279_v40 = vpop.f32.mrf.mxu1 }
  0xfd   :  { %v1216_v41 = vpop.f32.mrf.mxu0 }
  0xfe   :  { %v1280_v42 = vpop.f32.mrf.mxu1 }
  0xff   :  { %v1218_v43 = vpop.f32.mrf.mxu0 }
 0x100   :  { %v1282_v44 = vpop.f32.mrf.mxu1 }
 0x101   :  { %v1219_v45 = vpop.f32.mrf.mxu0 }
 0x102   :  { %v1283_v46 = vpop.f32.mrf.mxu1  ;;  %v1220_v22 = vadd.f32 %v1219_v45, %v1218_v43 }
 0x103   :  { %v1221_v47 = vpop.f32.mrf.mxu0  ;;  %v1284_v23 = vadd.f32 %v1283_v46, %v1282_v44 }
 0x104   :  { %v1285_v48 = vpop.f32.mrf.mxu1 }
 0x105   :  { %v1222_v49 = vpop.f32.mrf.mxu0  ;;  %v1723_v46 = vadd.f32 %v1284_v23, %v1220_v22 }
 0x106   :  { %v1286_v50 = vpop.f32.mrf.mxu1  ;;  %v1223_v25 = vadd.f32 %v1222_v49, %v1221_v47 }
 0x107   :  { %v1224_v51 = vpop.f32.mrf.mxu0  ;;  %v1287_v24 = vadd.f32 %v1286_v50, %v1285_v48 }
 0x108   :  { %v1288_v52 = vpop.f32.mrf.mxu1 }
 0x109   :  { %v1225_v53 = vpop.f32.mrf.mxu0  ;;  %v743_v49 = vadd.f32 %v1287_v24, %v1223_v25 }
 0x10a   :  { %v1289_v54 = vpop.f32.mrf.mxu1  ;;  %v1226_v27 = vadd.f32 %v1225_v53, %v1224_v51 }
 0x10b   :  { %v1227_v55 = vpop.f32.mrf.mxu0  ;;  %v1290_v29 = vadd.f32 %v1289_v54, %v1288_v52 }
 0x10c   :  { %v1291_v56 = vpop.f32.mrf.mxu1 }
 0x10d   :  { %v1228_v57 = vpop.f32.mrf.mxu0  ;;  %v746_v51 = vadd.f32 %v1290_v29, %v1226_v27 }
 0x10e   :  { %v1292_v58 = vpop.f32.mrf.mxu1  ;;  %v1229_v18 = vadd.f32 %v1228_v57, %v1227_v55  ;;  %v1803_v55 = vld [vmem:[#allocation2_spill] sm:$0xff] }
 0x10f   :  { %v1230_v59 = vpop.f32.mrf.mxu0  ;;  %v1293_v20 = vadd.f32 %v1292_v58, %v1291_v56 }
 0x110   :  { %v1294_v60 = vpop.f32.mrf.mxu1 }
 0x111   :  { %v1231_v61 = vpop.f32.mrf.mxu0 }
 0x112   :  { %v1295_v62 = vpop.f32.mrf.mxu1  ;;  %v1232_v28 = vadd.f32 %v1231_v61, %v1230_v59 }
 0x113   :  { %v1233_v63 = vpop.f32.mrf.mxu0  ;;  %v1296_v30 = vadd.f32 %v1295_v62, %v1294_v60 }
 0x114   :  { %v1297_v0 = vpop.f32.mrf.mxu1 }
 0x115   :  { %v1234_v1 = vpop.f32.mrf.mxu0  ;;  %v754_v50 = vadd.f32 %v1296_v30, %v1232_v28 }
 0x116   :  { %v1298_v2 = vpop.f32.mrf.mxu1 }
 0x117   :  { %v1708_v3 = vpop.f32.mrf.mxu0  ;;  %v1299_v43 = vadd.f32 %v1298_v2, %v1297_v0 }
 0x118   :  { %1799 = vst [vmem:[#allocation3_spill] sm:$0xff] %v1708_v3  ;;  %v1710_v4 = vpop.f32.mrf.mxu1  ;;  %v1278_v3 = vadd.f32 %v1277_v38, %v1276_v36  ;;  %v751_v38 = vadd.f32 %v1293_v20, %v1229_v18 }
 0x119   :  { %1800 = vst [vmem:[#allocation4_spill] sm:$0xff] %v1710_v4  ;;  %v1712_v5 = vpop.f32.mrf.mxu0 }
 0x11a   :  { %1801 = vst [vmem:[#allocation5_spill] sm:$0xff] %v1712_v5  ;;  %v1714_v6 = vpop.f32.mrf.mxu1  ;;  %v1217_v5 = vadd.f32 %v1216_v41, %v1215_v39  ;;  %v1721_v41 = vadd.f32 %v1278_v3, %v1214_v21  ;;  %v1729_v21 = vld [vmem:[%s1796_s3] ss:$0 sm:$0xff] }
 0x11b   :  { %1802 = vst [vmem:[#allocation6_spill] sm:$0xff] %v1714_v6  ;;  %v1239_v7 = vpop.f32.mrf.mxu0  ;;  %v1281_v6 = vadd.f32 %v1280_v42, %v1279_v40  ;;  %v727_v40 = vadd.f32 %v1275_v17, %v1211_v16  ;;  %v1235_v42 = vadd.f32 %v1234_v1, %v1233_v63 }
 0x11c   :  { %v1303_v10 = vpop.f32.mrf.mxu1 }
 0x11d   :  { %v1240_v15 = vpop.f32.mrf.mxu0  ;;  %v735_v39 = vadd.f32 %v1281_v6, %v1217_v5  ;;  %v759_v5 = vadd.f32 %v1299_v43, %v1235_v42 }
 0x11e   :  { %v1304_v4 = vpop.f32.mrf.mxu1  ;;  %v1241_v52 = vadd.f32 %v1240_v15, %v1239_v7 }
 0x11f   :  { %v1242_v19 = vpop.f32.mrf.mxu0  ;;  %v1305_v53 = vadd.f32 %v1304_v4, %v1303_v10  ;;  %v1804_v63 = vld [vmem:[#allocation3_spill] sm:$0xff] }
 0x120   :  { %v1306_v26 = vpop.f32.mrf.mxu1  ;;  %v1806_v6 = vld [vmem:[#allocation4_spill] sm:$0xff] }
 0x121   :  { %v1243_v31 = vpop.f32.mrf.mxu0  ;;  %v1805_v0 = vld [vmem:[#allocation5_spill] sm:$0xff]  ;;  %v767_v17 = vadd.f32 %v1305_v53, %v1241_v52 }
 0x122   :  { %v1307_v33 = vpop.f32.mrf.mxu1  ;;  %v1244_v58 = vadd.f32 %v1243_v31, %v1242_v19  ;;  %v1238_v1 = vadd.f32 %v1805_v0, %v1804_v63  ;;  %v1807_v7 = vld [vmem:[#allocation6_spill] sm:$0xff] }
 0x123   :  { %v1331_v36 = vpop.f32.mrf.mxu0  ;;  %v1308_v59 = vadd.f32 %v1307_v33, %v1306_v26  ;;  %v1302_v8 = vadd.f32 %v1807_v7, %v1806_v6 }
 0x124   :  { %v816_v44 = vadd.f32 %v1331_v36, %v719_v32  ;;  %v1339_v45 = vpop.f32.mrf.mxu1 }
 0x125   :  { %v848_v47 = vadd.f32 %v1339_v45, %v751_v38  ;;  %v807_v48 = vpop.f32.mrf.mxu0  ;;  %v770_v23 = vadd.f32 %v1308_v59, %v1244_v58 }
 0x126   :  { %v879_v54 = vmul.f32 %v1719_v37, %v816_v44  ;;  %v808_v56 = vadd.f32 %v807_v48, %v1803_v55  ;;  %v839_v57 = vpop.f32.mrf.mxu1 }
 0x127   :  { %v887_v60 = vmul.f32 %v1719_v37, %v848_v47  ;;  %v840_v61 = vadd.f32 %v839_v57, %v743_v49  ;;  %v1332_v62 = vpop.f32.mrf.mxu0 }
 0x128   :  { %v877_v2 = vmul.f32 %v1719_v37, %v808_v56  ;;  %v819_v3 = vadd.f32 %v1332_v62, %v722_v34  ;;  %v1340_v4 = vpop.f32.mrf.mxu1  ;;  %v902_v9 = vadd.f32 %v1729_v21, %v879_v54 }
 0x129   :  { %v885_v10 = vmul.f32 %v1719_v37, %v840_v61  ;;  %v851_v11 = vadd.f32 %v1340_v4, %v754_v50  ;;  %v810_v12 = vpop.f32.mrf.mxu0  ;;  %v910_v13 = vadd.f32 %v1729_v21, %v887_v60  ;;  %v762_v60 = vadd.f32 %v1302_v8, %v1238_v1 }
 0x12a   :  { %v880_v14 = vmul.f32 %v1719_v37, %v819_v3  ;;  %v811_v15 = vadd.f32 %v810_v12, %v714_v35  ;;  %v842_v16 = vpop.f32.mrf.mxu1  ;;  %v900_v18 = vadd.f32 %v1729_v21, %v877_v2  ;;  %v918_v28 = vmax.f32 %v902_v9, 0.0 }
 0x12b   :  { %v888_v20 = vmul.f32 %v1719_v37, %v851_v11  ;;  %v843_v19 = vadd.f32 %v842_v16, %v746_v51  ;;  %v1335_v22 = vpop.f32.mrf.mxu0  ;;  %v908_v25 = vadd.f32 %v1729_v21, %v885_v10  ;;  %v926_v34 = vmax.f32 %v910_v13, 0.0 }
 0x12c   :  { %v903_v24 = vadd.f32 %v1729_v21, %v880_v14  ;;  %v878_v26 = vmul.f32 %v1719_v37, %v811_v15  ;;  %v832_v27 = vadd.f32 %v1335_v22, %v735_v39  ;;  %v1343_v29 = vpop.f32.mrf.mxu1  ;;  %v916_v43 = vmax.f32 %v900_v18, 0.0 }
 0x12d   :  { %v911_v30 = vadd.f32 %v1729_v21, %v888_v20  ;;  %v886_v31 = vmul.f32 %v1719_v37, %v843_v19  ;;  %v864_v33 = vadd.f32 %v1343_v29, %v767_v17  ;;  %v823_v32 = vpop.f32.mrf.mxu0  ;;  %v924_v48 = vmax.f32 %v908_v25, 0.0 }
 0x12e   :  { %v919_v35 = vmax.f32 %v903_v24, 0.0  ;;  %v901_v36 = vadd.f32 %v1729_v21, %v878_v26  ;;  %v824_v38 = vadd.f32 %v823_v32, %v727_v40  ;;  %v855_v42 = vpop.f32.mrf.mxu1  ;;  %v883_v51 = vmul.f32 %v1719_v37, %v832_v27 }
 0x12f   :  { %v927_v44 = vmax.f32 %v911_v30, 0.0  ;;  %v909_v45 = vadd.f32 %v1729_v21, %v886_v31  ;;  %v856_v47 = vadd.f32 %v855_v42, %v759_v5  ;;  %v1336_v39 = vpop.f32.mrf.mxu0  ;;  %v891_v55 = vmul.f32 %v1719_v37, %v864_v33 }
 0x130   :  { %v1142_v49 = vpack.c.bf16 %v919_v35, %v918_v28  ;;  %v917_v50 = vmax.f32 %v901_v36, 0.0  ;;  %v1344_v52 = vpop.f32.mrf.mxu1  ;;  %v881_v56 = vmul.f32 %v1719_v37, %v824_v38  ;;  %v835_v59 = vadd.f32 %v1336_v39, %v1723_v46 }
 0x131   :  { %v1162_v53 = vpack.c.bf16 %v927_v44, %v926_v34  ;;  %v925_v54 = vmax.f32 %v909_v45, 0.0  ;;  %v826_v40 = vpop.f32.mrf.mxu0  ;;  %v889_v58 = vmul.f32 %v1719_v37, %v856_v47  ;;  %v867_v63 = vadd.f32 %v1344_v52, %v770_v23 }
 0x132   :  { %1174 = vst [vmem:[%s1797_s4 + $0x8] sm:$0xff] %v1142_v49   ;;  %v1137_v57 = vpack.c.bf16 %v917_v50, %v916_v43  ;;  %v858_v61 = vpop.f32.mrf.mxu1  ;;  %v906_v0 = vadd.f32 %v1729_v21, %v883_v51  ;;  %v884_v2 = vmul.f32 %v1719_v37, %v835_v59  ;;  %v827_v3 = vadd.f32 %v826_v40, %v1721_v41 }
 0x133   :  { %1178 = vst [vmem:[%s1797_s4 + $0x28] sm:$0xff] %v1162_v53   ;;  %v1157_v62 = vpack.c.bf16 %v925_v54, %v924_v48  ;;  %v859_v4 = vadd.f32 %v858_v61, %v762_v60  ;;  %v914_v46 = vadd.f32 %v1729_v21, %v891_v55  ;;  %v904_v1 = vadd.f32 %v1729_v21, %v881_v56 }
 0x134   :  { %1138 = vst [vmem:[%s1797_s4] sm:$0xff] %v1137_v57   ;;  %v892_v5 = vmul.f32 %v1719_v37, %v867_v63  ;;  %v912_v6 = vadd.f32 %v1729_v21, %v889_v58  ;;  %v907_v7 = vadd.f32 %v1729_v21, %v884_v2  ;;  %v882_v8 = vmul.f32 %v1719_v37, %v827_v3 }
 0x135   :  { %1177 = vst [vmem:[%s1797_s4 + $0x20] sm:$0xff] %v1157_v62   ;;  %v890_v9 = vmul.f32 %v1719_v37, %v859_v4  ;;  %v922_v10 = vmax.f32 %v906_v0, 0.0  ;;  %v930_v14 = vmax.f32 %v914_v46, 0.0  ;;  %v920_v15 = vmax.f32 %v904_v1, 0.0 }
 0x136   :  { %v915_v41 = vadd.f32 %v1729_v21, %v892_v5  ;;  %v923_v11 = vmax.f32 %v907_v7, 0.0  ;;  %v905_v12 = vadd.f32 %v1729_v21, %v882_v8  ;;  %v928_v17 = vmax.f32 %v912_v6, 0.0 }
 0x137   :  { %v913_v13 = vadd.f32 %v1729_v21, %v890_v9 }
 0x138   :  { %v931_v16 = vmax.f32 %v915_v41, 0.0  ;;  %v1152_v18 = vpack.c.bf16 %v923_v11, %v922_v10  ;;  %v921_v20 = vmax.f32 %v905_v12, 0.0 }
 0x139   :  { %v929_v19 = vmax.f32 %v913_v13, 0.0 }
 0x13a   :  { %v1172_v22 = vpack.c.bf16 %v931_v16, %v930_v14  ;;  %1176 = vst [vmem:[%s1797_s4 + $0x18] sm:$0xff] %v1152_v18   ;;  %v1147_v37 = vpack.c.bf16 %v921_v20, %v920_v15 }
 0x13b   :  { %v1167_v23 = vpack.c.bf16 %v929_v19, %v928_v17 }
 0x13c   :  { %1180 = vst [vmem:[%s1797_s4 + $0x38] sm:$0xff] %v1172_v22   ;;  %1175 = vst [vmem:[%s1797_s4 + $0x10] sm:$0xff] %v1147_v37  }
 0x13d   :  { %1179 = vst [vmem:[%s1797_s4 + $0x30] sm:$0xff] %v1167_v23  }

// kernel: forward.9
= control target key start
LH: loop header
LB: loop body
LE: loop exit
PB: predicated region body
PF: predicated region fallthrough
CT: control target
= control target key end

     0   :  { %v695_v54 = vmov 0   ;;  %s888_s1 = inlined_call_operand.vmem [shape: bf16[512,128], index: 1, kind: input, shape index: {}]   ;;  %s889_s0 = inlined_call_operand.vmem [shape: bf16[8,512], index: 0, kind: input, shape index: {}]   ;;  %s890_s3 = inlined_call_operand.vmem [shape: bf16[128,256], index: 3, kind: input, shape index: {}]   ;;  %s891_s2 = inlined_call_operand.vmem [shape: f32[1,128], index: 2, kind: input, shape index: {}]   ;;  %s892_s4 = inlined_call_operand.vmem [shape: f32[1,256], index: 4, kind: input, shape index: {}]   ;;  %s893_s5 = inlined_call_operand.vmem [shape: f32[8,256], index: 5, kind: output, shape index: {}]  }
   0x1   :  { %v635_v0 = vld [vmem:[%s888_s1 + $0x78] sm:$0xff]   ;;  %v639_v4 = vld [vmem:[%s888_s1 + $0x70] sm:$0xff]   ;;  %v643_v8 = vld [vmem:[%s888_s1 + $0x68] sm:$0xff]  }
   0x2   :  { %v636_v1 = vld [vmem:[%s888_s1 + $0xf8] sm:$0xff]   ;;  %590 = vmatprep.subr.bf16.mxu0 %v635_v0  ;;  %v640_v5 = vld [vmem:[%s888_s1 + $0xf0] sm:$0xff]   ;;  %v644_v9 = vld [vmem:[%s888_s1 + $0xe8] sm:$0xff]  }
   0x3   :  { %v637_v2 = vld [vmem:[%s888_s1 + $0x38] sm:$0xff]   ;;  %612 = vmatprep.subr.bf16.mxu1 %v636_v1  ;;  %v641_v6 = vld [vmem:[%s888_s1 + $0x30] sm:$0xff]   ;;  %v645_v10 = vld [vmem:[%s888_s1 + $0x28] sm:$0xff]  }
   0x4   :  { %v638_v3 = vld [vmem:[%s888_s1 + $0xb8] sm:$0xff]   ;;  %591 = vmatpush3.bf16.msra.mxu0 %v637_v2  ;;  %v642_v7 = vld [vmem:[%s888_s1 + $0xb0] sm:$0xff]   ;;  %v646_v11 = vld [vmem:[%s888_s1 + $0xa8] sm:$0xff]  }
   0x5   :  { %613 = vmatpush3.bf16.msra.mxu1 %v638_v3  ;;  %592 = vmatprep.subr.bf16.mxu0 %v639_v4  ;;  %v647_v12 = vld [vmem:[%s888_s1 + $0x60] sm:$0xff]   ;;  %v651_v16 = vld [vmem:[%s888_s1 + $0x58] sm:$0xff]   ;;  %v655_v20 = vld [vmem:[%s888_s1 + $0x50] sm:$0xff]  }
   0x6   :  { %614 = vmatprep.subr.bf16.mxu1 %v640_v5  ;;  %v648_v13 = vld [vmem:[%s888_s1 + $0xe0] sm:$0xff]   ;;  %v652_v17 = vld [vmem:[%s888_s1 + $0xd8] sm:$0xff]   ;;  %v656_v21 = vld [vmem:[%s888_s1 + $0xd0] sm:$0xff]  }
   0x7   :  { %v649_v14 = vld [vmem:[%s888_s1 + $0x20] sm:$0xff]   ;;  %v653_v18 = vld [vmem:[%s888_s1 + $0x18] sm:$0xff]   ;;  %v657_v22 = vld [vmem:[%s888_s1 + $0x10] sm:$0xff]  }
   0x8   :  { %593 = vmatpush3.bf16.msra.mxu0 %v641_v6  ;;  %v650_v15 = vld [vmem:[%s888_s1 + $0xa0] sm:$0xff]   ;;  %v654_v19 = vld [vmem:[%s888_s1 + $0x98] sm:$0xff]   ;;  %v658_v23 = vld [vmem:[%s888_s1 + $0x90] sm:$0xff]   ;;  %v400_v6 = vlaneseq }
   0x9   :  { %615 = vmatpush3.bf16.msra.mxu1 %v642_v7  ;;  %594 = vmatprep.subr.bf16.mxu0 %v643_v8  ;;  %v659_v24 = vld [vmem:[%s888_s1 + $0x48] sm:$0xff]   ;;  %v663_v28 = vld [vmem:[%s888_s1 + $0x40] sm:$0xff]   ;;  %v673_v38 = vld [vmem:[%s890_s3 + $0x74] ss:$8 sps:$4 sm:$0xff]  }
   0xa   :  { %616 = vmatprep.subr.bf16.mxu1 %v644_v9  ;;  %v660_v25 = vld [vmem:[%s888_s1 + $0xc8] sm:$0xff]   ;;  %v664_v29 = vld [vmem:[%s888_s1 + $0xc0] sm:$0xff]   ;;  %v671_v39 = vld [vmem:[%s890_s3 + $0x70] ss:$8 sps:$4 sm:$0xff]   ;;  %v401_v7 = vshrl.u32 %v400_v6, 7 }
   0xb   :  { %v661_v26 = vld [vmem:[%s888_s1 + $0x8] sm:$0xff]   ;;  %v665_v30 = vld [vmem:[%s888_s1] sm:$0xff]   ;;  %v679_v42 = vld [vmem:[%s890_s3 + $0x54] ss:$8 sps:$4 sm:$0xff]  }
   0xc   :  { %595 = vmatpush3.bf16.msra.mxu0 %v645_v10  ;;  %v662_v27 = vld [vmem:[%s888_s1 + $0x88] sm:$0xff]   ;;  %v666_v31 = vld [vmem:[%s888_s1 + $0x80] sm:$0xff]   ;;  %v677_v43 = vld [vmem:[%s890_s3 + $0x50] ss:$8 sps:$4 sm:$0xff]   ;;  %v402_v8 = vsub.s32 0, %v401_v7  ;;  %v406_v10 = vsub.s32 1, %v401_v7 }
   0xd   :  { %617 = vmatpush3.bf16.msra.mxu1 %v646_v11  ;;  %596 = vmatprep.subr.bf16.mxu0 %v647_v12  ;;  %v21_v32 = vld [vmem:[%s889_s0] sm:$0xff]  ;;  %v22_v33 = vld [vmem:[%s889_s0 + $0x8] sm:$0xff]  ;;  %v685_v46 = vld [vmem:[%s890_s3 + $0x34] ss:$8 sps:$4 sm:$0xff]  }
   0xe   :  { %618 = vmatprep.subr.bf16.mxu1 %v648_v13  ;;  %v538_v34 = vcombine.low %v21_v32, %v21_v32  ;;  %v539_v35 = vcombine.high %v21_v32, %v21_v32  ;;  %v540_v36 = vcombine.low %v22_v33, %v22_v33  ;;  %v541_v37 = vcombine.high %v22_v33, %v22_v33  ;;  %v676_v40 = vld [vmem:[%s890_s3 + $0x64] ss:$8 sps:$4 sm:$0xff]   ;;  %v674_v41 = vld [vmem:[%s890_s3 + $0x60] ss:$8 sps:$4 sm:$0xff]   ;;  %v683_v47 = vld [vmem:[%s890_s3 + $0x30] ss:$8 sps:$4 sm:$0xff]  }
   0xf   :  { %v682_v44 = vld [vmem:[%s890_s3 + $0x44] ss:$8 sps:$4 sm:$0xff]   ;;  %v680_v45 = vld [vmem:[%s890_s3 + $0x40] ss:$8 sps:$4 sm:$0xff]   ;;  %v691_v50 = vld [vmem:[%s890_s3 + $0x14] ss:$8 sps:$4 sm:$0xff]  }
  0x10   :  { %597 = vmatpush3.bf16.msra.mxu0 %v649_v14  ;;  %332 = vmatprep.mubr.bf16.mxu0 %v539_v35  ;;  %v688_v48 = vld [vmem:[%s890_s3 + $0x24] ss:$8 sps:$4 sm:$0xff]   ;;  %v686_v49 = vld [vmem:[%s890_s3 + $0x20] ss:$8 sps:$4 sm:$0xff]   ;;  %v689_v51 = vld [vmem:[%s890_s3 + $0x10] ss:$8 sps:$4 sm:$0xff]  }
  0x11   :  { %619 = vmatpush3.bf16.msra.mxu1 %v650_v15  ;;  %598 = vmatprep.subr.bf16.mxu0 %v651_v16  ;;  %v694_v52 = vld [vmem:[%s890_s3 + $0x4] ss:$8 sps:$4 sm:$0xff]   ;;  %v692_v53 = vld [vmem:[%s890_s3] ss:$8 sps:$4 sm:$0xff]  }
  0x12   :  { %620 = vmatprep.subr.bf16.mxu1 %v652_v17  ;;  %372 = vmatprep.mubr.bf16.mxu1 %v541_v37  ;;  %v537_v57 = vld [vmem:[%s891_s2] ss:$0 sm:$0xff] }
  0x13   :  { %v398_v9 = vld [vmem:[%s892_s4] sm:$0x3] }
  0x14   :  { %599 = vmatpush3.bf16.msra.mxu0 %v653_v18  ;;  %v403_v11 = vrot.slane %v398_v9, %v402_v8  ;;  %v407_v12 = vrot.slane %v398_v9, %v406_v10 }
  0x15   :  { %621 = vmatpush3.bf16.msra.mxu1 %v654_v19  ;;  %600 = vmatprep.subr.bf16.mxu0 %v655_v20 }
  0x16   :  { %622 = vmatprep.subr.bf16.mxu1 %v656_v21 }
  0x18   :  { %601 = vmatpush3.bf16.msra.mxu0 %v657_v22 }
  0x19   :  { %623 = vmatpush3.bf16.msra.mxu1 %v658_v23  ;;  %602 = vmatprep.subr.bf16.mxu0 %v659_v24 }
  0x1a   :  { %624 = vmatprep.subr.bf16.mxu1 %v660_v25 }
  0x1c   :  { %603 = vmatpush3.bf16.msra.mxu0 %v661_v26 }
  0x1d   :  { %625 = vmatpush3.bf16.msra.mxu1 %v662_v27  ;;  %604 = vmatprep.subr.bf16.mxu0 %v663_v28 }
  0x1e   :  { %626 = vmatprep.subr.bf16.mxu1 %v664_v29 }
  0x20   :  { %605 = vmatpush3.bf16.msra.mxu0 %v665_v30 }
  0x21   :  { %627 = vmatpush3.bf16.msra.mxu1 %v666_v31  ;;  %490 = vmatprep.subr.bf16.mxu0 %v673_v38 }
  0x23   :  { %333 = vmatmul.mubr.bf16.vlgmr.msra.gmra.mxu0 %v538_v34 }
  0x24   :  { %373 = vmatmul.mubr.bf16.vlgmr.msra.gmra.mxu1 %v540_v36  ;;  %491 = vmatpush1.bf16.msra.mxu0 %v671_v39 }
  0x25   :  { %492 = vmatprep.subr.bf16.mxu0 %v676_v40  ;;  %522 = vmatprep.mubr.bf16.mxu0 %v695_v54 }
  0x28   :  { %493 = vmatpush1.bf16.msra.mxu0 %v674_v41 }
  0x29   :  { %494 = vmatprep.subr.bf16.mxu0 %v679_v42 }
  0x2c   :  { %495 = vmatpush1.bf16.msra.mxu0 %v677_v43 }
  0x2d   :  { %496 = vmatprep.subr.bf16.mxu0 %v682_v44 }
  0x30   :  { %497 = vmatpush1.bf16.msra.mxu0 %v680_v45 }
  0x31   :  { %498 = vmatprep.subr.bf16.mxu0 %v685_v46 }
  0x34   :  { %499 = vmatpush1.bf16.msra.mxu0 %v683_v47 }
  0x35   :  { %500 = vmatprep.subr.bf16.mxu0 %v688_v48 }
  0x38   :  { %501 = vmatpush1.bf16.msra.mxu0 %v686_v49 }
  0x39   :  { %502 = vmatprep.subr.bf16.mxu0 %v691_v50 }
  0x3c   :  { %503 = vmatpush1.bf16.msra.mxu0 %v689_v51 }
  0x3d   :  { %504 = vmatprep.subr.bf16.mxu0 %v694_v52 }
  0x40   :  { %505 = vmatpush1.bf16.msra.mxu0 %v692_v53 }
  0xe3   :  { %v606_v55 = vpop.f32.mrf.mxu0 }
  0xe4   :  { %v628_v56 = vpop.f32.mrf.mxu1 }
  0xe5   :  { %v607_v58 = vpop.f32.mrf.mxu0 }
  0xe6   :  { %v629_v59 = vpop.f32.mrf.mxu1  ;;  %v608_v60 = vadd.f32 %v607_v58, %v606_v55 }
  0xe7   :  { %v609_v61 = vpop.f32.mrf.mxu0  ;;  %v630_v0 = vadd.f32 %v629_v59, %v628_v56 }
  0xe8   :  { %v631_v62 = vpop.f32.mrf.mxu1  ;;  %v335_v63 = vadd.f32 %v608_v60, %v537_v57 }
  0xe9   :  { %v610_v1 = vpop.f32.mrf.mxu0 }
  0xea   :  { %v632_v2 = vpop.f32.mrf.mxu1  ;;  %v375_v3 = vadd.f32 %v630_v0, %v335_v63 }
  0xec   :  { %v380_v4 = vmax.f32 %v375_v3, 0.0 }
  0xee   :  { %v381_v5 = vpack.c.bf16 %v380_v4, %v380_v4 }
  0xf0   :  { %523 = vmatmul.mubr.bf16.vlgmr.msra.gmra.mxu0 %v381_v5 }
 0x1b0   :  { %v524_v13 = vpop.f32.mrf.mxu0 }
 0x1b1   :  { %v525_v14 = vadd.f32 %v524_v13, %v403_v11 }
 0x1b2   :  { %v526_v15 = vpop.f32.mrf.mxu0 }
 0x1b3   :  { %531 = vst [vmem:[%s893_s5] sm:$0xff] %v525_v14  ;;  %v527_v16 = vadd.f32 %v526_v15, %v407_v12 }
 0x1b4   :  { %v528_v17 = vpop.f32.mrf.mxu0 }
 0x1b5   :  { %532 = vst [vmem:[%s893_s5 + $0x8] sm:$0xff] %v527_v16 }
 0x1b6   :  { %v529_v18 = vpop.f32.mrf.mxu0 }

// kernel: forward.10
= control target key start
LH: loop header
LB: loop body
LE: loop exit
PB: predicated region body
PF: predicated region fallthrough
CT: control target
= control target key end

     0   :  { %s870_s9 = smov 0   ;;  %s872_s10 = smov 0   ;;  %s1045_s0 = inlined_call_operand.vmem [shape: f32[4,2,256], index: 0, kind: input, shape index: {}]   ;;  %s1046_s1 = inlined_call_operand.vmem [shape: bf16[2,32,256], index: 1, kind: input, shape index: {}]   ;;  %s1047_s2 = inlined_call_operand.vmem [shape: f32[4,2,256], index: 2, kind: output, shape index: {}]  }
   0x1   :  { %s874_s11 = smov 0  }
   0x2 LB: > { %s886_s12 = sadd.s32 4294967295, %s850_s11   ;;  %s889_s13 = sadd.s32 1, %s850_s11   ;;  %s850_s11 = sphi %s874_s11, %s1053_s11   ;;  %s846_s10 = sphi %s872_s10, %s1052_s10   ;;  %s842_s9 = sphi %s870_s9, %s1051_s9  }
   0x3   : > { %s16_s14 = ssub.s32 %s850_s11, %s889_s13  ;;  %s19_s15 = sadd.s32 1, %s846_s10 }
   0x4   : > { %p17_p0 = scmp.eq.s32.totalorder %s16_s14, 0  ;;  %p26_p1 = scmp.ne.s32.totalorder %s846_s10, %s842_s9 }
   0x5   : > { %p27_p2 = scmp.eq.s32.totalorder %s850_s11, 0  ;;  %p82_p3 = scmp.eq.s32.totalorder %s886_s12, 1 }
   0x6   : > { %s899_s16 = scalar_select %p17_p0, %s846_s10, %s19_s15  }
   0x7   : > { %p28_p4 = por %p27_p2, %p26_p1  ;;  %p901_p5 = por %p82_p3, %p26_p1 }
   0x8   : > { %p732_p6 = scmp.ge.s32.totalorder %s850_s11, 2 }
   0xa   : > { %104 = sbr.rel (%p732_p6) target bundleno = 21 (0x15), region = 16 }
   0xf   : > { %107 = sbr.rel (!%p28_p4) target bundleno = 21 (0x15), region = 20  ;;  %s109_s18 = sand.u32 (%p28_p4), 1, %s846_s10  }
  0x10   : > { %s734_s19 = sshll.u32 (%p28_p4), %s850_s11, 1  ;;  %s733_s20 = sshll.u32 (%p28_p4), %s109_s18, 3 }
  0x11   : > { %s113_s23 = scalar_lea.vmem (%p28_p4), %s1045_s0, %s734_s19  ;;  %s111_s24 = scalar_lea.vmem (%p28_p4), [#allocation2], %s733_s20 }
  0x12   : > { %v130_v0 = vld [vmem:[%s113_s23] sm:$0x3] (%p28_p4)  ;;  %v132_v1 = vld [vmem:[%s113_s23 + $0x4] sm:$0x3] (%p28_p4)  ;;  %v134_v2 = vld [vmem:[%s113_s23 + $0x8] sm:$0x3] (%p28_p4) }
  0x13   : > { %131 = vst [vmem:[%s111_s24] sm:$0x3] (%p28_p4), %v130_v0  ;;  %133 = vst [vmem:[%s111_s24 + $0x2] sm:$0x3] (%p28_p4), %v132_v1  ;;  %v136_v3 = vld [vmem:[%s113_s23 + $0xc] sm:$0x3] (%p28_p4) }
  0x14   : > { %135 = vst [vmem:[%s111_s24 + $0x4] sm:$0x3] %v134_v2  ;;  %137 = vst [vmem:[%s111_s24 + $0x6] sm:$0x3] %v136_v3 }
  0x15 PF: > { %p735_p7 = scmp.ge.s32.totalorder %s850_s11, 1  ;;  %p176_p8 = scmp.lt.s32.totalorder %s850_s11, 3 }
  0x17   : > { %p177_p9 = pnand %p735_p7, %p176_p8 }
  0x18   : > { %s183_s25 = sand.u32 (!%p177_p9), 1, %s842_s9   ;;  %s740_s26 = smul.u32 (!%p177_p9), 6, %s886_s12 }
  0x19   : > { %180 = sbr.rel (%p177_p9) target bundleno = 2881 (0xb41), region = 65  ;;  %s915_s27 = sshll.u32 (!%p177_p9), %s183_s25, 3 }
  0x1a   : > { %s918_s28 = scalar_lea.vmem (!%p177_p9), [#allocation2], %s915_s27  ;;  %s852_s30 = smov (!%p177_p9), 64  }
  0x1b   : > { %s225_s29 = scalar_lea.vmem (!%p177_p9), %s918_s28, %s740_s26 [#allocation2]  ;;  %s853_s3 = smov (!%p177_p9), 32  }
  0x1c   : > { %p208_p10 = scmp.lt.s32.totalorder (!%p177_p9), %s886_s12, 1  ;;  %s747_s9 = sshll.u32 (!%p177_p9), %s886_s12, 1 }
  0x1d   : > { %s957_s11 = smul.u32 (!%p177_p9), 3, %s886_s12  ;;  %s961_s14 = ssub.s32 (!%p177_p9), 1, %s747_s9 }
  0x1e   : > { %v226_v4 = vld [vmem:[%s225_s29] sm:$0x3]  ;;  %v218_v8 = vlaneseq  ;;  %v854_v19 = vmov 0   ;;  %s209_s4 = scalar_select %p208_p10, %s886_s12, 1  ;;  %vm277_vm3 = vcmask 261120  }
  0x1f   : > { %v741_v5 = vmul.f32 -1.442695, %v226_v4  ;;  %313 = vmatprep.mubr.bf16.mxu0 %v854_v19  ;;  %395 = vmatprep.mubr.bf16.mxu1 %v854_v19  ;;  %s326_s15 = sadd.s32 %s961_s14, %s957_s11  ;;  %s970_s20 = scalar_lea.vmem [#allocation3], %s915_s27 }
  0x20   : > { %v219_v9 = vand.u32 127, %v218_v8  ;;  %s762_s5 = sshll.u32 %s209_s4, 5  ;;  %s965_s18 = sshll.u32 %s326_s15, 1 }
  0x21   : > { %796 = vpow2.f32 %v741_v5  ;;  %s212_s8 = scalar_lea.vmem %s1046_s1, %s762_s5  ;;  %s328_s19 = scalar_lea.vmem %s918_s28, %s965_s18 [#allocation2] }
  0x22   : > { %798 = vtanh.f32 %v226_v4  ;;  %vm220_vm0 = vcmp.ge.s32.totalorder %v219_v9, 64  ;;  %vm221_vm1 = vcmp.lt.s32.totalorder %v219_v9, 96  ;;  %v790_v20 = vld [vmem:[%s212_s8 + $0x14] ss:$8 sps:$4 sm:$0xff]   ;;  %v941_v21 = vld [vmem:[%s212_s8 + $0x10] ss:$8 sps:$4 sm:$0xff]   ;;  %s322_s21 = scalar_lea.vmem %s970_s20, %s740_s26 [#allocation3]  ;;  %s404_s26 = scalar_lea.vmem %s970_s20, %s965_s18 [#allocation3] }
  0x23   : > { %vm923_vm2 = vmand %vm220_vm0, %vm221_vm1  ;;  %293 = vmatprep.subr.bf16.mxu0 %v790_v20  ;;  %v943_v23 = vld [vmem:[%s212_s8 + $0x4] ss:$8 sps:$4 sm:$0xff]   ;;  %375 = vmatprep.subr.bf16.mxu1 %v790_v20  ;;  %v795_v24 = vld [vmem:[%s212_s8] ss:$8 sps:$4 sm:$0xff]   ;;  %s751_s22 = sshll.u32 %s961_s14, 1  ;;  %s487_s27 = smul.u32 3, %s961_s14 }
  0x24   : > { %294 = vmatpush1.bf16.msra.mxu0 %v941_v21  ;;  %376 = vmatpush1.bf16.msra.mxu1 %v941_v21  ;;  %v329_v29 = vld [vmem:[%s328_s19] sm:$0x3]  ;;  %s988_s23 = sadd.s32 %s751_s22, %s957_s11 }
  0x25   : > { %295 = vmatprep.subr.bf16.mxu0 %v943_v23  ;;  %377 = vmatprep.subr.bf16.mxu1 %v943_v23  ;;  %s752_s24 = sshll.u32 %s988_s23, 1  ;;  %s1005_s29 = sadd.s32 %s487_s27, %s957_s11 }
  0x26   : > { %s409_s25 = scalar_lea.vmem %s918_s28, %s752_s24 [#allocation2]  ;;  %s755_s4 = sshll.u32 %s1005_s29, 1 }
  0x27   : > { %v410_v51 = vld [vmem:[%s409_s25] sm:$0x3]  ;;  %s490_s5 = scalar_lea.vmem %s918_s28, %s755_s4 [#allocation2]  ;;  %s485_s6 = scalar_lea.vmem %s970_s20, %s752_s24 [#allocation3] }
  0x28   : > { %296 = vmatpush1.bf16.msra.mxu0 %v795_v24  ;;  %378 = vmatpush1.bf16.msra.mxu1 %v795_v24  ;;  %v491_v9 = vld [vmem:[%s490_s5] sm:$0x3]  ;;  %s565_s28 = scalar_lea.vmem %s970_s20, %s755_s4 [#allocation3] }
  0x29   : > { %456 = vmatprep.subr.bf16.mxu0 %v790_v20  ;;  %537 = vmatprep.subr.bf16.mxu1 %v790_v20 }
  0x2e   : > { %v797_v6 = vpop.eup %796 }
  0x2f   : > { %v232_v7 = vadd.f32 1.0, %v797_v6  ;;  %v799_v10 = vpop.eup %798 }
  0x31   : > { %800 = vrcp.f32 %v232_v7 }
  0x3e   : > { %v801_v12 = vpop.eup %800 }
  0x3f   : > { %v235_v13 = vsel %vm923_vm2, %v799_v10, %v801_v12 }
  0x40   : > { %238 = vrot.lane.b32.xlu0 %v235_v13, %s852_s30  ;;  %v236_v16 = vmul.f32 0.0, %v235_v13 }
  0xb2   : > { %v239_v14 = vpop.permute.xlu0 %238 }
  0xb3   : > { %v241_v15 = vmul.f32 %v239_v14, %v235_v13 }
  0xb5   : > { %243 = vrot.lane.b32.xlu0 %v241_v15, %s853_s3 }
 0x127   : > { %v244_v17 = vpop.permute.xlu0 %243 }
 0x128   : > { %v931_v18 = vadd.f32 %v244_v17, %v236_v16 }
 0x12a   : > { %802 = vtanh.f32 %v931_v18 }
 0x137   : > { %v803_v22 = vpop.eup %802 }
 0x138   : > { %249 = vrot.lane.b32.xlu1 %v803_v22, %s852_s30 }
 0x1aa   : > { %v250_v25 = vpop.permute.xlu1 %249 }
 0x1ab   : > { %v252_v26 = vmul.f32 %v250_v25, %v235_v13 }
 0x1ad   : > { %v253_v27 = vpack.c.bf16 %v252_v26, %v252_v26 }
 0x1af   : > { %255 = vrot.lane.b32.xlu1 %v253_v27, %s853_s3 }
 0x221   : > { %v256_v28 = vpop.permute.xlu1 %255 }
 0x222   : > { %746 = vmatmul.mubr.msk.bf16.vlgmr.msra.gmra.mxu0 %vm277_vm3, %v256_v28 }
 0x223   : > { %457 = vmatpush1.bf16.msra.mxu0 %v941_v21  ;;  %476 = vmatprep.mubr.bf16.mxu0 %v854_v19 }
 0x224   : > { %458 = vmatprep.subr.bf16.mxu0 %v943_v23 }
 0x227   : > { %459 = vmatpush1.bf16.msra.mxu0 %v795_v24 }
 0x2e2   : > { %v315_v30 = vpop.f32.mrf.mxu0 }
 0x2e3   : > { %v330_v31 = vadd.f32 %v329_v29, %v315_v30 }
 0x2e4   : > { %v317_v32 = vpop.f32.mrf.mxu0 }
 0x2e5   : > { %v749_v33 = vmul.f32 -1.442695, %v330_v31  ;;  %323 = vst [vmem:[%s322_s21] sm:$0x3] %v317_v32 }
 0x2e6   : > { %v319_v34 = vpop.f32.mrf.mxu0 }
 0x2e7   : > { %804 = vpow2.f32 %v749_v33 }
 0x2e8   : > { %v320_v35 = vpop.f32.mrf.mxu0  ;;  %806 = vtanh.f32 %v330_v31 }
 0x2f4   : > { %v805_v36 = vpop.eup %804 }
 0x2f5   : > { %v335_v37 = vadd.f32 1.0, %v805_v36  ;;  %v807_v38 = vpop.eup %806 }
 0x2f7   : > { %808 = vrcp.f32 %v335_v37 }
 0x304   : > { %v809_v39 = vpop.eup %808 }
 0x305   : > { %v338_v40 = vsel %vm923_vm2, %v807_v38, %v809_v39 }
 0x306   : > { %341 = vrot.lane.b32.xlu0 %v338_v40, %s852_s30  ;;  %v339_v43 = vmul.f32 %v338_v40, %v931_v18 }
 0x378   : > { %v342_v41 = vpop.permute.xlu0 %341 }
 0x379   : > { %v344_v42 = vmul.f32 %v342_v41, %v338_v40 }
 0x37b   : > { %346 = vrot.lane.b32.xlu1 %v344_v42, %s853_s3 }
 0x3ed   : > { %v347_v44 = vpop.permute.xlu1 %346 }
 0x3ee   : > { %v349_v45 = vadd.f32 %v347_v44, %v339_v43 }
 0x3f0   : > { %810 = vtanh.f32 %v349_v45 }
 0x3fd   : > { %v811_v46 = vpop.eup %810 }
 0x3fe   : > { %352 = vrot.lane.b32.xlu0 %v811_v46, %s852_s30 }
 0x470   : > { %v353_v47 = vpop.permute.xlu0 %352 }
 0x471   : > { %v355_v48 = vmul.f32 %v353_v47, %v338_v40 }
 0x473   : > { %v356_v49 = vpack.c.bf16 %v355_v48, %v355_v48 }
 0x475   : > { %358 = vrot.lane.b32.xlu1 %v356_v49, %s853_s3 }
 0x4e7   : > { %v359_v50 = vpop.permute.xlu1 %358 }
 0x4e8   : > { %750 = vmatmul.mubr.msk.bf16.vlgmr.msra.gmra.mxu1 %vm277_vm3, %v359_v50 }
 0x4e9   : > { %538 = vmatpush1.bf16.msra.mxu1 %v941_v21  ;;  %557 = vmatprep.mubr.bf16.mxu1 %v854_v19 }
 0x4ea   : > { %539 = vmatprep.subr.bf16.mxu1 %v943_v23 }
 0x4ed   : > { %540 = vmatpush1.bf16.msra.mxu1 %v795_v24 }
 0x5a8   : > { %v397_v52 = vpop.f32.mrf.mxu1 }
 0x5a9   : > { %v411_v53 = vadd.f32 %v410_v51, %v397_v52 }
 0x5aa   : > { %v399_v54 = vpop.f32.mrf.mxu1 }
 0x5ab   : > { %v753_v55 = vmul.f32 -1.442695, %v411_v53  ;;  %405 = vst [vmem:[%s404_s26] sm:$0x3] %v399_v54 }
 0x5ac   : > { %v401_v56 = vpop.f32.mrf.mxu1 }
 0x5ad   : > { %812 = vpow2.f32 %v753_v55 }
 0x5ae   : > { %v402_v57 = vpop.f32.mrf.mxu1  ;;  %814 = vtanh.f32 %v411_v53 }
 0x5ba   : > { %v813_v58 = vpop.eup %812 }
 0x5bb   : > { %v416_v59 = vadd.f32 1.0, %v813_v58  ;;  %v815_v60 = vpop.eup %814 }
 0x5bd   : > { %816 = vrcp.f32 %v416_v59 }
 0x5ca   : > { %v817_v61 = vpop.eup %816 }
 0x5cb   : > { %v419_v62 = vsel %vm923_vm2, %v815_v60, %v817_v61 }
 0x5cc   : > { %422 = vrot.lane.b32.xlu0 %v419_v62, %s852_s30  ;;  %v420_v1 = vmul.f32 %v419_v62, %v349_v45 }
 0x63e   : > { %v423_v63 = vpop.permute.xlu0 %422 }
 0x63f   : > { %v425_v0 = vmul.f32 %v423_v63, %v419_v62 }
 0x641   : > { %427 = vrot.lane.b32.xlu1 %v425_v0, %s853_s3 }
 0x6b3   : > { %v428_v2 = vpop.permute.xlu1 %427 }
 0x6b4   : > { %v430_v3 = vadd.f32 %v428_v2, %v420_v1 }
 0x6b6   : > { %818 = vtanh.f32 %v430_v3 }
 0x6c3   : > { %v819_v4 = vpop.eup %818 }
 0x6c4   : > { %433 = vrot.lane.b32.xlu0 %v819_v4, %s852_s30 }
 0x736   : > { %v434_v5 = vpop.permute.xlu0 %433 }
 0x737   : > { %v436_v6 = vmul.f32 %v434_v5, %v419_v62 }
 0x739   : > { %v437_v7 = vpack.c.bf16 %v436_v6, %v436_v6 }
 0x73b   : > { %439 = vrot.lane.b32.xlu1 %v437_v7, %s853_s3 }
 0x7ad   : > { %v440_v8 = vpop.permute.xlu1 %439 }
 0x7ae   : > { %754 = vmatmul.mubr.msk.bf16.vlgmr.msra.gmra.mxu0 %vm277_vm3, %v440_v8 }
 0x86e   : > { %v478_v10 = vpop.f32.mrf.mxu0 }
 0x86f   : > { %v492_v12 = vadd.f32 %v491_v9, %v478_v10 }
 0x870   : > { %v480_v13 = vpop.f32.mrf.mxu0 }
 0x871   : > { %v756_v14 = vmul.f32 -1.442695, %v492_v12  ;;  %486 = vst [vmem:[%s485_s6] sm:$0x3] %v480_v13 }
 0x872   : > { %v482_v15 = vpop.f32.mrf.mxu0 }
 0x873   : > { %820 = vpow2.f32 %v756_v14 }
 0x874   : > { %v483_v16 = vpop.f32.mrf.mxu0  ;;  %822 = vtanh.f32 %v492_v12 }
 0x880   : > { %v821_v17 = vpop.eup %820 }
 0x881   : > { %v497_v18 = vadd.f32 1.0, %v821_v17  ;;  %v823_v19 = vpop.eup %822 }
 0x883   : > { %824 = vrcp.f32 %v497_v18 }
 0x890   : > { %v825_v20 = vpop.eup %824 }
 0x891   : > { %v500_v21 = vsel %vm923_vm2, %v823_v19, %v825_v20 }
 0x892   : > { %503 = vrot.lane.b32.xlu0 %v500_v21, %s852_s30  ;;  %v501_v24 = vmul.f32 %v500_v21, %v430_v3 }
 0x904   : > { %v504_v22 = vpop.permute.xlu0 %503 }
 0x905   : > { %v506_v23 = vmul.f32 %v504_v22, %v500_v21 }
 0x907   : > { %508 = vrot.lane.b32.xlu1 %v506_v23, %s853_s3 }
 0x979   : > { %v509_v25 = vpop.permute.xlu1 %508 }
 0x97a   : > { %v511_v26 = vadd.f32 %v509_v25, %v501_v24 }
 0x97c   : > { %826 = vtanh.f32 %v511_v26 }
 0x989   : > { %v827_v27 = vpop.eup %826 }
 0x98a   : > { %514 = vrot.lane.b32.xlu0 %v827_v27, %s852_s30 }
 0x9fc   : > { %v515_v28 = vpop.permute.xlu0 %514 }
 0x9fd   : > { %v517_v29 = vmul.f32 %v515_v28, %v500_v21 }
 0x9ff   : > { %v518_v30 = vpack.c.bf16 %v517_v29, %v517_v29 }
 0xa01   : > { %520 = vrot.lane.b32.xlu1 %v518_v30, %s853_s3  ;;  %s575_s3 = scalar_lea.vmem (%p901_p5), %s1047_s2, %s747_s9 }
 0xa73   : > { %v521_v11 = vpop.permute.xlu1 %520 }
 0xa74   : > { %757 = vmatmul.mubr.msk.bf16.vlgmr.msra.gmra.mxu1 %vm277_vm3, %v521_v11 }
 0xb34   : > { %v559_v31 = vpop.f32.mrf.mxu1 }
 0xb36   : > { %v560_v32 = vpop.f32.mrf.mxu1  ;;  %573 = sbr.rel (!%p901_p5) target bundleno = 2881 (0xb41), region = 73 }
 0xb37   : > { %566 = vst [vmem:[%s565_s28] sm:$0x3] %v560_v32 }
 0xb38   : > { %v562_v33 = vpop.f32.mrf.mxu1 }
 0xb3a   : > { %v563_v34 = vpop.f32.mrf.mxu1 }
 0xb3e   : > { %v592_v35 = vld [vmem:[%s970_s20] sm:$0x3]  ;;  %v594_v36 = vld [vmem:[%s970_s20 + $0x2] sm:$0x3]  ;;  %v596_v37 = vld [vmem:[%s970_s20 + $0x4] sm:$0x3] }
 0xb3f   : > { %593 = vst [vmem:[%s575_s3] sm:$0x3] %v592_v35  ;;  %595 = vst [vmem:[%s575_s3 + $0x4] sm:$0x3] %v594_v36  ;;  %v598_v38 = vld [vmem:[%s970_s20 + $0x6] sm:$0x3] }
 0xb40   : > { %597 = vst [vmem:[%s575_s3 + $0x8] sm:$0x3] %v596_v37  ;;  %599 = vst [vmem:[%s575_s3 + $0xc] sm:$0x3] %v598_v38 }
 0xb41 PF: > { %p9_p11 = scmp.ge.s32.totalorder %s889_s13, 4   ;;  %s1051_s9 = smov %s846_s10 }
 0xb42   : > { %s1052_s10 = smov %s899_s16  ;;  %s1053_s11 = smov %s889_s13 }
 0xb43   :  { %11 = sbr.rel (!%p9_p11) target bundleno = 2 (0x2), region = 156 }

// kernel: forward.11
= control target key start
LH: loop header
LB: loop body
LE: loop exit
PB: predicated region body
PF: predicated region fallthrough
CT: control target
= control target key end

     0   :  { %v587_v1 = vmov 0.0   ;;  %vm588_vm0 = vmmov 0   ;;  %s726_s0 = inlined_call_operand.vmem [shape: f32[4,2,256], index: 0, kind: input, shape index: {}]   ;;  %s727_s1 = inlined_call_operand.vmem [shape: bf16[32,128], index: 1, kind: input, shape index: {}]   ;;  %s728_s2 = inlined_call_operand.vmem [shape: f32[1,128], index: 2, kind: input, shape index: {}]   ;;  %s729_s3 = inlined_call_operand.vmem [shape: bf16[32,128], index: 3, kind: input, shape index: {}]   ;;  %s730_s4 = inlined_call_operand.vmem [shape: f32[1,128], index: 4, kind: input, shape index: {}]   ;;  %s731_s5 = inlined_call_operand.hbm [shape: f32[2,128], index: 5, kind: output, shape index: {}]  }
   0x1   :  { %v626_v0 = vld [vmem:[%s727_s1 + $0x8] sm:$0xff]   ;;  %483 = vmatprep.subr.bf16.mxu0 %v587_v1  ;;  %491 = vmatprep.subr.bf16.mxu1 %v587_v1  ;;  %v634_v2 = vld [vmem:[%s727_s1] sm:$0xff]  }
   0x2   :  { %484 = vmatpush3.bf16.msra.mxu0 %v626_v0  ;;  %487 = vmatprep.mubr.msk.bf16.mxu0 %vm588_vm0, %v587_v1 }
   0x3   :  { %485 = vmatprep.subr.bf16.mxu0 %v587_v1  ;;  %492 = vmatpush3.bf16.msra.mxu1 %v626_v0 }
   0x4   :  { %493 = vmatprep.subr.bf16.mxu1 %v587_v1  ;;  %495 = vmatprep.mubr.msk.bf16.mxu1 %vm588_vm0, %v587_v1 }
   0x5   :  { %10 = vsyncpa [#allocation3], 0  ;;  %v589_v3 = vmov 0   ;;  %v451_v4 = vld [vmem:[%s726_s0 + $0xc] sm:$0xf]  ;;  %v27_v17 = vlaneseq  ;;  %s591_s25 = smov 32  }
   0x6   :  { %486 = vmatpush3.bf16.msra.mxu0 %v634_v2  ;;  %v35_v5 = vrot.slane %v451_v4, 2  ;;  %v659_v7 = vld [vmem:[%s728_s2] ss:$0 sm:$0xff]  ;;  %s590_s2 = smov 64   ;;  %vm57_vm4 = vcmask 261120   ;;  %s592_s12 = smov [#allocation2]  }
   0x7   :  { %494 = vmatpush3.bf16.msra.mxu1 %v634_v2  ;;  %499 = vmatprep.subr.bf16.mxu0 %v587_v1  ;;  %v28_v18 = vand.u32 127, %v27_v17  ;;  %v456_v33 = vld [vmem:[%s726_s0 + $0x8] sm:$0xf]  ;;  %v459_v58 = vld [vmem:[%s726_s0 + $0x4] sm:$0xf] }
   0x8   :  { %507 = vmatprep.subr.bf16.mxu1 %v587_v1  ;;  %v37_v6 = vadd.f32 %v451_v4, %v35_v5  ;;  %v130_v34 = vrot.slane %v456_v33, 2  ;;  %v210_v59 = vrot.slane %v459_v58, 2  ;;  %v532_v19 = vld [vmem:[%s729_s3] sm:$0xff]  }
   0x9   :  { %488 = vmatmul.mubr.bf16.vlgmr.msra.gmra.mxu0 %v589_v3  ;;  %vm29_vm1 = vcmp.ge.s32.totalorder %v28_v18, 64  ;;  %vm30_vm2 = vcmp.lt.s32.totalorder %v28_v18, 96 }
   0xa   :  { %500 = vmatpush3.bf16.msra.mxu0 %v626_v0  ;;  %503 = vmatprep.mubr.msk.bf16.mxu0 %vm588_vm0, %v587_v1  ;;  %v44_v8 = vadd.f32 %v659_v7, %v37_v6  ;;  %vm662_vm3 = vmand %vm29_vm1, %vm30_vm2  ;;  %v132_v35 = vadd.f32 %v456_v33, %v130_v34  ;;  %v212_v60 = vadd.f32 %v459_v58, %v210_v59 }
   0xb   :  { %501 = vmatprep.subr.bf16.mxu0 %v587_v1 }
   0xc   :  { %v133_v36 = vadd.f32 %v659_v7, %v132_v35  ;;  %v213_v61 = vadd.f32 %v659_v7, %v212_v60 }
   0xe   :  { %502 = vmatpush3.bf16.msra.mxu0 %v634_v2 }
   0xf   :  { %515 = vmatprep.subr.bf16.mxu0 %v587_v1 }
  0xc9   :  { %v95_v9 = vpop.f32.mrf.mxu0 }
  0xca   :  { %v101_v10 = vadd.f32 %v95_v9, %v44_v8 }
  0xcb   :  { %v489_v11 = vpop.f32.mrf.mxu0 }
  0xcc   :  { %v455_v12 = vmul.f32 -1.442695, %v101_v10 }
  0xcd   :  { %v98_v13 = vpop.f32.mrf.mxu0 }
  0xce   :  { %533 = vpow2.f32 %v455_v12 }
  0xcf   :  { %v490_v14 = vpop.f32.mrf.mxu0  ;;  %535 = vtanh.f32 %v101_v10 }
  0xdb   :  { %v534_v15 = vpop.eup %533 }
  0xdc   :  { %v106_v16 = vadd.f32 1.0, %v534_v15  ;;  %v536_v20 = vpop.eup %535 }
  0xde   :  { %537 = vrcp.f32 %v106_v16 }
  0xeb   :  { %v538_v21 = vpop.eup %537 }
  0xec   :  { %v109_v22 = vsel %vm662_vm3, %v536_v20, %v538_v21 }
  0xed   :  { %112 = vrot.lane.b32.xlu0 %v109_v22, %s590_s2  ;;  %v110_v25 = vmul.f32 0.0, %v109_v22 }
 0x15f   :  { %v113_v23 = vpop.permute.xlu0 %112 }
 0x160   :  { %v115_v24 = vmul.f32 %v113_v23, %v109_v22 }
 0x162   :  { %117 = vrot.lane.b32.xlu0 %v115_v24, %s591_s25 }
 0x1d4   :  { %v118_v26 = vpop.permute.xlu0 %117 }
 0x1d5   :  { %v120_v27 = vadd.f32 %v118_v26, %v110_v25 }
 0x1d7   :  { %539 = vtanh.f32 %v120_v27 }
 0x1e4   :  { %v540_v28 = vpop.eup %539 }
 0x1e5   :  { %123 = vrot.lane.b32.xlu1 %v540_v28, %s590_s2 }
 0x257   :  { %v124_v29 = vpop.permute.xlu1 %123 }
 0x258   :  { %v126_v30 = vmul.f32 %v124_v29, %v109_v22  ;;  %v287_v22 = vld [vmem:[%s726_s0] sm:$0xf] }
 0x259   :  { %v289_v23 = vrot.slane %v287_v22, 2 }
 0x25a   :  { %v134_v31 = vpack.c.bf16 %v126_v30, %v126_v30 }
 0x25b   :  { %v291_v24 = vadd.f32 %v289_v23, %v287_v22 }
 0x25c   :  { %136 = vrot.lane.b32.xlu1 %v134_v31, %s591_s25 }
 0x25d   :  { %v292_v25 = vadd.f32 %v659_v7, %v291_v24 }
 0x2ce   :  { %v137_v32 = vpop.permute.xlu1 %136 }
 0x2cf   :  { %496 = vmatmul.mubr.msk.bf16.vlgmr.msra.gmra.mxu1 %vm57_vm4, %v137_v32 }
 0x2d0   :  { %508 = vmatpush3.bf16.msra.mxu1 %v626_v0  ;;  %511 = vmatprep.mubr.msk.bf16.mxu1 %vm588_vm0, %v587_v1 }
 0x2d1   :  { %509 = vmatprep.subr.bf16.mxu1 %v587_v1 }
 0x2d4   :  { %510 = vmatpush3.bf16.msra.mxu1 %v634_v2 }
 0x38f   :  { %v175_v37 = vpop.f32.mrf.mxu1 }
 0x390   :  { %v181_v38 = vadd.f32 %v175_v37, %v133_v36 }
 0x391   :  { %v497_v39 = vpop.f32.mrf.mxu1 }
 0x392   :  { %v458_v40 = vmul.f32 -1.442695, %v181_v38 }
 0x393   :  { %v178_v41 = vpop.f32.mrf.mxu1 }
 0x394   :  { %541 = vpow2.f32 %v458_v40  ;;  %v531_v41 = vld [vmem:[%s729_s3 + $0x8] sm:$0xff]   ;;  %s443_s3 = sshll.u32 %s592_s12, 4  ;;  %s444_s3 = int_to_ptr.vmem [resolvable:$true] %s443_s3 }
 0x395   :  { %v498_v42 = vpop.f32.mrf.mxu1  ;;  %543 = vtanh.f32 %v181_v38  ;;  %s565_s13 = scalar_lea.vmem %s444_s3, 32  ;;  %p570_p1 = scmp.lt.s32.totalorder %s444_s3, %s444_s3 }
 0x396   :  { %p566_p0 = scmp.ne.s32.totalorder %s444_s3, %s565_s13  ;;  %p571_p2 = scmp.lt.s32.totalorder %s565_s13, %s565_s13 }
 0x398   :  { %p572_p3 = por %p571_p2, %p570_p1 }
 0x39a   :  { %p573_p4 = pnand %p572_p3, %p566_p0 }
 0x3a1   :  { %v542_v43 = vpop.eup %541 }
 0x3a2   :  { %v186_v44 = vadd.f32 1.0, %v542_v43  ;;  %v544_v45 = vpop.eup %543 }
 0x3a4   :  { %545 = vrcp.f32 %v186_v44 }
 0x3b1   :  { %v546_v46 = vpop.eup %545 }
 0x3b2   :  { %v189_v47 = vsel %vm662_vm3, %v544_v45, %v546_v46 }
 0x3b3   :  { %192 = vrot.lane.b32.xlu0 %v189_v47, %s590_s2  ;;  %v190_v50 = vmul.f32 %v189_v47, %v120_v27 }
 0x425   :  { %v193_v48 = vpop.permute.xlu0 %192 }
 0x426   :  { %v195_v49 = vmul.f32 %v193_v48, %v189_v47 }
 0x428   :  { %197 = vrot.lane.b32.xlu1 %v195_v49, %s591_s25 }
 0x49a   :  { %v198_v51 = vpop.permute.xlu1 %197 }
 0x49b   :  { %v200_v52 = vadd.f32 %v198_v51, %v190_v50 }
 0x49d   :  { %547 = vtanh.f32 %v200_v52 }
 0x4aa   :  { %v548_v53 = vpop.eup %547 }
 0x4ab   :  { %203 = vrot.lane.b32.xlu0 %v548_v53, %s590_s2 }
 0x51d   :  { %v204_v54 = vpop.permute.xlu0 %203 }
 0x51e   :  { %v206_v55 = vmul.f32 %v204_v54, %v189_v47  ;;  %v464_v47 = vld [vmem:[%s730_s4] ss:$0 sm:$0xff] }
 0x520   :  { %v214_v56 = vpack.c.bf16 %v206_v55, %v206_v55 }
 0x522   :  { %216 = vrot.lane.b32.xlu1 %v214_v56, %s591_s25 }
 0x594   :  { %v217_v57 = vpop.permute.xlu1 %216 }
 0x595   :  { %504 = vmatmul.mubr.msk.bf16.vlgmr.msra.gmra.mxu0 %vm57_vm4, %v217_v57 }
 0x596   :  { %519 = vmatprep.mubr.msk.bf16.mxu0 %vm588_vm0, %v587_v1  ;;  %516 = vmatpush3.bf16.msra.mxu0 %v531_v41 }
 0x597   :  { %517 = vmatprep.subr.bf16.mxu0 %v587_v1 }
 0x59a   :  { %518 = vmatpush3.bf16.msra.mxu0 %v532_v19 }
 0x655   :  { %v255_v62 = vpop.f32.mrf.mxu0 }
 0x656   :  { %v261_v63 = vadd.f32 %v255_v62, %v213_v61 }
 0x657   :  { %v505_v0 = vpop.f32.mrf.mxu0 }
 0x658   :  { %v461_v2 = vmul.f32 -1.442695, %v261_v63 }
 0x659   :  { %v258_v3 = vpop.f32.mrf.mxu0 }
 0x65a   :  { %549 = vpow2.f32 %v461_v2 }
 0x65b   :  { %v506_v4 = vpop.f32.mrf.mxu0  ;;  %551 = vtanh.f32 %v261_v63 }
 0x667   :  { %v550_v5 = vpop.eup %549 }
 0x668   :  { %v266_v6 = vadd.f32 1.0, %v550_v5  ;;  %v552_v8 = vpop.eup %551 }
 0x66a   :  { %553 = vrcp.f32 %v266_v6 }
 0x677   :  { %v554_v9 = vpop.eup %553 }
 0x678   :  { %v269_v10 = vsel %vm662_vm3, %v552_v8, %v554_v9 }
 0x679   :  { %272 = vrot.lane.b32.xlu0 %v269_v10, %s590_s2  ;;  %v270_v13 = vmul.f32 %v269_v10, %v200_v52 }
 0x6eb   :  { %v273_v11 = vpop.permute.xlu0 %272 }
 0x6ec   :  { %v275_v12 = vmul.f32 %v273_v11, %v269_v10 }
 0x6ee   :  { %277 = vrot.lane.b32.xlu1 %v275_v12, %s591_s25 }
 0x760   :  { %v278_v14 = vpop.permute.xlu1 %277 }
 0x761   :  { %v280_v15 = vadd.f32 %v278_v14, %v270_v13 }
 0x763   :  { %555 = vtanh.f32 %v280_v15 }
 0x770   :  { %v556_v16 = vpop.eup %555 }
 0x771   :  { %283 = vrot.lane.b32.xlu0 %v556_v16, %s590_s2 }
 0x7e3   :  { %v284_v17 = vpop.permute.xlu0 %283 }
 0x7e4   :  { %v286_v18 = vmul.f32 %v284_v17, %v269_v10 }
 0x7e6   :  { %v293_v20 = vpack.c.bf16 %v286_v18, %v286_v18 }
 0x7e8   :  { %295 = vrot.lane.b32.xlu1 %v293_v20, %s591_s25 }
 0x85a   :  { %v296_v21 = vpop.permute.xlu1 %295 }
 0x85b   :  { %512 = vmatmul.mubr.msk.bf16.vlgmr.msra.gmra.mxu1 %vm57_vm4, %v296_v21 }
 0x91b   :  { %v334_v26 = vpop.f32.mrf.mxu1 }
 0x91c   :  { %v340_v27 = vadd.f32 %v334_v26, %v292_v25 }
 0x91d   :  { %v513_v28 = vpop.f32.mrf.mxu1 }
 0x91e   :  { %v463_v29 = vmul.f32 -1.442695, %v340_v27 }
 0x91f   :  { %v337_v30 = vpop.f32.mrf.mxu1 }
 0x920   :  { %557 = vpow2.f32 %v463_v29 }
 0x921   :  { %v514_v31 = vpop.f32.mrf.mxu1  ;;  %559 = vtanh.f32 %v340_v27 }
 0x92d   :  { %v558_v32 = vpop.eup %557 }
 0x92e   :  { %v345_v33 = vadd.f32 1.0, %v558_v32  ;;  %v560_v34 = vpop.eup %559 }
 0x930   :  { %561 = vrcp.f32 %v345_v33 }
 0x93d   :  { %v562_v35 = vpop.eup %561 }
 0x93e   :  { %v348_v36 = vsel %vm662_vm3, %v560_v34, %v562_v35 }
 0x93f   :  { %351 = vrot.lane.b32.xlu0 %v348_v36, %s590_s2  ;;  %v349_v38 = vmul.f32 %v348_v36, %v280_v15 }
 0x9b1   :  { %v352_v37 = vpop.permute.xlu0 %351 }
 0x9b2   :  { %v354_v7 = vmul.f32 %v352_v37, %v348_v36 }
 0x9b4   :  { %356 = vrot.lane.b32.xlu1 %v354_v7, %s591_s25 }
 0xa26   :  { %v357_v39 = vpop.permute.xlu1 %356 }
 0xa27   :  { %v359_v40 = vadd.f32 %v357_v39, %v349_v38 }
 0xa29   :  { %563 = vtanh.f32 %v359_v40 }
 0xa36   :  { %v564_v42 = vpop.eup %563 }
 0xa37   :  { %362 = vrot.lane.b32.xlu0 %v564_v42, %s590_s2 }
 0xaa9   :  { %v363_v43 = vpop.permute.xlu0 %362 }
 0xaaa   :  { %v365_v44 = vmul.f32 %v363_v43, %v348_v36 }
 0xaac   :  { %v366_v45 = vpack.c.bf16 %v365_v44, %v365_v44 }
 0xaae   :  { %379 = vrot.lane.b32.xlu1 %v366_v45, %s591_s25 }
 0xb20   :  { %v380_v46 = vpop.permute.xlu1 %379 }
 0xb21   :  { %520 = vmatmul.mubr.msk.bf16.vlgmr.msra.gmra.mxu0 %vm57_vm4, %v380_v46 }
 0xbe1   :  { %v430_v48 = vpop.f32.mrf.mxu0 }
 0xbe2   :  { %v431_v1 = vadd.f32 %v464_v47, %v430_v48 }
 0xbe3   :  { %v521_v49 = vpop.f32.mrf.mxu0 }
 0xbe4   :  { %436 = vst [vmem:[#allocation2] sm:$0x3] %v431_v1 }
 0xbe5   :  { %v433_v50 = vpop.f32.mrf.mxu0 }
 0xbe6   :  { %576 = shalt.err (!%p573_p4)
}
 0xbe7   :  { %446 = dma.vmem_to_hbm [thread:$0]  %s444_s3, 32, %s731_s5, [#allocation3]   ;;  %v522_v51 = vpop.f32.mrf.mxu0 }
 0xbe8   :  { %585 = dma.done.wait [#allocation3], 32  }
 0xbe9   :  { %586 = vsyncadd [#allocation3], 4294967264 }
 0xbea   :  { %450 = vsyncpa [#allocation3], 1 }

</bundles_post_ra>
